<compile_context>
chip_gen: v7x
topology: tpu7x:2x2x1
jax: 0.10.0
libtpu: 0.0.40
codegen_flags: <defaults>
</compile_context>

<pallas_src>
import functools

import jax
import jax.numpy as jnp
from jax.experimental import pallas as pl
from jax.experimental.pallas import tpu as pltpu

# ---- synthetic "BERT" config (small, deterministic) -------------------------------------
VOCAB = 100
HIDDEN = 32
NUM_LAYERS = 4           # >= 3 so "last three hidden states" is meaningful
NUM_HEADS = 2
HEAD_DIM = HIDDEN // NUM_HEADS
INTERMEDIATE = 64
MAX_POS = 32
TYPE_VOCAB = 2
LN_EPS = 1e-12


# ---------------------------------- fused Pallas kernel ----------------------------------
def _fused_encoder_kernel(emb_ref, mask_ref, eg_ref, eb_ref,
                          wqkv_ref, bqkv_ref, wo_ref, bo_ref,
                          ln1g_ref, ln1b_ref, wi_ref, bi_ref,
                          wf_ref, bf_ref, ln2g_ref, ln2b_ref,
                          out_ref, *, batch, seq):
    """Entire BERT-style encoder in one kernel.

    emb_ref : [B*S, H]  f32   summed word+pos+type embeddings
    mask_ref: [B, 1, S] f32   additive attention-mask bias (0 / -1e4)
    weights : stacked along a leading layer dim; matmul weights are bf16, everything else f32
    out_ref : [B, 3*H]  f32   cat(hidden[-1], hidden[-2], hidden[-3])[:, 0]
    """

    def layernorm(x, g, b):
        mu = jnp.mean(x, axis=-1, keepdims=True)
        var = jnp.mean(jnp.square(x - mu), axis=-1, keepdims=True)
        return (x - mu) * jax.lax.rsqrt(var + LN_EPS) * g + b

    def mxu(x, w):
        # bf16 operands into the MXU, f32 accumulation.
        return jnp.dot(x.astype(jnp.bfloat16), w.astype(jnp.bfloat16),
                       preferred_element_type=jnp.float32)

    def gelu(x):
        # TODO(synk): HF BERT's default intermediate activation is exact (erf) GELU; tanh
        # approximation used here (f32 on the VPU/EUP).
        c = 0.7978845608028654  # sqrt(2/pi)
        return 0.5 * x * (1.0 + jnp.tanh(c * (x + 0.044715 * x * x * x)))

    mask = mask_ref[...]                                    # [B, 1, S]

    def attention(x, l):
        # Fused QKV projection; 1/sqrt(Dh) already folded into wq/bq on the host.
        qkv = mxu(x, wqkv_ref[l]) + bqkv_ref[l]             # [B*S, 3H] f32
        ctx_heads = []
        for hd in range(NUM_HEADS):                         # static unroll over heads
            q = qkv[:, hd * HEAD_DIM:(hd + 1) * HEAD_DIM].reshape(batch, seq, HEAD_DIM)
            k = qkv[:, HIDDEN + hd * HEAD_DIM:HIDDEN + (hd + 1) * HEAD_DIM].reshape(batch, seq, HEAD_DIM)
            v = qkv[:, 2 * HIDDEN + hd * HEAD_DIM:2 * HIDDEN + (hd + 1) * HEAD_DIM].reshape(batch, seq, HEAD_DIM)
            s = jnp.einsum('bqd,bkd->bqk',
                           q.astype(jnp.bfloat16), k.astype(jnp.bfloat16),
                           preferred_element_type=jnp.float32)
            s = s + mask                                    # broadcast over query positions
            s = s - jnp.max(s, axis=-1, keepdims=True)
            p = jnp.exp(s)
            p = p * pl.reciprocal(jnp.sum(p, axis=-1, keepdims=True), approx=True)
            ctx = jnp.einsum('bqk,bkd->bqd',
                             p.astype(jnp.bfloat16), v.astype(jnp.bfloat16),
                             preferred_element_type=jnp.float32)
            ctx_heads.append(ctx.reshape(batch * seq, HEAD_DIM))
        ctx = jnp.concatenate(ctx_heads, axis=-1)           # [B*S, H]
        return mxu(ctx, wo_ref[l]) + bo_ref[l]

    def ffn(x, l):
        mid = gelu(mxu(x, wi_ref[l]) + bi_ref[l])
        return mxu(mid, wf_ref[l]) + bf_ref[l]

    cls_slabs = []                                          # collected in increasing hs index

    def maybe_collect(h, hs_index):
        # Keep only the CLS rows of the last three hidden states (no [L+1,B,S,H] stack).
        if hs_index >= NUM_LAYERS - 2:
            cls = jnp.concatenate([h[b * seq:b * seq + 1, :] for b in range(batch)], axis=0)
            cls_slabs.append(cls)                           # [B, H]

    # hidden_states[0] = LayerNorm(word + pos + type embeddings); no dummy-zeros residual.
    h = layernorm(emb_ref[...], eg_ref[...], eb_ref[...])
    maybe_collect(h, 0)

    for l in range(NUM_LAYERS):                             # statically unrolled layer loop
        h = layernorm(attention(h, l) + h, ln1g_ref[l], ln1b_ref[l])
        h = layernorm(ffn(h, l) + h, ln2g_ref[l], ln2b_ref[l])
        maybe_collect(h, l + 1)

    # torch.cat((hs[-1], hs[-2], hs[-3]), -1)[:, 0] -> single lane-contiguous store.
    out_ref[...] = jnp.concatenate(cls_slabs[::-1], axis=-1)


# ------------------------------- parameter initialization --------------------------------
def init_params(key):
    def nrm(k, shape, scale=0.02):
        return (scale * jax.random.normal(k, shape)).astype(jnp.float32)

    keys = jax.random.split(key, 3 + NUM_LAYERS * 6)
    it = iter(keys)
    params = {
        "word_emb": nrm(next(it), (VOCAB, HIDDEN)),
        "pos_emb": nrm(next(it), (MAX_POS, HIDDEN)),
        "type_emb": nrm(next(it), (TYPE_VOCAB, HIDDEN)),
        "emb_ln_g": jnp.ones((1, HIDDEN), jnp.float32),
        "emb_ln_b": jnp.zeros((1, HIDDEN), jnp.float32),
        "layers": [],
    }
    for _ in range(NUM_LAYERS):
        lp = {
            "wq": nrm(next(it), (HIDDEN, HIDDEN)), "bq": jnp.zeros((1, HIDDEN), jnp.float32),
            "wk": nrm(next(it), (HIDDEN, HIDDEN)), "bk": jnp.zeros((1, HIDDEN), jnp.float32),
            "wv": nrm(next(it), (HIDDEN, HIDDEN)), "bv": jnp.zeros((1, HIDDEN), jnp.float32),
            "wo": nrm(next(it), (HIDDEN, HIDDEN)), "bo": jnp.zeros((1, HIDDEN), jnp.float32),
            "ln1_g": jnp.ones((1, HIDDEN), jnp.float32),
            "ln1_b": jnp.zeros((1, HIDDEN), jnp.float32),
            "wi": nrm(next(it), (HIDDEN, INTERMEDIATE)),
            "bi": jnp.zeros((1, INTERMEDIATE), jnp.float32),
            "wf": nrm(next(it), (INTERMEDIATE, HIDDEN)),
            "bf": jnp.zeros((1, HIDDEN), jnp.float32),
            "ln2_g": jnp.ones((1, HIDDEN), jnp.float32),
            "ln2_b": jnp.zeros((1, HIDDEN), jnp.float32),
        }
        params["layers"].append(lp)
    return params


def pack_params(params):
    """Stack per-layer weights along a leading layer dim; fuse QKV; fold attn scale into wq/bq;
    cast matmul weights to bf16 (MXU operands)."""
    scale = 1.0 / (HEAD_DIM ** 0.5)
    layers = params["layers"]
    return {
        "emb_ln_g": params["emb_ln_g"],
        "emb_ln_b": params["emb_ln_b"],
        "wqkv": jnp.stack([jnp.concatenate([lp["wq"] * scale, lp["wk"], lp["wv"]], axis=1)
                           for lp in layers]).astype(jnp.bfloat16),          # [L, H, 3H]
        "bqkv": jnp.stack([jnp.concatenate([lp["bq"] * scale, lp["bk"], lp["bv"]], axis=1)
                           for lp in layers]),                               # [L, 1, 3H]
        "wo": jnp.stack([lp["wo"] for lp in layers]).astype(jnp.bfloat16),   # [L, H, H]
        "bo": jnp.stack([lp["bo"] for lp in layers]),
        "ln1_g": jnp.stack([lp["ln1_g"] for lp in layers]),
        "ln1_b": jnp.stack([lp["ln1_b"] for lp in layers]),
        "wi": jnp.stack([lp["wi"] for lp in layers]).astype(jnp.bfloat16),   # [L, H, I]
        "bi": jnp.stack([lp["bi"] for lp in layers]),
        "wf": jnp.stack([lp["wf"] for lp in layers]).astype(jnp.bfloat16),   # [L, I, H]
        "bf": jnp.stack([lp["bf"] for lp in layers]),
        "ln2_g": jnp.stack([lp["ln2_g"] for lp in layers]),
        "ln2_b": jnp.stack([lp["ln2_b"] for lp in layers]),
    }


# -------------------------------------- forward ------------------------------------------
def embedding_model_forward(params, input_ids, attention_mask, token_type_ids=None):
    B, S = input_ids.shape
    if token_type_ids is None:
        token_type_ids = jnp.zeros((B, S), dtype=jnp.int32)

    # Embedding-table gathers stay in plain JAX glue.
    # TODO(synk): the original loads a pretrained HF BERT checkpoint; weights here are synthetic
    # deterministic initializations with identical forward semantics.
    we = params["word_emb"][input_ids]                      # [B,S,H]
    pe = params["pos_emb"][jnp.arange(S)]                   # [S,H]
    te = params["type_emb"][token_type_ids]                 # [B,S,H]
    emb = (we + pe[None, :, :] + te).reshape(B * S, HIDDEN).astype(jnp.float32)

    # Additive attention-mask bias: 0 where attended, -1e4 where masked.  [B,1,S]
    mask_bias = ((1.0 - attention_mask.astype(jnp.float32)) * -10000.0)[:, None, :]

    packed = pack_params(params)

    vmem_spec = pl.BlockSpec(memory_space=pltpu.MemorySpace.VMEM)
    kernel = functools.partial(_fused_encoder_kernel, batch=B, seq=S)
    return pl.pallas_call(
        kernel,
        out_shape=jax.ShapeDtypeStruct((B, 3 * HIDDEN), jnp.float32),
        in_specs=[vmem_spec] * 16,
        out_specs=vmem_spec,
    )(emb, mask_bias,
      packed["emb_ln_g"], packed["emb_ln_b"],
      packed["wqkv"], packed["bqkv"], packed["wo"], packed["bo"],
      packed["ln1_g"], packed["ln1_b"], packed["wi"], packed["bi"],
      packed["wf"], packed["bf"], packed["ln2_g"], packed["ln2_b"])


# --------------------------------------- main ---------------------------------------------
if __name__ == "__main__":
    key = jax.random.PRNGKey(0)
    pkey, ikey = jax.random.split(key)
    params = init_params(pkey)

    B, S = 2, 8
    input_ids = jax.random.randint(ikey, (B, S), 0, VOCAB, dtype=jnp.int32)
    attention_mask = jnp.ones((B, S), dtype=jnp.int32)
    token_type_ids = jnp.zeros((B, S), dtype=jnp.int32)

    out = embedding_model_forward(params, input_ids, attention_mask, token_type_ids)
    out = jax.block_until_ready(out)
    assert out.shape == (B, 3 * HIDDEN), out.shape
    assert out.dtype == jnp.float32
    print("KERNEL_OK")
</pallas_src>

<mosaic_0001>
module attributes {stable_mosaic.version = 11 : i64} {
  func.func @_fused_encoder_kernel(%arg0: memref<16x32xf32, #tpu.memory_space<vmem>>, %arg1: memref<2x1x8xf32, #tpu.memory_space<vmem>>, %arg2: memref<1x32xf32, #tpu.memory_space<vmem>>, %arg3: memref<1x32xf32, #tpu.memory_space<vmem>>, %arg4: memref<4x32x96xbf16, #tpu.memory_space<vmem>>, %arg5: memref<4x1x96xf32, #tpu.memory_space<vmem>>, %arg6: memref<4x32x32xbf16, #tpu.memory_space<vmem>>, %arg7: memref<4x1x32xf32, #tpu.memory_space<vmem>>, %arg8: memref<4x1x32xf32, #tpu.memory_space<vmem>>, %arg9: memref<4x1x32xf32, #tpu.memory_space<vmem>>, %arg10: memref<4x32x64xbf16, #tpu.memory_space<vmem>>, %arg11: memref<4x1x64xf32, #tpu.memory_space<vmem>>, %arg12: memref<4x64x32xbf16, #tpu.memory_space<vmem>>, %arg13: memref<4x1x32xf32, #tpu.memory_space<vmem>>, %arg14: memref<4x1x32xf32, #tpu.memory_space<vmem>>, %arg15: memref<4x1x32xf32, #tpu.memory_space<vmem>>, %arg16: memref<2x96xf32, #tpu.memory_space<vmem>>) attributes {dimension_semantics = [], scalar_prefetch = 0 : i64, scratch_operands = 0 : i64, tpu.core_type = #tpu.core_type<tc>} {
    %c0 = arith.constant 0 : index
    %c0_0 = arith.constant 0 : index
    %c0_1 = arith.constant 0 : index
    %0 = vector.load %arg1[%c0, %c0_0, %c0_1] : memref<2x1x8xf32, #tpu.memory_space<vmem>>, vector<2x1x8xf32>
    %c0_2 = arith.constant 0 : index
    %c0_3 = arith.constant 0 : index
    %1 = vector.load %arg0[%c0_2, %c0_3] : memref<16x32xf32, #tpu.memory_space<vmem>>, vector<16x32xf32>
    %c0_4 = arith.constant 0 : index
    %c0_5 = arith.constant 0 : index
    %2 = vector.load %arg2[%c0_4, %c0_5] : memref<1x32xf32, #tpu.memory_space<vmem>>, vector<1x32xf32>
    %c0_6 = arith.constant 0 : index
    %c0_7 = arith.constant 0 : index
    %3 = vector.load %arg3[%c0_6, %c0_7] : memref<1x32xf32, #tpu.memory_space<vmem>>, vector<1x32xf32>
    %cst = arith.constant dense<0.000000e+00> : vector<16xf32>
    %4 = vector.multi_reduction <add>, %1, %cst [1] : vector<16x32xf32> to vector<16xf32>
    %5 = vector.shape_cast %4 : vector<16xf32> to vector<16x1xf32>
    %cst_8 = arith.constant 3.200000e+01 : f32
    %6 = vector.broadcast %cst_8 : f32 to vector<16x1xf32>
    %7 = arith.divf %5, %6 : vector<16x1xf32>
    %8 = vector.broadcast %7 : vector<16x1xf32> to vector<16x32xf32>
    %9 = arith.subf %1, %8 : vector<16x32xf32>
    %10 = arith.mulf %9, %9 : vector<16x32xf32>
    %cst_9 = arith.constant dense<0.000000e+00> : vector<16xf32>
    %11 = vector.multi_reduction <add>, %10, %cst_9 [1] : vector<16x32xf32> to vector<16xf32>
    %12 = vector.shape_cast %11 : vector<16xf32> to vector<16x1xf32>
    %cst_10 = arith.constant 3.200000e+01 : f32
    %13 = vector.broadcast %cst_10 : f32 to vector<16x1xf32>
    %14 = arith.divf %12, %13 : vector<16x1xf32>
    %15 = vector.broadcast %7 : vector<16x1xf32> to vector<16x32xf32>
    %16 = arith.subf %1, %15 : vector<16x32xf32>
    %cst_11 = arith.constant 9.99999996E-13 : f32
    %17 = vector.broadcast %cst_11 : f32 to vector<16x1xf32>
    %18 = arith.addf %14, %17 : vector<16x1xf32>
    %19 = math.rsqrt %18 : vector<16x1xf32>
    %20 = vector.broadcast %19 : vector<16x1xf32> to vector<16x32xf32>
    %21 = arith.mulf %16, %20 : vector<16x32xf32>
    %22 = vector.broadcast %2 : vector<1x32xf32> to vector<16x32xf32>
    %23 = arith.mulf %21, %22 : vector<16x32xf32>
    %24 = vector.broadcast %3 : vector<1x32xf32> to vector<16x32xf32>
    %25 = arith.addf %23, %24 : vector<16x32xf32>
    %c0_12 = arith.constant 0 : index
    %c0_13 = arith.constant 0 : index
    %c0_14 = arith.constant 0 : index
    %26 = vector.load %arg4[%c0_12, %c0_13, %c0_14] : memref<4x32x96xbf16, #tpu.memory_space<vmem>>, vector<1x32x96xbf16>
    %27 = vector.shape_cast %26 : vector<1x32x96xbf16> to vector<32x96xbf16>
    %28 = arith.truncf %25 : vector<16x32xf32> to vector<16x32xbf16>
    %cst_15 = arith.constant dense<0.000000e+00> : vector<16x96xf32>
    %29 = tpu.matmul %28, %27, %cst_15 {dimension_numbers = #tpu.dot_dimension_numbers<[1], [0], [0], [1], [0, 0, 1, 1], [], []>} : vector<16x32xbf16>, vector<32x96xbf16>, vector<16x96xf32> -> vector<16x96xf32>
    %c0_16 = arith.constant 0 : index
    %c0_17 = arith.constant 0 : index
    %c0_18 = arith.constant 0 : index
    %30 = vector.load %arg5[%c0_16, %c0_17, %c0_18] : memref<4x1x96xf32, #tpu.memory_space<vmem>>, vector<1x1x96xf32>
    %31 = vector.shape_cast %30 : vector<1x1x96xf32> to vector<1x96xf32>
    %32 = vector.broadcast %31 : vector<1x96xf32> to vector<16x96xf32>
    %33 = arith.addf %29, %32 : vector<16x96xf32>
    %34 = vector.extract_strided_slice %33 {offsets = [0, 0], sizes = [16, 16], strides = [1, 1]} : vector<16x96xf32> to vector<16x16xf32>
    %35 = vector.shape_cast %34 : vector<16x16xf32> to vector<2x8x16xf32>
    %36 = vector.extract_strided_slice %33 {offsets = [0, 32], sizes = [16, 16], strides = [1, 1]} : vector<16x96xf32> to vector<16x16xf32>
    %37 = vector.shape_cast %36 : vector<16x16xf32> to vector<2x8x16xf32>
    %38 = vector.extract_strided_slice %33 {offsets = [0, 64], sizes = [16, 16], strides = [1, 1]} : vector<16x96xf32> to vector<16x16xf32>
    %39 = vector.shape_cast %38 : vector<16x16xf32> to vector<2x8x16xf32>
    %40 = arith.truncf %35 : vector<2x8x16xf32> to vector<2x8x16xbf16>
    %41 = arith.truncf %37 : vector<2x8x16xf32> to vector<2x8x16xbf16>
    "tpu.trace_start"() <{level = 10 : i32, message = "bqd,bkd->bqk"}> : () -> ()
    %cst_19 = arith.constant dense<0.000000e+00> : vector<2x8x8xf32>
    %42 = tpu.matmul %40, %41, %cst_19 {dimension_numbers = #tpu.dot_dimension_numbers<[2], [2], [1], [1], [0, 0, 0, 1, 1, 1], [0], [0]>} : vector<2x8x16xbf16>, vector<2x8x16xbf16>, vector<2x8x8xf32> -> vector<2x8x8xf32>
    "tpu.trace_stop"() : () -> ()
    %43 = vector.broadcast %0 : vector<2x1x8xf32> to vector<2x8x8xf32>
    %44 = arith.addf %42, %43 : vector<2x8x8xf32>
    %cst_20 = arith.constant dense<0xFF800000> : vector<2x8xf32>
    %45 = vector.multi_reduction <maximumf>, %44, %cst_20 [2] : vector<2x8x8xf32> to vector<2x8xf32>
    %46 = vector.shape_cast %45 : vector<2x8xf32> to vector<2x8x1xf32>
    %47 = vector.broadcast %46 : vector<2x8x1xf32> to vector<2x8x8xf32>
    %48 = arith.subf %44, %47 : vector<2x8x8xf32>
    %49 = math.exp %48 : vector<2x8x8xf32>
    %cst_21 = arith.constant dense<0.000000e+00> : vector<2x8xf32>
    %50 = vector.multi_reduction <add>, %49, %cst_21 [2] : vector<2x8x8xf32> to vector<2x8xf32>
    %51 = vector.shape_cast %50 : vector<2x8xf32> to vector<2x8x1xf32>
    %52 = tpu.reciprocal %51 {approx = true} : vector<2x8x1xf32> -> vector<2x8x1xf32>
    %53 = vector.broadcast %52 : vector<2x8x1xf32> to vector<2x8x8xf32>
    %54 = arith.mulf %49, %53 : vector<2x8x8xf32>
    %55 = arith.truncf %54 : vector<2x8x8xf32> to vector<2x8x8xbf16>
    %56 = arith.truncf %39 : vector<2x8x16xf32> to vector<2x8x16xbf16>
    "tpu.trace_start"() <{level = 10 : i32, message = "bqk,bkd->bqd"}> : () -> ()
    %cst_22 = arith.constant dense<0.000000e+00> : vector<2x8x16xf32>
    %57 = tpu.matmul %55, %56, %cst_22 {dimension_numbers = #tpu.dot_dimension_numbers<[2], [1], [1], [2], [0, 0, 0, 1, 1, 2], [0], [0]>} : vector<2x8x8xbf16>, vector<2x8x16xbf16>, vector<2x8x16xf32> -> vector<2x8x16xf32>
    "tpu.trace_stop"() : () -> ()
    %58 = vector.shape_cast %57 : vector<2x8x16xf32> to vector<16x16xf32>
    %59 = vector.extract_strided_slice %33 {offsets = [0, 16], sizes = [16, 16], strides = [1, 1]} : vector<16x96xf32> to vector<16x16xf32>
    %60 = vector.shape_cast %59 : vector<16x16xf32> to vector<2x8x16xf32>
    %61 = vector.extract_strided_slice %33 {offsets = [0, 48], sizes = [16, 16], strides = [1, 1]} : vector<16x96xf32> to vector<16x16xf32>
    %62 = vector.shape_cast %61 : vector<16x16xf32> to vector<2x8x16xf32>
    %63 = vector.extract_strided_slice %33 {offsets = [0, 80], sizes = [16, 16], strides = [1, 1]} : vector<16x96xf32> to vector<16x16xf32>
    %64 = vector.shape_cast %63 : vector<16x16xf32> to vector<2x8x16xf32>
    %65 = arith.truncf %60 : vector<2x8x16xf32> to vector<2x8x16xbf16>
    %66 = arith.truncf %62 : vector<2x8x16xf32> to vector<2x8x16xbf16>
    "tpu.trace_start"() <{level = 10 : i32, message = "bqd,bkd->bqk"}> : () -> ()
    %cst_23 = arith.constant dense<0.000000e+00> : vector<2x8x8xf32>
    %67 = tpu.matmul %65, %66, %cst_23 {dimension_numbers = #tpu.dot_dimension_numbers<[2], [2], [1], [1], [0, 0, 0, 1, 1, 1], [0], [0]>} : vector<2x8x16xbf16>, vector<2x8x16xbf16>, vector<2x8x8xf32> -> vector<2x8x8xf32>
    "tpu.trace_stop"() : () -> ()
    %68 = vector.broadcast %0 : vector<2x1x8xf32> to vector<2x8x8xf32>
    %69 = arith.addf %67, %68 : vector<2x8x8xf32>
    %cst_24 = arith.constant dense<0xFF800000> : vector<2x8xf32>
    %70 = vector.multi_reduction <maximumf>, %69, %cst_24 [2] : vector<2x8x8xf32> to vector<2x8xf32>
    %71 = vector.shape_cast %70 : vector<2x8xf32> to vector<2x8x1xf32>
    %72 = vector.broadcast %71 : vector<2x8x1xf32> to vector<2x8x8xf32>
    %73 = arith.subf %69, %72 : vector<2x8x8xf32>
    %74 = math.exp %73 : vector<2x8x8xf32>
    %cst_25 = arith.constant dense<0.000000e+00> : vector<2x8xf32>
    %75 = vector.multi_reduction <add>, %74, %cst_25 [2] : vector<2x8x8xf32> to vector<2x8xf32>
    %76 = vector.shape_cast %75 : vector<2x8xf32> to vector<2x8x1xf32>
    %77 = tpu.reciprocal %76 {approx = true} : vector<2x8x1xf32> -> vector<2x8x1xf32>
    %78 = vector.broadcast %77 : vector<2x8x1xf32> to vector<2x8x8xf32>
    %79 = arith.mulf %74, %78 : vector<2x8x8xf32>
    %80 = arith.truncf %79 : vector<2x8x8xf32> to vector<2x8x8xbf16>
    %81 = arith.truncf %64 : vector<2x8x16xf32> to vector<2x8x16xbf16>
    "tpu.trace_start"() <{level = 10 : i32, message = "bqk,bkd->bqd"}> : () -> ()
    %cst_26 = arith.constant dense<0.000000e+00> : vector<2x8x16xf32>
    %82 = tpu.matmul %80, %81, %cst_26 {dimension_numbers = #tpu.dot_dimension_numbers<[2], [1], [1], [2], [0, 0, 0, 1, 1, 2], [0], [0]>} : vector<2x8x8xbf16>, vector<2x8x16xbf16>, vector<2x8x16xf32> -> vector<2x8x16xf32>
    "tpu.trace_stop"() : () -> ()
    %83 = vector.shape_cast %82 : vector<2x8x16xf32> to vector<16x16xf32>
    %84 = tpu.concatenate %58, %83 in 1 : vector<16x16xf32>, vector<16x16xf32> -> vector<16x32xf32>
    %c0_27 = arith.constant 0 : index
    %c0_28 = arith.constant 0 : index
    %c0_29 = arith.constant 0 : index
    %85 = vector.load %arg6[%c0_27, %c0_28, %c0_29] : memref<4x32x32xbf16, #tpu.memory_space<vmem>>, vector<1x32x32xbf16>
    %86 = vector.shape_cast %85 : vector<1x32x32xbf16> to vector<32x32xbf16>
    %87 = arith.truncf %84 : vector<16x32xf32> to vector<16x32xbf16>
    %cst_30 = arith.constant dense<0.000000e+00> : vector<16x32xf32>
    %88 = tpu.matmul %87, %86, %cst_30 {dimension_numbers = #tpu.dot_dimension_numbers<[1], [0], [0], [1], [0, 0, 1, 1], [], []>} : vector<16x32xbf16>, vector<32x32xbf16>, vector<16x32xf32> -> vector<16x32xf32>
    %c0_31 = arith.constant 0 : index
    %c0_32 = arith.constant 0 : index
    %c0_33 = arith.constant 0 : index
    %89 = vector.load %arg7[%c0_31, %c0_32, %c0_33] : memref<4x1x32xf32, #tpu.memory_space<vmem>>, vector<1x1x32xf32>
    %90 = vector.shape_cast %89 : vector<1x1x32xf32> to vector<1x32xf32>
    %91 = vector.broadcast %90 : vector<1x32xf32> to vector<16x32xf32>
    %92 = arith.addf %88, %91 : vector<16x32xf32>
    %93 = arith.addf %92, %25 : vector<16x32xf32>
    %c0_34 = arith.constant 0 : index
    %c0_35 = arith.constant 0 : index
    %c0_36 = arith.constant 0 : index
    %94 = vector.load %arg8[%c0_34, %c0_35, %c0_36] : memref<4x1x32xf32, #tpu.memory_space<vmem>>, vector<1x1x32xf32>
    %95 = vector.shape_cast %94 : vector<1x1x32xf32> to vector<1x32xf32>
    %c0_37 = arith.constant 0 : index
    %c0_38 = arith.constant 0 : index
    %c0_39 = arith.constant 0 : index
    %96 = vector.load %arg9[%c0_37, %c0_38, %c0_39] : memref<4x1x32xf32, #tpu.memory_space<vmem>>, vector<1x1x32xf32>
    %97 = vector.shape_cast %96 : vector<1x1x32xf32> to vector<1x32xf32>
    %cst_40 = arith.constant dense<0.000000e+00> : vector<16xf32>
    %98 = vector.multi_reduction <add>, %93, %cst_40 [1] : vector<16x32xf32> to vector<16xf32>
    %99 = vector.shape_cast %98 : vector<16xf32> to vector<16x1xf32>
    %cst_41 = arith.constant 3.200000e+01 : f32
    %100 = vector.broadcast %cst_41 : f32 to vector<16x1xf32>
    %101 = arith.divf %99, %100 : vector<16x1xf32>
    %102 = vector.broadcast %101 : vector<16x1xf32> to vector<16x32xf32>
    %103 = arith.subf %93, %102 : vector<16x32xf32>
    %104 = arith.mulf %103, %103 : vector<16x32xf32>
    %cst_42 = arith.constant dense<0.000000e+00> : vector<16xf32>
    %105 = vector.multi_reduction <add>, %104, %cst_42 [1] : vector<16x32xf32> to vector<16xf32>
    %106 = vector.shape_cast %105 : vector<16xf32> to vector<16x1xf32>
    %cst_43 = arith.constant 3.200000e+01 : f32
    %107 = vector.broadcast %cst_43 : f32 to vector<16x1xf32>
    %108 = arith.divf %106, %107 : vector<16x1xf32>
    %109 = vector.broadcast %101 : vector<16x1xf32> to vector<16x32xf32>
    %110 = arith.subf %93, %109 : vector<16x32xf32>
    %cst_44 = arith.constant 9.99999996E-13 : f32
    %111 = vector.broadcast %cst_44 : f32 to vector<16x1xf32>
    %112 = arith.addf %108, %111 : vector<16x1xf32>
    %113 = math.rsqrt %112 : vector<16x1xf32>
    %114 = vector.broadcast %113 : vector<16x1xf32> to vector<16x32xf32>
    %115 = arith.mulf %110, %114 : vector<16x32xf32>
    %116 = vector.broadcast %95 : vector<1x32xf32> to vector<16x32xf32>
    %117 = arith.mulf %115, %116 : vector<16x32xf32>
    %118 = vector.broadcast %97 : vector<1x32xf32> to vector<16x32xf32>
    %119 = arith.addf %117, %118 : vector<16x32xf32>
    %c0_45 = arith.constant 0 : index
    %c0_46 = arith.constant 0 : index
    %c0_47 = arith.constant 0 : index
    %120 = vector.load %arg10[%c0_45, %c0_46, %c0_47] : memref<4x32x64xbf16, #tpu.memory_space<vmem>>, vector<1x32x64xbf16>
    %121 = vector.shape_cast %120 : vector<1x32x64xbf16> to vector<32x64xbf16>
    %122 = arith.truncf %119 : vector<16x32xf32> to vector<16x32xbf16>
    %cst_48 = arith.constant dense<0.000000e+00> : vector<16x64xf32>
    %123 = tpu.matmul %122, %121, %cst_48 {dimension_numbers = #tpu.dot_dimension_numbers<[1], [0], [0], [1], [0, 0, 1, 1], [], []>} : vector<16x32xbf16>, vector<32x64xbf16>, vector<16x64xf32> -> vector<16x64xf32>
    %c0_49 = arith.constant 0 : index
    %c0_50 = arith.constant 0 : index
    %c0_51 = arith.constant 0 : index
    %124 = vector.load %arg11[%c0_49, %c0_50, %c0_51] : memref<4x1x64xf32, #tpu.memory_space<vmem>>, vector<1x1x64xf32>
    %125 = vector.shape_cast %124 : vector<1x1x64xf32> to vector<1x64xf32>
    %126 = vector.broadcast %125 : vector<1x64xf32> to vector<16x64xf32>
    %127 = arith.addf %123, %126 : vector<16x64xf32>
    %cst_52 = arith.constant 5.000000e-01 : f32
    %128 = vector.broadcast %cst_52 : f32 to vector<16x64xf32>
    %129 = arith.mulf %128, %127 : vector<16x64xf32>
    %cst_53 = arith.constant 4.471500e-02 : f32
    %130 = vector.broadcast %cst_53 : f32 to vector<16x64xf32>
    %131 = arith.mulf %130, %127 : vector<16x64xf32>
    %132 = arith.mulf %131, %127 : vector<16x64xf32>
    %133 = arith.mulf %132, %127 : vector<16x64xf32>
    %134 = arith.addf %127, %133 : vector<16x64xf32>
    %cst_54 = arith.constant 0.797884583 : f32
    %135 = vector.broadcast %cst_54 : f32 to vector<16x64xf32>
    %136 = arith.mulf %135, %134 : vector<16x64xf32>
    %137 = math.tanh %136 : vector<16x64xf32>
    %cst_55 = arith.constant 1.000000e+00 : f32
    %138 = vector.broadcast %cst_55 : f32 to vector<16x64xf32>
    %139 = arith.addf %138, %137 : vector<16x64xf32>
    %140 = arith.mulf %129, %139 : vector<16x64xf32>
    %c0_56 = arith.constant 0 : index
    %c0_57 = arith.constant 0 : index
    %c0_58 = arith.constant 0 : index
    %141 = vector.load %arg12[%c0_56, %c0_57, %c0_58] : memref<4x64x32xbf16, #tpu.memory_space<vmem>>, vector<1x64x32xbf16>
    %142 = vector.shape_cast %141 : vector<1x64x32xbf16> to vector<64x32xbf16>
    %143 = arith.truncf %140 : vector<16x64xf32> to vector<16x64xbf16>
    %cst_59 = arith.constant dense<0.000000e+00> : vector<16x32xf32>
    %144 = tpu.matmul %143, %142, %cst_59 {dimension_numbers = #tpu.dot_dimension_numbers<[1], [0], [0], [1], [0, 0, 1, 1], [], []>} : vector<16x64xbf16>, vector<64x32xbf16>, vector<16x32xf32> -> vector<16x32xf32>
    %c0_60 = arith.constant 0 : index
    %c0_61 = arith.constant 0 : index
    %c0_62 = arith.constant 0 : index
    %145 = vector.load %arg13[%c0_60, %c0_61, %c0_62] : memref<4x1x32xf32, #tpu.memory_space<vmem>>, vector<1x1x32xf32>
    %146 = vector.shape_cast %145 : vector<1x1x32xf32> to vector<1x32xf32>
    %147 = vector.broadcast %146 : vector<1x32xf32> to vector<16x32xf32>
    %148 = arith.addf %144, %147 : vector<16x32xf32>
    %149 = arith.addf %148, %119 : vector<16x32xf32>
    %c0_63 = arith.constant 0 : index
    %c0_64 = arith.constant 0 : index
    %c0_65 = arith.constant 0 : index
    %150 = vector.load %arg14[%c0_63, %c0_64, %c0_65] : memref<4x1x32xf32, #tpu.memory_space<vmem>>, vector<1x1x32xf32>
    %151 = vector.shape_cast %150 : vector<1x1x32xf32> to vector<1x32xf32>
    %c0_66 = arith.constant 0 : index
    %c0_67 = arith.constant 0 : index
    %c0_68 = arith.constant 0 : index
    %152 = vector.load %arg15[%c0_66, %c0_67, %c0_68] : memref<4x1x32xf32, #tpu.memory_space<vmem>>, vector<1x1x32xf32>
    %153 = vector.shape_cast %152 : vector<1x1x32xf32> to vector<1x32xf32>
    %cst_69 = arith.constant dense<0.000000e+00> : vector<16xf32>
    %154 = vector.multi_reduction <add>, %149, %cst_69 [1] : vector<16x32xf32> to vector<16xf32>
    %155 = vector.shape_cast %154 : vector<16xf32> to vector<16x1xf32>
    %cst_70 = arith.constant 3.200000e+01 : f32
    %156 = vector.broadcast %cst_70 : f32 to vector<16x1xf32>
    %157 = arith.divf %155, %156 : vector<16x1xf32>
    %158 = vector.broadcast %157 : vector<16x1xf32> to vector<16x32xf32>
    %159 = arith.subf %149, %158 : vector<16x32xf32>
    %160 = arith.mulf %159, %159 : vector<16x32xf32>
    %cst_71 = arith.constant dense<0.000000e+00> : vector<16xf32>
    %161 = vector.multi_reduction <add>, %160, %cst_71 [1] : vector<16x32xf32> to vector<16xf32>
    %162 = vector.shape_cast %161 : vector<16xf32> to vector<16x1xf32>
    %cst_72 = arith.constant 3.200000e+01 : f32
    %163 = vector.broadcast %cst_72 : f32 to vector<16x1xf32>
    %164 = arith.divf %162, %163 : vector<16x1xf32>
    %165 = vector.broadcast %157 : vector<16x1xf32> to vector<16x32xf32>
    %166 = arith.subf %149, %165 : vector<16x32xf32>
    %cst_73 = arith.constant 9.99999996E-13 : f32
    %167 = vector.broadcast %cst_73 : f32 to vector<16x1xf32>
    %168 = arith.addf %164, %167 : vector<16x1xf32>
    %169 = math.rsqrt %168 : vector<16x1xf32>
    %170 = vector.broadcast %169 : vector<16x1xf32> to vector<16x32xf32>
    %171 = arith.mulf %166, %170 : vector<16x32xf32>
    %172 = vector.broadcast %151 : vector<1x32xf32> to vector<16x32xf32>
    %173 = arith.mulf %171, %172 : vector<16x32xf32>
    %174 = vector.broadcast %153 : vector<1x32xf32> to vector<16x32xf32>
    %175 = arith.addf %173, %174 : vector<16x32xf32>
    %c1 = arith.constant 1 : index
    %c0_74 = arith.constant 0 : index
    %c0_75 = arith.constant 0 : index
    %176 = vector.load %arg4[%c1, %c0_74, %c0_75] : memref<4x32x96xbf16, #tpu.memory_space<vmem>>, vector<1x32x96xbf16>
    %177 = vector.shape_cast %176 : vector<1x32x96xbf16> to vector<32x96xbf16>
    %178 = arith.truncf %175 : vector<16x32xf32> to vector<16x32xbf16>
    %cst_76 = arith.constant dense<0.000000e+00> : vector<16x96xf32>
    %179 = tpu.matmul %178, %177, %cst_76 {dimension_numbers = #tpu.dot_dimension_numbers<[1], [0], [0], [1], [0, 0, 1, 1], [], []>} : vector<16x32xbf16>, vector<32x96xbf16>, vector<16x96xf32> -> vector<16x96xf32>
    %c1_77 = arith.constant 1 : index
    %c0_78 = arith.constant 0 : index
    %c0_79 = arith.constant 0 : index
    %180 = vector.load %arg5[%c1_77, %c0_78, %c0_79] : memref<4x1x96xf32, #tpu.memory_space<vmem>>, vector<1x1x96xf32>
    %181 = vector.shape_cast %180 : vector<1x1x96xf32> to vector<1x96xf32>
    %182 = vector.broadcast %181 : vector<1x96xf32> to vector<16x96xf32>
    %183 = arith.addf %179, %182 : vector<16x96xf32>
    %184 = vector.extract_strided_slice %183 {offsets = [0, 0], sizes = [16, 16], strides = [1, 1]} : vector<16x96xf32> to vector<16x16xf32>
    %185 = vector.shape_cast %184 : vector<16x16xf32> to vector<2x8x16xf32>
    %186 = vector.extract_strided_slice %183 {offsets = [0, 32], sizes = [16, 16], strides = [1, 1]} : vector<16x96xf32> to vector<16x16xf32>
    %187 = vector.shape_cast %186 : vector<16x16xf32> to vector<2x8x16xf32>
    %188 = vector.extract_strided_slice %183 {offsets = [0, 64], sizes = [16, 16], strides = [1, 1]} : vector<16x96xf32> to vector<16x16xf32>
    %189 = vector.shape_cast %188 : vector<16x16xf32> to vector<2x8x16xf32>
    %190 = arith.truncf %185 : vector<2x8x16xf32> to vector<2x8x16xbf16>
    %191 = arith.truncf %187 : vector<2x8x16xf32> to vector<2x8x16xbf16>
    "tpu.trace_start"() <{level = 10 : i32, message = "bqd,bkd->bqk"}> : () -> ()
    %cst_80 = arith.constant dense<0.000000e+00> : vector<2x8x8xf32>
    %192 = tpu.matmul %190, %191, %cst_80 {dimension_numbers = #tpu.dot_dimension_numbers<[2], [2], [1], [1], [0, 0, 0, 1, 1, 1], [0], [0]>} : vector<2x8x16xbf16>, vector<2x8x16xbf16>, vector<2x8x8xf32> -> vector<2x8x8xf32>
    "tpu.trace_stop"() : () -> ()
    %193 = vector.broadcast %0 : vector<2x1x8xf32> to vector<2x8x8xf32>
    %194 = arith.addf %192, %193 : vector<2x8x8xf32>
    %cst_81 = arith.constant dense<0xFF800000> : vector<2x8xf32>
    %195 = vector.multi_reduction <maximumf>, %194, %cst_81 [2] : vector<2x8x8xf32> to vector<2x8xf32>
    %196 = vector.shape_cast %195 : vector<2x8xf32> to vector<2x8x1xf32>
    %197 = vector.broadcast %196 : vector<2x8x1xf32> to vector<2x8x8xf32>
    %198 = arith.subf %194, %197 : vector<2x8x8xf32>
    %199 = math.exp %198 : vector<2x8x8xf32>
    %cst_82 = arith.constant dense<0.000000e+00> : vector<2x8xf32>
    %200 = vector.multi_reduction <add>, %199, %cst_82 [2] : vector<2x8x8xf32> to vector<2x8xf32>
    %201 = vector.shape_cast %200 : vector<2x8xf32> to vector<2x8x1xf32>
    %202 = tpu.reciprocal %201 {approx = true} : vector<2x8x1xf32> -> vector<2x8x1xf32>
    %203 = vector.broadcast %202 : vector<2x8x1xf32> to vector<2x8x8xf32>
    %204 = arith.mulf %199, %203 : vector<2x8x8xf32>
    %205 = arith.truncf %204 : vector<2x8x8xf32> to vector<2x8x8xbf16>
    %206 = arith.truncf %189 : vector<2x8x16xf32> to vector<2x8x16xbf16>
    "tpu.trace_start"() <{level = 10 : i32, message = "bqk,bkd->bqd"}> : () -> ()
    %cst_83 = arith.constant dense<0.000000e+00> : vector<2x8x16xf32>
    %207 = tpu.matmul %205, %206, %cst_83 {dimension_numbers = #tpu.dot_dimension_numbers<[2], [1], [1], [2], [0, 0, 0, 1, 1, 2], [0], [0]>} : vector<2x8x8xbf16>, vector<2x8x16xbf16>, vector<2x8x16xf32> -> vector<2x8x16xf32>
    "tpu.trace_stop"() : () -> ()
    %208 = vector.shape_cast %207 : vector<2x8x16xf32> to vector<16x16xf32>
    %209 = vector.extract_strided_slice %183 {offsets = [0, 16], sizes = [16, 16], strides = [1, 1]} : vector<16x96xf32> to vector<16x16xf32>
    %210 = vector.shape_cast %209 : vector<16x16xf32> to vector<2x8x16xf32>
    %211 = vector.extract_strided_slice %183 {offsets = [0, 48], sizes = [16, 16], strides = [1, 1]} : vector<16x96xf32> to vector<16x16xf32>
    %212 = vector.shape_cast %211 : vector<16x16xf32> to vector<2x8x16xf32>
    %213 = vector.extract_strided_slice %183 {offsets = [0, 80], sizes = [16, 16], strides = [1, 1]} : vector<16x96xf32> to vector<16x16xf32>
    %214 = vector.shape_cast %213 : vector<16x16xf32> to vector<2x8x16xf32>
    %215 = arith.truncf %210 : vector<2x8x16xf32> to vector<2x8x16xbf16>
    %216 = arith.truncf %212 : vector<2x8x16xf32> to vector<2x8x16xbf16>
    "tpu.trace_start"() <{level = 10 : i32, message = "bqd,bkd->bqk"}> : () -> ()
    %cst_84 = arith.constant dense<0.000000e+00> : vector<2x8x8xf32>
    %217 = tpu.matmul %215, %216, %cst_84 {dimension_numbers = #tpu.dot_dimension_numbers<[2], [2], [1], [1], [0, 0, 0, 1, 1, 1], [0], [0]>} : vector<2x8x16xbf16>, vector<2x8x16xbf16>, vector<2x8x8xf32> -> vector<2x8x8xf32>
    "tpu.trace_stop"() : () -> ()
    %218 = vector.broadcast %0 : vector<2x1x8xf32> to vector<2x8x8xf32>
    %219 = arith.addf %217, %218 : vector<2x8x8xf32>
    %cst_85 = arith.constant dense<0xFF800000> : vector<2x8xf32>
    %220 = vector.multi_reduction <maximumf>, %219, %cst_85 [2] : vector<2x8x8xf32> to vector<2x8xf32>
    %221 = vector.shape_cast %220 : vector<2x8xf32> to vector<2x8x1xf32>
    %222 = vector.broadcast %221 : vector<2x8x1xf32> to vector<2x8x8xf32>
    %223 = arith.subf %219, %222 : vector<2x8x8xf32>
    %224 = math.exp %223 : vector<2x8x8xf32>
    %cst_86 = arith.constant dense<0.000000e+00> : vector<2x8xf32>
    %225 = vector.multi_reduction <add>, %224, %cst_86 [2] : vector<2x8x8xf32> to vector<2x8xf32>
    %226 = vector.shape_cast %225 : vector<2x8xf32> to vector<2x8x1xf32>
    %227 = tpu.reciprocal %226 {approx = true} : vector<2x8x1xf32> -> vector<2x8x1xf32>
    %228 = vector.broadcast %227 : vector<2x8x1xf32> to vector<2x8x8xf32>
    %229 = arith.mulf %224, %228 : vector<2x8x8xf32>
    %230 = arith.truncf %229 : vector<2x8x8xf32> to vector<2x8x8xbf16>
    %231 = arith.truncf %214 : vector<2x8x16xf32> to vector<2x8x16xbf16>
    "tpu.trace_start"() <{level = 10 : i32, message = "bqk,bkd->bqd"}> : () -> ()
    %cst_87 = arith.constant dense<0.000000e+00> : vector<2x8x16xf32>
    %232 = tpu.matmul %230, %231, %cst_87 {dimension_numbers = #tpu.dot_dimension_numbers<[2], [1], [1], [2], [0, 0, 0, 1, 1, 2], [0], [0]>} : vector<2x8x8xbf16>, vector<2x8x16xbf16>, vector<2x8x16xf32> -> vector<2x8x16xf32>
    "tpu.trace_stop"() : () -> ()
    %233 = vector.shape_cast %232 : vector<2x8x16xf32> to vector<16x16xf32>
    %234 = tpu.concatenate %208, %233 in 1 : vector<16x16xf32>, vector<16x16xf32> -> vector<16x32xf32>
    %c1_88 = arith.constant 1 : index
    %c0_89 = arith.constant 0 : index
    %c0_90 = arith.constant 0 : index
    %235 = vector.load %arg6[%c1_88, %c0_89, %c0_90] : memref<4x32x32xbf16, #tpu.memory_space<vmem>>, vector<1x32x32xbf16>
    %236 = vector.shape_cast %235 : vector<1x32x32xbf16> to vector<32x32xbf16>
    %237 = arith.truncf %234 : vector<16x32xf32> to vector<16x32xbf16>
    %cst_91 = arith.constant dense<0.000000e+00> : vector<16x32xf32>
    %238 = tpu.matmul %237, %236, %cst_91 {dimension_numbers = #tpu.dot_dimension_numbers<[1], [0], [0], [1], [0, 0, 1, 1], [], []>} : vector<16x32xbf16>, vector<32x32xbf16>, vector<16x32xf32> -> vector<16x32xf32>
    %c1_92 = arith.constant 1 : index
    %c0_93 = arith.constant 0 : index
    %c0_94 = arith.constant 0 : index
    %239 = vector.load %arg7[%c1_92, %c0_93, %c0_94] : memref<4x1x32xf32, #tpu.memory_space<vmem>>, vector<1x1x32xf32>
    %240 = vector.shape_cast %239 : vector<1x1x32xf32> to vector<1x32xf32>
    %241 = vector.broadcast %240 : vector<1x32xf32> to vector<16x32xf32>
    %242 = arith.addf %238, %241 : vector<16x32xf32>
    %243 = arith.addf %242, %175 : vector<16x32xf32>
    %c1_95 = arith.constant 1 : index
    %c0_96 = arith.constant 0 : index
    %c0_97 = arith.constant 0 : index
    %244 = vector.load %arg8[%c1_95, %c0_96, %c0_97] : memref<4x1x32xf32, #tpu.memory_space<vmem>>, vector<1x1x32xf32>
    %245 = vector.shape_cast %244 : vector<1x1x32xf32> to vector<1x32xf32>
    %c1_98 = arith.constant 1 : index
    %c0_99 = arith.constant 0 : index
    %c0_100 = arith.constant 0 : index
    %246 = vector.load %arg9[%c1_98, %c0_99, %c0_100] : memref<4x1x32xf32, #tpu.memory_space<vmem>>, vector<1x1x32xf32>
    %247 = vector.shape_cast %246 : vector<1x1x32xf32> to vector<1x32xf32>
    %cst_101 = arith.constant dense<0.000000e+00> : vector<16xf32>
    %248 = vector.multi_reduction <add>, %243, %cst_101 [1] : vector<16x32xf32> to vector<16xf32>
    %249 = vector.shape_cast %248 : vector<16xf32> to vector<16x1xf32>
    %cst_102 = arith.constant 3.200000e+01 : f32
    %250 = vector.broadcast %cst_102 : f32 to vector<16x1xf32>
    %251 = arith.divf %249, %250 : vector<16x1xf32>
    %252 = vector.broadcast %251 : vector<16x1xf32> to vector<16x32xf32>
    %253 = arith.subf %243, %252 : vector<16x32xf32>
    %254 = arith.mulf %253, %253 : vector<16x32xf32>
    %cst_103 = arith.constant dense<0.000000e+00> : vector<16xf32>
    %255 = vector.multi_reduction <add>, %254, %cst_103 [1] : vector<16x32xf32> to vector<16xf32>
    %256 = vector.shape_cast %255 : vector<16xf32> to vector<16x1xf32>
    %cst_104 = arith.constant 3.200000e+01 : f32
    %257 = vector.broadcast %cst_104 : f32 to vector<16x1xf32>
    %258 = arith.divf %256, %257 : vector<16x1xf32>
    %259 = vector.broadcast %251 : vector<16x1xf32> to vector<16x32xf32>
    %260 = arith.subf %243, %259 : vector<16x32xf32>
    %cst_105 = arith.constant 9.99999996E-13 : f32
    %261 = vector.broadcast %cst_105 : f32 to vector<16x1xf32>
    %262 = arith.addf %258, %261 : vector<16x1xf32>
    %263 = math.rsqrt %262 : vector<16x1xf32>
    %264 = vector.broadcast %263 : vector<16x1xf32> to vector<16x32xf32>
    %265 = arith.mulf %260, %264 : vector<16x32xf32>
    %266 = vector.broadcast %245 : vector<1x32xf32> to vector<16x32xf32>
    %267 = arith.mulf %265, %266 : vector<16x32xf32>
    %268 = vector.broadcast %247 : vector<1x32xf32> to vector<16x32xf32>
    %269 = arith.addf %267, %268 : vector<16x32xf32>
    %c1_106 = arith.constant 1 : index
    %c0_107 = arith.constant 0 : index
    %c0_108 = arith.constant 0 : index
    %270 = vector.load %arg10[%c1_106, %c0_107, %c0_108] : memref<4x32x64xbf16, #tpu.memory_space<vmem>>, vector<1x32x64xbf16>
    %271 = vector.shape_cast %270 : vector<1x32x64xbf16> to vector<32x64xbf16>
    %272 = arith.truncf %269 : vector<16x32xf32> to vector<16x32xbf16>
    %cst_109 = arith.constant dense<0.000000e+00> : vector<16x64xf32>
    %273 = tpu.matmul %272, %271, %cst_109 {dimension_numbers = #tpu.dot_dimension_numbers<[1], [0], [0], [1], [0, 0, 1, 1], [], []>} : vector<16x32xbf16>, vector<32x64xbf16>, vector<16x64xf32> -> vector<16x64xf32>
    %c1_110 = arith.constant 1 : index
    %c0_111 = arith.constant 0 : index
    %c0_112 = arith.constant 0 : index
    %274 = vector.load %arg11[%c1_110, %c0_111, %c0_112] : memref<4x1x64xf32, #tpu.memory_space<vmem>>, vector<1x1x64xf32>
    %275 = vector.shape_cast %274 : vector<1x1x64xf32> to vector<1x64xf32>
    %276 = vector.broadcast %275 : vector<1x64xf32> to vector<16x64xf32>
    %277 = arith.addf %273, %276 : vector<16x64xf32>
    %cst_113 = arith.constant 5.000000e-01 : f32
    %278 = vector.broadcast %cst_113 : f32 to vector<16x64xf32>
    %279 = arith.mulf %278, %277 : vector<16x64xf32>
    %cst_114 = arith.constant 4.471500e-02 : f32
    %280 = vector.broadcast %cst_114 : f32 to vector<16x64xf32>
    %281 = arith.mulf %280, %277 : vector<16x64xf32>
    %282 = arith.mulf %281, %277 : vector<16x64xf32>
    %283 = arith.mulf %282, %277 : vector<16x64xf32>
    %284 = arith.addf %277, %283 : vector<16x64xf32>
    %cst_115 = arith.constant 0.797884583 : f32
    %285 = vector.broadcast %cst_115 : f32 to vector<16x64xf32>
    %286 = arith.mulf %285, %284 : vector<16x64xf32>
    %287 = math.tanh %286 : vector<16x64xf32>
    %cst_116 = arith.constant 1.000000e+00 : f32
    %288 = vector.broadcast %cst_116 : f32 to vector<16x64xf32>
    %289 = arith.addf %288, %287 : vector<16x64xf32>
    %290 = arith.mulf %279, %289 : vector<16x64xf32>
    %c1_117 = arith.constant 1 : index
    %c0_118 = arith.constant 0 : index
    %c0_119 = arith.constant 0 : index
    %291 = vector.load %arg12[%c1_117, %c0_118, %c0_119] : memref<4x64x32xbf16, #tpu.memory_space<vmem>>, vector<1x64x32xbf16>
    %292 = vector.shape_cast %291 : vector<1x64x32xbf16> to vector<64x32xbf16>
    %293 = arith.truncf %290 : vector<16x64xf32> to vector<16x64xbf16>
    %cst_120 = arith.constant dense<0.000000e+00> : vector<16x32xf32>
    %294 = tpu.matmul %293, %292, %cst_120 {dimension_numbers = #tpu.dot_dimension_numbers<[1], [0], [0], [1], [0, 0, 1, 1], [], []>} : vector<16x64xbf16>, vector<64x32xbf16>, vector<16x32xf32> -> vector<16x32xf32>
    %c1_121 = arith.constant 1 : index
    %c0_122 = arith.constant 0 : index
    %c0_123 = arith.constant 0 : index
    %295 = vector.load %arg13[%c1_121, %c0_122, %c0_123] : memref<4x1x32xf32, #tpu.memory_space<vmem>>, vector<1x1x32xf32>
    %296 = vector.shape_cast %295 : vector<1x1x32xf32> to vector<1x32xf32>
    %297 = vector.broadcast %296 : vector<1x32xf32> to vector<16x32xf32>
    %298 = arith.addf %294, %297 : vector<16x32xf32>
    %299 = arith.addf %298, %269 : vector<16x32xf32>
    %c1_124 = arith.constant 1 : index
    %c0_125 = arith.constant 0 : index
    %c0_126 = arith.constant 0 : index
    %300 = vector.load %arg14[%c1_124, %c0_125, %c0_126] : memref<4x1x32xf32, #tpu.memory_space<vmem>>, vector<1x1x32xf32>
    %301 = vector.shape_cast %300 : vector<1x1x32xf32> to vector<1x32xf32>
    %c1_127 = arith.constant 1 : index
    %c0_128 = arith.constant 0 : index
    %c0_129 = arith.constant 0 : index
    %302 = vector.load %arg15[%c1_127, %c0_128, %c0_129] : memref<4x1x32xf32, #tpu.memory_space<vmem>>, vector<1x1x32xf32>
    %303 = vector.shape_cast %302 : vector<1x1x32xf32> to vector<1x32xf32>
    %cst_130 = arith.constant dense<0.000000e+00> : vector<16xf32>
    %304 = vector.multi_reduction <add>, %299, %cst_130 [1] : vector<16x32xf32> to vector<16xf32>
    %305 = vector.shape_cast %304 : vector<16xf32> to vector<16x1xf32>
    %cst_131 = arith.constant 3.200000e+01 : f32
    %306 = vector.broadcast %cst_131 : f32 to vector<16x1xf32>
    %307 = arith.divf %305, %306 : vector<16x1xf32>
    %308 = vector.broadcast %307 : vector<16x1xf32> to vector<16x32xf32>
    %309 = arith.subf %299, %308 : vector<16x32xf32>
    %310 = arith.mulf %309, %309 : vector<16x32xf32>
    %cst_132 = arith.constant dense<0.000000e+00> : vector<16xf32>
    %311 = vector.multi_reduction <add>, %310, %cst_132 [1] : vector<16x32xf32> to vector<16xf32>
    %312 = vector.shape_cast %311 : vector<16xf32> to vector<16x1xf32>
    %cst_133 = arith.constant 3.200000e+01 : f32
    %313 = vector.broadcast %cst_133 : f32 to vector<16x1xf32>
    %314 = arith.divf %312, %313 : vector<16x1xf32>
    %315 = vector.broadcast %307 : vector<16x1xf32> to vector<16x32xf32>
    %316 = arith.subf %299, %315 : vector<16x32xf32>
    %cst_134 = arith.constant 9.99999996E-13 : f32
    %317 = vector.broadcast %cst_134 : f32 to vector<16x1xf32>
    %318 = arith.addf %314, %317 : vector<16x1xf32>
    %319 = math.rsqrt %318 : vector<16x1xf32>
    %320 = vector.broadcast %319 : vector<16x1xf32> to vector<16x32xf32>
    %321 = arith.mulf %316, %320 : vector<16x32xf32>
    %322 = vector.broadcast %301 : vector<1x32xf32> to vector<16x32xf32>
    %323 = arith.mulf %321, %322 : vector<16x32xf32>
    %324 = vector.broadcast %303 : vector<1x32xf32> to vector<16x32xf32>
    %325 = arith.addf %323, %324 : vector<16x32xf32>
    %326 = vector.extract_strided_slice %325 {offsets = [0, 0], sizes = [1, 32], strides = [1, 1]} : vector<16x32xf32> to vector<1x32xf32>
    %327 = vector.extract_strided_slice %325 {offsets = [8, 0], sizes = [1, 32], strides = [1, 1]} : vector<16x32xf32> to vector<1x32xf32>
    %328 = tpu.concatenate %326, %327 in 0 : vector<1x32xf32>, vector<1x32xf32> -> vector<2x32xf32>
    %c2 = arith.constant 2 : index
    %c0_135 = arith.constant 0 : index
    %c0_136 = arith.constant 0 : index
    %329 = vector.load %arg4[%c2, %c0_135, %c0_136] : memref<4x32x96xbf16, #tpu.memory_space<vmem>>, vector<1x32x96xbf16>
    %330 = vector.shape_cast %329 : vector<1x32x96xbf16> to vector<32x96xbf16>
    %331 = arith.truncf %325 : vector<16x32xf32> to vector<16x32xbf16>
    %cst_137 = arith.constant dense<0.000000e+00> : vector<16x96xf32>
    %332 = tpu.matmul %331, %330, %cst_137 {dimension_numbers = #tpu.dot_dimension_numbers<[1], [0], [0], [1], [0, 0, 1, 1], [], []>} : vector<16x32xbf16>, vector<32x96xbf16>, vector<16x96xf32> -> vector<16x96xf32>
    %c2_138 = arith.constant 2 : index
    %c0_139 = arith.constant 0 : index
    %c0_140 = arith.constant 0 : index
    %333 = vector.load %arg5[%c2_138, %c0_139, %c0_140] : memref<4x1x96xf32, #tpu.memory_space<vmem>>, vector<1x1x96xf32>
    %334 = vector.shape_cast %333 : vector<1x1x96xf32> to vector<1x96xf32>
    %335 = vector.broadcast %334 : vector<1x96xf32> to vector<16x96xf32>
    %336 = arith.addf %332, %335 : vector<16x96xf32>
    %337 = vector.extract_strided_slice %336 {offsets = [0, 0], sizes = [16, 16], strides = [1, 1]} : vector<16x96xf32> to vector<16x16xf32>
    %338 = vector.shape_cast %337 : vector<16x16xf32> to vector<2x8x16xf32>
    %339 = vector.extract_strided_slice %336 {offsets = [0, 32], sizes = [16, 16], strides = [1, 1]} : vector<16x96xf32> to vector<16x16xf32>
    %340 = vector.shape_cast %339 : vector<16x16xf32> to vector<2x8x16xf32>
    %341 = vector.extract_strided_slice %336 {offsets = [0, 64], sizes = [16, 16], strides = [1, 1]} : vector<16x96xf32> to vector<16x16xf32>
    %342 = vector.shape_cast %341 : vector<16x16xf32> to vector<2x8x16xf32>
    %343 = arith.truncf %338 : vector<2x8x16xf32> to vector<2x8x16xbf16>
    %344 = arith.truncf %340 : vector<2x8x16xf32> to vector<2x8x16xbf16>
    "tpu.trace_start"() <{level = 10 : i32, message = "bqd,bkd->bqk"}> : () -> ()
    %cst_141 = arith.constant dense<0.000000e+00> : vector<2x8x8xf32>
    %345 = tpu.matmul %343, %344, %cst_141 {dimension_numbers = #tpu.dot_dimension_numbers<[2], [2], [1], [1], [0, 0, 0, 1, 1, 1], [0], [0]>} : vector<2x8x16xbf16>, vector<2x8x16xbf16>, vector<2x8x8xf32> -> vector<2x8x8xf32>
    "tpu.trace_stop"() : () -> ()
    %346 = vector.broadcast %0 : vector<2x1x8xf32> to vector<2x8x8xf32>
    %347 = arith.addf %345, %346 : vector<2x8x8xf32>
    %cst_142 = arith.constant dense<0xFF800000> : vector<2x8xf32>
    %348 = vector.multi_reduction <maximumf>, %347, %cst_142 [2] : vector<2x8x8xf32> to vector<2x8xf32>
    %349 = vector.shape_cast %348 : vector<2x8xf32> to vector<2x8x1xf32>
    %350 = vector.broadcast %349 : vector<2x8x1xf32> to vector<2x8x8xf32>
    %351 = arith.subf %347, %350 : vector<2x8x8xf32>
    %352 = math.exp %351 : vector<2x8x8xf32>
    %cst_143 = arith.constant dense<0.000000e+00> : vector<2x8xf32>
    %353 = vector.multi_reduction <add>, %352, %cst_143 [2] : vector<2x8x8xf32> to vector<2x8xf32>
    %354 = vector.shape_cast %353 : vector<2x8xf32> to vector<2x8x1xf32>
    %355 = tpu.reciprocal %354 {approx = true} : vector<2x8x1xf32> -> vector<2x8x1xf32>
    %356 = vector.broadcast %355 : vector<2x8x1xf32> to vector<2x8x8xf32>
    %357 = arith.mulf %352, %356 : vector<2x8x8xf32>
    %358 = arith.truncf %357 : vector<2x8x8xf32> to vector<2x8x8xbf16>
    %359 = arith.truncf %342 : vector<2x8x16xf32> to vector<2x8x16xbf16>
    "tpu.trace_start"() <{level = 10 : i32, message = "bqk,bkd->bqd"}> : () -> ()
    %cst_144 = arith.constant dense<0.000000e+00> : vector<2x8x16xf32>
    %360 = tpu.matmul %358, %359, %cst_144 {dimension_numbers = #tpu.dot_dimension_numbers<[2], [1], [1], [2], [0, 0, 0, 1, 1, 2], [0], [0]>} : vector<2x8x8xbf16>, vector<2x8x16xbf16>, vector<2x8x16xf32> -> vector<2x8x16xf32>
    "tpu.trace_stop"() : () -> ()
    %361 = vector.shape_cast %360 : vector<2x8x16xf32> to vector<16x16xf32>
    %362 = vector.extract_strided_slice %336 {offsets = [0, 16], sizes = [16, 16], strides = [1, 1]} : vector<16x96xf32> to vector<16x16xf32>
    %363 = vector.shape_cast %362 : vector<16x16xf32> to vector<2x8x16xf32>
    %364 = vector.extract_strided_slice %336 {offsets = [0, 48], sizes = [16, 16], strides = [1, 1]} : vector<16x96xf32> to vector<16x16xf32>
    %365 = vector.shape_cast %364 : vector<16x16xf32> to vector<2x8x16xf32>
    %366 = vector.extract_strided_slice %336 {offsets = [0, 80], sizes = [16, 16], strides = [1, 1]} : vector<16x96xf32> to vector<16x16xf32>
    %367 = vector.shape_cast %366 : vector<16x16xf32> to vector<2x8x16xf32>
    %368 = arith.truncf %363 : vector<2x8x16xf32> to vector<2x8x16xbf16>
    %369 = arith.truncf %365 : vector<2x8x16xf32> to vector<2x8x16xbf16>
    "tpu.trace_start"() <{level = 10 : i32, message = "bqd,bkd->bqk"}> : () -> ()
    %cst_145 = arith.constant dense<0.000000e+00> : vector<2x8x8xf32>
    %370 = tpu.matmul %368, %369, %cst_145 {dimension_numbers = #tpu.dot_dimension_numbers<[2], [2], [1], [1], [0, 0, 0, 1, 1, 1], [0], [0]>} : vector<2x8x16xbf16>, vector<2x8x16xbf16>, vector<2x8x8xf32> -> vector<2x8x8xf32>
    "tpu.trace_stop"() : () -> ()
    %371 = vector.broadcast %0 : vector<2x1x8xf32> to vector<2x8x8xf32>
    %372 = arith.addf %370, %371 : vector<2x8x8xf32>
    %cst_146 = arith.constant dense<0xFF800000> : vector<2x8xf32>
    %373 = vector.multi_reduction <maximumf>, %372, %cst_146 [2] : vector<2x8x8xf32> to vector<2x8xf32>
    %374 = vector.shape_cast %373 : vector<2x8xf32> to vector<2x8x1xf32>
    %375 = vector.broadcast %374 : vector<2x8x1xf32> to vector<2x8x8xf32>
    %376 = arith.subf %372, %375 : vector<2x8x8xf32>
    %377 = math.exp %376 : vector<2x8x8xf32>
    %cst_147 = arith.constant dense<0.000000e+00> : vector<2x8xf32>
    %378 = vector.multi_reduction <add>, %377, %cst_147 [2] : vector<2x8x8xf32> to vector<2x8xf32>
    %379 = vector.shape_cast %378 : vector<2x8xf32> to vector<2x8x1xf32>
    %380 = tpu.reciprocal %379 {approx = true} : vector<2x8x1xf32> -> vector<2x8x1xf32>
    %381 = vector.broadcast %380 : vector<2x8x1xf32> to vector<2x8x8xf32>
    %382 = arith.mulf %377, %381 : vector<2x8x8xf32>
    %383 = arith.truncf %382 : vector<2x8x8xf32> to vector<2x8x8xbf16>
    %384 = arith.truncf %367 : vector<2x8x16xf32> to vector<2x8x16xbf16>
    "tpu.trace_start"() <{level = 10 : i32, message = "bqk,bkd->bqd"}> : () -> ()
    %cst_148 = arith.constant dense<0.000000e+00> : vector<2x8x16xf32>
    %385 = tpu.matmul %383, %384, %cst_148 {dimension_numbers = #tpu.dot_dimension_numbers<[2], [1], [1], [2], [0, 0, 0, 1, 1, 2], [0], [0]>} : vector<2x8x8xbf16>, vector<2x8x16xbf16>, vector<2x8x16xf32> -> vector<2x8x16xf32>
    "tpu.trace_stop"() : () -> ()
    %386 = vector.shape_cast %385 : vector<2x8x16xf32> to vector<16x16xf32>
    %387 = tpu.concatenate %361, %386 in 1 : vector<16x16xf32>, vector<16x16xf32> -> vector<16x32xf32>
    %c2_149 = arith.constant 2 : index
    %c0_150 = arith.constant 0 : index
    %c0_151 = arith.constant 0 : index
    %388 = vector.load %arg6[%c2_149, %c0_150, %c0_151] : memref<4x32x32xbf16, #tpu.memory_space<vmem>>, vector<1x32x32xbf16>
    %389 = vector.shape_cast %388 : vector<1x32x32xbf16> to vector<32x32xbf16>
    %390 = arith.truncf %387 : vector<16x32xf32> to vector<16x32xbf16>
    %cst_152 = arith.constant dense<0.000000e+00> : vector<16x32xf32>
    %391 = tpu.matmul %390, %389, %cst_152 {dimension_numbers = #tpu.dot_dimension_numbers<[1], [0], [0], [1], [0, 0, 1, 1], [], []>} : vector<16x32xbf16>, vector<32x32xbf16>, vector<16x32xf32> -> vector<16x32xf32>
    %c2_153 = arith.constant 2 : index
    %c0_154 = arith.constant 0 : index
    %c0_155 = arith.constant 0 : index
    %392 = vector.load %arg7[%c2_153, %c0_154, %c0_155] : memref<4x1x32xf32, #tpu.memory_space<vmem>>, vector<1x1x32xf32>
    %393 = vector.shape_cast %392 : vector<1x1x32xf32> to vector<1x32xf32>
    %394 = vector.broadcast %393 : vector<1x32xf32> to vector<16x32xf32>
    %395 = arith.addf %391, %394 : vector<16x32xf32>
    %396 = arith.addf %395, %325 : vector<16x32xf32>
    %c2_156 = arith.constant 2 : index
    %c0_157 = arith.constant 0 : index
    %c0_158 = arith.constant 0 : index
    %397 = vector.load %arg8[%c2_156, %c0_157, %c0_158] : memref<4x1x32xf32, #tpu.memory_space<vmem>>, vector<1x1x32xf32>
    %398 = vector.shape_cast %397 : vector<1x1x32xf32> to vector<1x32xf32>
    %c2_159 = arith.constant 2 : index
    %c0_160 = arith.constant 0 : index
    %c0_161 = arith.constant 0 : index
    %399 = vector.load %arg9[%c2_159, %c0_160, %c0_161] : memref<4x1x32xf32, #tpu.memory_space<vmem>>, vector<1x1x32xf32>
    %400 = vector.shape_cast %399 : vector<1x1x32xf32> to vector<1x32xf32>
    %cst_162 = arith.constant dense<0.000000e+00> : vector<16xf32>
    %401 = vector.multi_reduction <add>, %396, %cst_162 [1] : vector<16x32xf32> to vector<16xf32>
    %402 = vector.shape_cast %401 : vector<16xf32> to vector<16x1xf32>
    %cst_163 = arith.constant 3.200000e+01 : f32
    %403 = vector.broadcast %cst_163 : f32 to vector<16x1xf32>
    %404 = arith.divf %402, %403 : vector<16x1xf32>
    %405 = vector.broadcast %404 : vector<16x1xf32> to vector<16x32xf32>
    %406 = arith.subf %396, %405 : vector<16x32xf32>
    %407 = arith.mulf %406, %406 : vector<16x32xf32>
    %cst_164 = arith.constant dense<0.000000e+00> : vector<16xf32>
    %408 = vector.multi_reduction <add>, %407, %cst_164 [1] : vector<16x32xf32> to vector<16xf32>
    %409 = vector.shape_cast %408 : vector<16xf32> to vector<16x1xf32>
    %cst_165 = arith.constant 3.200000e+01 : f32
    %410 = vector.broadcast %cst_165 : f32 to vector<16x1xf32>
    %411 = arith.divf %409, %410 : vector<16x1xf32>
    %412 = vector.broadcast %404 : vector<16x1xf32> to vector<16x32xf32>
    %413 = arith.subf %396, %412 : vector<16x32xf32>
    %cst_166 = arith.constant 9.99999996E-13 : f32
    %414 = vector.broadcast %cst_166 : f32 to vector<16x1xf32>
    %415 = arith.addf %411, %414 : vector<16x1xf32>
    %416 = math.rsqrt %415 : vector<16x1xf32>
    %417 = vector.broadcast %416 : vector<16x1xf32> to vector<16x32xf32>
    %418 = arith.mulf %413, %417 : vector<16x32xf32>
    %419 = vector.broadcast %398 : vector<1x32xf32> to vector<16x32xf32>
    %420 = arith.mulf %418, %419 : vector<16x32xf32>
    %421 = vector.broadcast %400 : vector<1x32xf32> to vector<16x32xf32>
    %422 = arith.addf %420, %421 : vector<16x32xf32>
    %c2_167 = arith.constant 2 : index
    %c0_168 = arith.constant 0 : index
    %c0_169 = arith.constant 0 : index
    %423 = vector.load %arg10[%c2_167, %c0_168, %c0_169] : memref<4x32x64xbf16, #tpu.memory_space<vmem>>, vector<1x32x64xbf16>
    %424 = vector.shape_cast %423 : vector<1x32x64xbf16> to vector<32x64xbf16>
    %425 = arith.truncf %422 : vector<16x32xf32> to vector<16x32xbf16>
    %cst_170 = arith.constant dense<0.000000e+00> : vector<16x64xf32>
    %426 = tpu.matmul %425, %424, %cst_170 {dimension_numbers = #tpu.dot_dimension_numbers<[1], [0], [0], [1], [0, 0, 1, 1], [], []>} : vector<16x32xbf16>, vector<32x64xbf16>, vector<16x64xf32> -> vector<16x64xf32>
    %c2_171 = arith.constant 2 : index
    %c0_172 = arith.constant 0 : index
    %c0_173 = arith.constant 0 : index
    %427 = vector.load %arg11[%c2_171, %c0_172, %c0_173] : memref<4x1x64xf32, #tpu.memory_space<vmem>>, vector<1x1x64xf32>
    %428 = vector.shape_cast %427 : vector<1x1x64xf32> to vector<1x64xf32>
    %429 = vector.broadcast %428 : vector<1x64xf32> to vector<16x64xf32>
    %430 = arith.addf %426, %429 : vector<16x64xf32>
    %cst_174 = arith.constant 5.000000e-01 : f32
    %431 = vector.broadcast %cst_174 : f32 to vector<16x64xf32>
    %432 = arith.mulf %431, %430 : vector<16x64xf32>
    %cst_175 = arith.constant 4.471500e-02 : f32
    %433 = vector.broadcast %cst_175 : f32 to vector<16x64xf32>
    %434 = arith.mulf %433, %430 : vector<16x64xf32>
    %435 = arith.mulf %434, %430 : vector<16x64xf32>
    %436 = arith.mulf %435, %430 : vector<16x64xf32>
    %437 = arith.addf %430, %436 : vector<16x64xf32>
    %cst_176 = arith.constant 0.797884583 : f32
    %438 = vector.broadcast %cst_176 : f32 to vector<16x64xf32>
    %439 = arith.mulf %438, %437 : vector<16x64xf32>
    %440 = math.tanh %439 : vector<16x64xf32>
    %cst_177 = arith.constant 1.000000e+00 : f32
    %441 = vector.broadcast %cst_177 : f32 to vector<16x64xf32>
    %442 = arith.addf %441, %440 : vector<16x64xf32>
    %443 = arith.mulf %432, %442 : vector<16x64xf32>
    %c2_178 = arith.constant 2 : index
    %c0_179 = arith.constant 0 : index
    %c0_180 = arith.constant 0 : index
    %444 = vector.load %arg12[%c2_178, %c0_179, %c0_180] : memref<4x64x32xbf16, #tpu.memory_space<vmem>>, vector<1x64x32xbf16>
    %445 = vector.shape_cast %444 : vector<1x64x32xbf16> to vector<64x32xbf16>
    %446 = arith.truncf %443 : vector<16x64xf32> to vector<16x64xbf16>
    %cst_181 = arith.constant dense<0.000000e+00> : vector<16x32xf32>
    %447 = tpu.matmul %446, %445, %cst_181 {dimension_numbers = #tpu.dot_dimension_numbers<[1], [0], [0], [1], [0, 0, 1, 1], [], []>} : vector<16x64xbf16>, vector<64x32xbf16>, vector<16x32xf32> -> vector<16x32xf32>
    %c2_182 = arith.constant 2 : index
    %c0_183 = arith.constant 0 : index
    %c0_184 = arith.constant 0 : index
    %448 = vector.load %arg13[%c2_182, %c0_183, %c0_184] : memref<4x1x32xf32, #tpu.memory_space<vmem>>, vector<1x1x32xf32>
    %449 = vector.shape_cast %448 : vector<1x1x32xf32> to vector<1x32xf32>
    %450 = vector.broadcast %449 : vector<1x32xf32> to vector<16x32xf32>
    %451 = arith.addf %447, %450 : vector<16x32xf32>
    %452 = arith.addf %451, %422 : vector<16x32xf32>
    %c2_185 = arith.constant 2 : index
    %c0_186 = arith.constant 0 : index
    %c0_187 = arith.constant 0 : index
    %453 = vector.load %arg14[%c2_185, %c0_186, %c0_187] : memref<4x1x32xf32, #tpu.memory_space<vmem>>, vector<1x1x32xf32>
    %454 = vector.shape_cast %453 : vector<1x1x32xf32> to vector<1x32xf32>
    %c2_188 = arith.constant 2 : index
    %c0_189 = arith.constant 0 : index
    %c0_190 = arith.constant 0 : index
    %455 = vector.load %arg15[%c2_188, %c0_189, %c0_190] : memref<4x1x32xf32, #tpu.memory_space<vmem>>, vector<1x1x32xf32>
    %456 = vector.shape_cast %455 : vector<1x1x32xf32> to vector<1x32xf32>
    %cst_191 = arith.constant dense<0.000000e+00> : vector<16xf32>
    %457 = vector.multi_reduction <add>, %452, %cst_191 [1] : vector<16x32xf32> to vector<16xf32>
    %458 = vector.shape_cast %457 : vector<16xf32> to vector<16x1xf32>
    %cst_192 = arith.constant 3.200000e+01 : f32
    %459 = vector.broadcast %cst_192 : f32 to vector<16x1xf32>
    %460 = arith.divf %458, %459 : vector<16x1xf32>
    %461 = vector.broadcast %460 : vector<16x1xf32> to vector<16x32xf32>
    %462 = arith.subf %452, %461 : vector<16x32xf32>
    %463 = arith.mulf %462, %462 : vector<16x32xf32>
    %cst_193 = arith.constant dense<0.000000e+00> : vector<16xf32>
    %464 = vector.multi_reduction <add>, %463, %cst_193 [1] : vector<16x32xf32> to vector<16xf32>
    %465 = vector.shape_cast %464 : vector<16xf32> to vector<16x1xf32>
    %cst_194 = arith.constant 3.200000e+01 : f32
    %466 = vector.broadcast %cst_194 : f32 to vector<16x1xf32>
    %467 = arith.divf %465, %466 : vector<16x1xf32>
    %468 = vector.broadcast %460 : vector<16x1xf32> to vector<16x32xf32>
    %469 = arith.subf %452, %468 : vector<16x32xf32>
    %cst_195 = arith.constant 9.99999996E-13 : f32
    %470 = vector.broadcast %cst_195 : f32 to vector<16x1xf32>
    %471 = arith.addf %467, %470 : vector<16x1xf32>
    %472 = math.rsqrt %471 : vector<16x1xf32>
    %473 = vector.broadcast %472 : vector<16x1xf32> to vector<16x32xf32>
    %474 = arith.mulf %469, %473 : vector<16x32xf32>
    %475 = vector.broadcast %454 : vector<1x32xf32> to vector<16x32xf32>
    %476 = arith.mulf %474, %475 : vector<16x32xf32>
    %477 = vector.broadcast %456 : vector<1x32xf32> to vector<16x32xf32>
    %478 = arith.addf %476, %477 : vector<16x32xf32>
    %479 = vector.extract_strided_slice %478 {offsets = [0, 0], sizes = [1, 32], strides = [1, 1]} : vector<16x32xf32> to vector<1x32xf32>
    %480 = vector.extract_strided_slice %478 {offsets = [8, 0], sizes = [1, 32], strides = [1, 1]} : vector<16x32xf32> to vector<1x32xf32>
    %481 = tpu.concatenate %479, %480 in 0 : vector<1x32xf32>, vector<1x32xf32> -> vector<2x32xf32>
    %c3 = arith.constant 3 : index
    %c0_196 = arith.constant 0 : index
    %c0_197 = arith.constant 0 : index
    %482 = vector.load %arg4[%c3, %c0_196, %c0_197] : memref<4x32x96xbf16, #tpu.memory_space<vmem>>, vector<1x32x96xbf16>
    %483 = vector.shape_cast %482 : vector<1x32x96xbf16> to vector<32x96xbf16>
    %484 = arith.truncf %478 : vector<16x32xf32> to vector<16x32xbf16>
    %cst_198 = arith.constant dense<0.000000e+00> : vector<16x96xf32>
    %485 = tpu.matmul %484, %483, %cst_198 {dimension_numbers = #tpu.dot_dimension_numbers<[1], [0], [0], [1], [0, 0, 1, 1], [], []>} : vector<16x32xbf16>, vector<32x96xbf16>, vector<16x96xf32> -> vector<16x96xf32>
    %c3_199 = arith.constant 3 : index
    %c0_200 = arith.constant 0 : index
    %c0_201 = arith.constant 0 : index
    %486 = vector.load %arg5[%c3_199, %c0_200, %c0_201] : memref<4x1x96xf32, #tpu.memory_space<vmem>>, vector<1x1x96xf32>
    %487 = vector.shape_cast %486 : vector<1x1x96xf32> to vector<1x96xf32>
    %488 = vector.broadcast %487 : vector<1x96xf32> to vector<16x96xf32>
    %489 = arith.addf %485, %488 : vector<16x96xf32>
    %490 = vector.extract_strided_slice %489 {offsets = [0, 0], sizes = [16, 16], strides = [1, 1]} : vector<16x96xf32> to vector<16x16xf32>
    %491 = vector.shape_cast %490 : vector<16x16xf32> to vector<2x8x16xf32>
    %492 = vector.extract_strided_slice %489 {offsets = [0, 32], sizes = [16, 16], strides = [1, 1]} : vector<16x96xf32> to vector<16x16xf32>
    %493 = vector.shape_cast %492 : vector<16x16xf32> to vector<2x8x16xf32>
    %494 = vector.extract_strided_slice %489 {offsets = [0, 64], sizes = [16, 16], strides = [1, 1]} : vector<16x96xf32> to vector<16x16xf32>
    %495 = vector.shape_cast %494 : vector<16x16xf32> to vector<2x8x16xf32>
    %496 = arith.truncf %491 : vector<2x8x16xf32> to vector<2x8x16xbf16>
    %497 = arith.truncf %493 : vector<2x8x16xf32> to vector<2x8x16xbf16>
    "tpu.trace_start"() <{level = 10 : i32, message = "bqd,bkd->bqk"}> : () -> ()
    %cst_202 = arith.constant dense<0.000000e+00> : vector<2x8x8xf32>
    %498 = tpu.matmul %496, %497, %cst_202 {dimension_numbers = #tpu.dot_dimension_numbers<[2], [2], [1], [1], [0, 0, 0, 1, 1, 1], [0], [0]>} : vector<2x8x16xbf16>, vector<2x8x16xbf16>, vector<2x8x8xf32> -> vector<2x8x8xf32>
    "tpu.trace_stop"() : () -> ()
    %499 = vector.broadcast %0 : vector<2x1x8xf32> to vector<2x8x8xf32>
    %500 = arith.addf %498, %499 : vector<2x8x8xf32>
    %cst_203 = arith.constant dense<0xFF800000> : vector<2x8xf32>
    %501 = vector.multi_reduction <maximumf>, %500, %cst_203 [2] : vector<2x8x8xf32> to vector<2x8xf32>
    %502 = vector.shape_cast %501 : vector<2x8xf32> to vector<2x8x1xf32>
    %503 = vector.broadcast %502 : vector<2x8x1xf32> to vector<2x8x8xf32>
    %504 = arith.subf %500, %503 : vector<2x8x8xf32>
    %505 = math.exp %504 : vector<2x8x8xf32>
    %cst_204 = arith.constant dense<0.000000e+00> : vector<2x8xf32>
    %506 = vector.multi_reduction <add>, %505, %cst_204 [2] : vector<2x8x8xf32> to vector<2x8xf32>
    %507 = vector.shape_cast %506 : vector<2x8xf32> to vector<2x8x1xf32>
    %508 = tpu.reciprocal %507 {approx = true} : vector<2x8x1xf32> -> vector<2x8x1xf32>
    %509 = vector.broadcast %508 : vector<2x8x1xf32> to vector<2x8x8xf32>
    %510 = arith.mulf %505, %509 : vector<2x8x8xf32>
    %511 = arith.truncf %510 : vector<2x8x8xf32> to vector<2x8x8xbf16>
    %512 = arith.truncf %495 : vector<2x8x16xf32> to vector<2x8x16xbf16>
    "tpu.trace_start"() <{level = 10 : i32, message = "bqk,bkd->bqd"}> : () -> ()
    %cst_205 = arith.constant dense<0.000000e+00> : vector<2x8x16xf32>
    %513 = tpu.matmul %511, %512, %cst_205 {dimension_numbers = #tpu.dot_dimension_numbers<[2], [1], [1], [2], [0, 0, 0, 1, 1, 2], [0], [0]>} : vector<2x8x8xbf16>, vector<2x8x16xbf16>, vector<2x8x16xf32> -> vector<2x8x16xf32>
    "tpu.trace_stop"() : () -> ()
    %514 = vector.shape_cast %513 : vector<2x8x16xf32> to vector<16x16xf32>
    %515 = vector.extract_strided_slice %489 {offsets = [0, 16], sizes = [16, 16], strides = [1, 1]} : vector<16x96xf32> to vector<16x16xf32>
    %516 = vector.shape_cast %515 : vector<16x16xf32> to vector<2x8x16xf32>
    %517 = vector.extract_strided_slice %489 {offsets = [0, 48], sizes = [16, 16], strides = [1, 1]} : vector<16x96xf32> to vector<16x16xf32>
    %518 = vector.shape_cast %517 : vector<16x16xf32> to vector<2x8x16xf32>
    %519 = vector.extract_strided_slice %489 {offsets = [0, 80], sizes = [16, 16], strides = [1, 1]} : vector<16x96xf32> to vector<16x16xf32>
    %520 = vector.shape_cast %519 : vector<16x16xf32> to vector<2x8x16xf32>
    %521 = arith.truncf %516 : vector<2x8x16xf32> to vector<2x8x16xbf16>
    %522 = arith.truncf %518 : vector<2x8x16xf32> to vector<2x8x16xbf16>
    "tpu.trace_start"() <{level = 10 : i32, message = "bqd,bkd->bqk"}> : () -> ()
    %cst_206 = arith.constant dense<0.000000e+00> : vector<2x8x8xf32>
    %523 = tpu.matmul %521, %522, %cst_206 {dimension_numbers = #tpu.dot_dimension_numbers<[2], [2], [1], [1], [0, 0, 0, 1, 1, 1], [0], [0]>} : vector<2x8x16xbf16>, vector<2x8x16xbf16>, vector<2x8x8xf32> -> vector<2x8x8xf32>
    "tpu.trace_stop"() : () -> ()
    %524 = vector.broadcast %0 : vector<2x1x8xf32> to vector<2x8x8xf32>
    %525 = arith.addf %523, %524 : vector<2x8x8xf32>
    %cst_207 = arith.constant dense<0xFF800000> : vector<2x8xf32>
    %526 = vector.multi_reduction <maximumf>, %525, %cst_207 [2] : vector<2x8x8xf32> to vector<2x8xf32>
    %527 = vector.shape_cast %526 : vector<2x8xf32> to vector<2x8x1xf32>
    %528 = vector.broadcast %527 : vector<2x8x1xf32> to vector<2x8x8xf32>
    %529 = arith.subf %525, %528 : vector<2x8x8xf32>
    %530 = math.exp %529 : vector<2x8x8xf32>
    %cst_208 = arith.constant dense<0.000000e+00> : vector<2x8xf32>
    %531 = vector.multi_reduction <add>, %530, %cst_208 [2] : vector<2x8x8xf32> to vector<2x8xf32>
    %532 = vector.shape_cast %531 : vector<2x8xf32> to vector<2x8x1xf32>
    %533 = tpu.reciprocal %532 {approx = true} : vector<2x8x1xf32> -> vector<2x8x1xf32>
    %534 = vector.broadcast %533 : vector<2x8x1xf32> to vector<2x8x8xf32>
    %535 = arith.mulf %530, %534 : vector<2x8x8xf32>
    %536 = arith.truncf %535 : vector<2x8x8xf32> to vector<2x8x8xbf16>
    %537 = arith.truncf %520 : vector<2x8x16xf32> to vector<2x8x16xbf16>
    "tpu.trace_start"() <{level = 10 : i32, message = "bqk,bkd->bqd"}> : () -> ()
    %cst_209 = arith.constant dense<0.000000e+00> : vector<2x8x16xf32>
    %538 = tpu.matmul %536, %537, %cst_209 {dimension_numbers = #tpu.dot_dimension_numbers<[2], [1], [1], [2], [0, 0, 0, 1, 1, 2], [0], [0]>} : vector<2x8x8xbf16>, vector<2x8x16xbf16>, vector<2x8x16xf32> -> vector<2x8x16xf32>
    "tpu.trace_stop"() : () -> ()
    %539 = vector.shape_cast %538 : vector<2x8x16xf32> to vector<16x16xf32>
    %540 = tpu.concatenate %514, %539 in 1 : vector<16x16xf32>, vector<16x16xf32> -> vector<16x32xf32>
    %c3_210 = arith.constant 3 : index
    %c0_211 = arith.constant 0 : index
    %c0_212 = arith.constant 0 : index
    %541 = vector.load %arg6[%c3_210, %c0_211, %c0_212] : memref<4x32x32xbf16, #tpu.memory_space<vmem>>, vector<1x32x32xbf16>
    %542 = vector.shape_cast %541 : vector<1x32x32xbf16> to vector<32x32xbf16>
    %543 = arith.truncf %540 : vector<16x32xf32> to vector<16x32xbf16>
    %cst_213 = arith.constant dense<0.000000e+00> : vector<16x32xf32>
    %544 = tpu.matmul %543, %542, %cst_213 {dimension_numbers = #tpu.dot_dimension_numbers<[1], [0], [0], [1], [0, 0, 1, 1], [], []>} : vector<16x32xbf16>, vector<32x32xbf16>, vector<16x32xf32> -> vector<16x32xf32>
    %c3_214 = arith.constant 3 : index
    %c0_215 = arith.constant 0 : index
    %c0_216 = arith.constant 0 : index
    %545 = vector.load %arg7[%c3_214, %c0_215, %c0_216] : memref<4x1x32xf32, #tpu.memory_space<vmem>>, vector<1x1x32xf32>
    %546 = vector.shape_cast %545 : vector<1x1x32xf32> to vector<1x32xf32>
    %547 = vector.broadcast %546 : vector<1x32xf32> to vector<16x32xf32>
    %548 = arith.addf %544, %547 : vector<16x32xf32>
    %549 = arith.addf %548, %478 : vector<16x32xf32>
    %c3_217 = arith.constant 3 : index
    %c0_218 = arith.constant 0 : index
    %c0_219 = arith.constant 0 : index
    %550 = vector.load %arg8[%c3_217, %c0_218, %c0_219] : memref<4x1x32xf32, #tpu.memory_space<vmem>>, vector<1x1x32xf32>
    %551 = vector.shape_cast %550 : vector<1x1x32xf32> to vector<1x32xf32>
    %c3_220 = arith.constant 3 : index
    %c0_221 = arith.constant 0 : index
    %c0_222 = arith.constant 0 : index
    %552 = vector.load %arg9[%c3_220, %c0_221, %c0_222] : memref<4x1x32xf32, #tpu.memory_space<vmem>>, vector<1x1x32xf32>
    %553 = vector.shape_cast %552 : vector<1x1x32xf32> to vector<1x32xf32>
    %cst_223 = arith.constant dense<0.000000e+00> : vector<16xf32>
    %554 = vector.multi_reduction <add>, %549, %cst_223 [1] : vector<16x32xf32> to vector<16xf32>
    %555 = vector.shape_cast %554 : vector<16xf32> to vector<16x1xf32>
    %cst_224 = arith.constant 3.200000e+01 : f32
    %556 = vector.broadcast %cst_224 : f32 to vector<16x1xf32>
    %557 = arith.divf %555, %556 : vector<16x1xf32>
    %558 = vector.broadcast %557 : vector<16x1xf32> to vector<16x32xf32>
    %559 = arith.subf %549, %558 : vector<16x32xf32>
    %560 = arith.mulf %559, %559 : vector<16x32xf32>
    %cst_225 = arith.constant dense<0.000000e+00> : vector<16xf32>
    %561 = vector.multi_reduction <add>, %560, %cst_225 [1] : vector<16x32xf32> to vector<16xf32>
    %562 = vector.shape_cast %561 : vector<16xf32> to vector<16x1xf32>
    %cst_226 = arith.constant 3.200000e+01 : f32
    %563 = vector.broadcast %cst_226 : f32 to vector<16x1xf32>
    %564 = arith.divf %562, %563 : vector<16x1xf32>
    %565 = vector.broadcast %557 : vector<16x1xf32> to vector<16x32xf32>
    %566 = arith.subf %549, %565 : vector<16x32xf32>
    %cst_227 = arith.constant 9.99999996E-13 : f32
    %567 = vector.broadcast %cst_227 : f32 to vector<16x1xf32>
    %568 = arith.addf %564, %567 : vector<16x1xf32>
    %569 = math.rsqrt %568 : vector<16x1xf32>
    %570 = vector.broadcast %569 : vector<16x1xf32> to vector<16x32xf32>
    %571 = arith.mulf %566, %570 : vector<16x32xf32>
    %572 = vector.broadcast %551 : vector<1x32xf32> to vector<16x32xf32>
    %573 = arith.mulf %571, %572 : vector<16x32xf32>
    %574 = vector.broadcast %553 : vector<1x32xf32> to vector<16x32xf32>
    %575 = arith.addf %573, %574 : vector<16x32xf32>
    %c3_228 = arith.constant 3 : index
    %c0_229 = arith.constant 0 : index
    %c0_230 = arith.constant 0 : index
    %576 = vector.load %arg10[%c3_228, %c0_229, %c0_230] : memref<4x32x64xbf16, #tpu.memory_space<vmem>>, vector<1x32x64xbf16>
    %577 = vector.shape_cast %576 : vector<1x32x64xbf16> to vector<32x64xbf16>
    %578 = arith.truncf %575 : vector<16x32xf32> to vector<16x32xbf16>
    %cst_231 = arith.constant dense<0.000000e+00> : vector<16x64xf32>
    %579 = tpu.matmul %578, %577, %cst_231 {dimension_numbers = #tpu.dot_dimension_numbers<[1], [0], [0], [1], [0, 0, 1, 1], [], []>} : vector<16x32xbf16>, vector<32x64xbf16>, vector<16x64xf32> -> vector<16x64xf32>
    %c3_232 = arith.constant 3 : index
    %c0_233 = arith.constant 0 : index
    %c0_234 = arith.constant 0 : index
    %580 = vector.load %arg11[%c3_232, %c0_233, %c0_234] : memref<4x1x64xf32, #tpu.memory_space<vmem>>, vector<1x1x64xf32>
    %581 = vector.shape_cast %580 : vector<1x1x64xf32> to vector<1x64xf32>
    %582 = vector.broadcast %581 : vector<1x64xf32> to vector<16x64xf32>
    %583 = arith.addf %579, %582 : vector<16x64xf32>
    %cst_235 = arith.constant 5.000000e-01 : f32
    %584 = vector.broadcast %cst_235 : f32 to vector<16x64xf32>
    %585 = arith.mulf %584, %583 : vector<16x64xf32>
    %cst_236 = arith.constant 4.471500e-02 : f32
    %586 = vector.broadcast %cst_236 : f32 to vector<16x64xf32>
    %587 = arith.mulf %586, %583 : vector<16x64xf32>
    %588 = arith.mulf %587, %583 : vector<16x64xf32>
    %589 = arith.mulf %588, %583 : vector<16x64xf32>
    %590 = arith.addf %583, %589 : vector<16x64xf32>
    %cst_237 = arith.constant 0.797884583 : f32
    %591 = vector.broadcast %cst_237 : f32 to vector<16x64xf32>
    %592 = arith.mulf %591, %590 : vector<16x64xf32>
    %593 = math.tanh %592 : vector<16x64xf32>
    %cst_238 = arith.constant 1.000000e+00 : f32
    %594 = vector.broadcast %cst_238 : f32 to vector<16x64xf32>
    %595 = arith.addf %594, %593 : vector<16x64xf32>
    %596 = arith.mulf %585, %595 : vector<16x64xf32>
    %c3_239 = arith.constant 3 : index
    %c0_240 = arith.constant 0 : index
    %c0_241 = arith.constant 0 : index
    %597 = vector.load %arg12[%c3_239, %c0_240, %c0_241] : memref<4x64x32xbf16, #tpu.memory_space<vmem>>, vector<1x64x32xbf16>
    %598 = vector.shape_cast %597 : vector<1x64x32xbf16> to vector<64x32xbf16>
    %599 = arith.truncf %596 : vector<16x64xf32> to vector<16x64xbf16>
    %cst_242 = arith.constant dense<0.000000e+00> : vector<16x32xf32>
    %600 = tpu.matmul %599, %598, %cst_242 {dimension_numbers = #tpu.dot_dimension_numbers<[1], [0], [0], [1], [0, 0, 1, 1], [], []>} : vector<16x64xbf16>, vector<64x32xbf16>, vector<16x32xf32> -> vector<16x32xf32>
    %c3_243 = arith.constant 3 : index
    %c0_244 = arith.constant 0 : index
    %c0_245 = arith.constant 0 : index
    %601 = vector.load %arg13[%c3_243, %c0_244, %c0_245] : memref<4x1x32xf32, #tpu.memory_space<vmem>>, vector<1x1x32xf32>
    %602 = vector.shape_cast %601 : vector<1x1x32xf32> to vector<1x32xf32>
    %603 = vector.broadcast %602 : vector<1x32xf32> to vector<16x32xf32>
    %604 = arith.addf %600, %603 : vector<16x32xf32>
    %605 = arith.addf %604, %575 : vector<16x32xf32>
    %c3_246 = arith.constant 3 : index
    %c0_247 = arith.constant 0 : index
    %c0_248 = arith.constant 0 : index
    %606 = vector.load %arg14[%c3_246, %c0_247, %c0_248] : memref<4x1x32xf32, #tpu.memory_space<vmem>>, vector<1x1x32xf32>
    %607 = vector.shape_cast %606 : vector<1x1x32xf32> to vector<1x32xf32>
    %c3_249 = arith.constant 3 : index
    %c0_250 = arith.constant 0 : index
    %c0_251 = arith.constant 0 : index
    %608 = vector.load %arg15[%c3_249, %c0_250, %c0_251] : memref<4x1x32xf32, #tpu.memory_space<vmem>>, vector<1x1x32xf32>
    %609 = vector.shape_cast %608 : vector<1x1x32xf32> to vector<1x32xf32>
    %cst_252 = arith.constant dense<0.000000e+00> : vector<16xf32>
    %610 = vector.multi_reduction <add>, %605, %cst_252 [1] : vector<16x32xf32> to vector<16xf32>
    %611 = vector.shape_cast %610 : vector<16xf32> to vector<16x1xf32>
    %cst_253 = arith.constant 3.200000e+01 : f32
    %612 = vector.broadcast %cst_253 : f32 to vector<16x1xf32>
    %613 = arith.divf %611, %612 : vector<16x1xf32>
    %614 = vector.broadcast %613 : vector<16x1xf32> to vector<16x32xf32>
    %615 = arith.subf %605, %614 : vector<16x32xf32>
    %616 = arith.mulf %615, %615 : vector<16x32xf32>
    %cst_254 = arith.constant dense<0.000000e+00> : vector<16xf32>
    %617 = vector.multi_reduction <add>, %616, %cst_254 [1] : vector<16x32xf32> to vector<16xf32>
    %618 = vector.shape_cast %617 : vector<16xf32> to vector<16x1xf32>
    %cst_255 = arith.constant 3.200000e+01 : f32
    %619 = vector.broadcast %cst_255 : f32 to vector<16x1xf32>
    %620 = arith.divf %618, %619 : vector<16x1xf32>
    %621 = vector.broadcast %613 : vector<16x1xf32> to vector<16x32xf32>
    %622 = arith.subf %605, %621 : vector<16x32xf32>
    %cst_256 = arith.constant 9.99999996E-13 : f32
    %623 = vector.broadcast %cst_256 : f32 to vector<16x1xf32>
    %624 = arith.addf %620, %623 : vector<16x1xf32>
    %625 = math.rsqrt %624 : vector<16x1xf32>
    %626 = vector.broadcast %625 : vector<16x1xf32> to vector<16x32xf32>
    %627 = arith.mulf %622, %626 : vector<16x32xf32>
    %628 = vector.broadcast %607 : vector<1x32xf32> to vector<16x32xf32>
    %629 = arith.mulf %627, %628 : vector<16x32xf32>
    %630 = vector.broadcast %609 : vector<1x32xf32> to vector<16x32xf32>
    %631 = arith.addf %629, %630 : vector<16x32xf32>
    %632 = vector.extract_strided_slice %631 {offsets = [0, 0], sizes = [1, 32], strides = [1, 1]} : vector<16x32xf32> to vector<1x32xf32>
    %633 = vector.extract_strided_slice %631 {offsets = [8, 0], sizes = [1, 32], strides = [1, 1]} : vector<16x32xf32> to vector<1x32xf32>
    %634 = tpu.concatenate %632, %633 in 0 : vector<1x32xf32>, vector<1x32xf32> -> vector<2x32xf32>
    %635 = tpu.concatenate %634, %481, %328 in 1 : vector<2x32xf32>, vector<2x32xf32>, vector<2x32xf32> -> vector<2x96xf32>
    %c0_257 = arith.constant 0 : index
    %c0_258 = arith.constant 0 : index
    %636 = vector.load %arg16[%c0_257, %c0_258] : memref<2x96xf32, #tpu.memory_space<vmem>>, vector<2x96xf32>
    tpu.vector_store %arg16[%c0_257, %c0_258], %635 {strides = array<i32>} : memref<2x96xf32, #tpu.memory_space<vmem>>, vector<2x96xf32>,
    return
  }
}

</mosaic_0001>

<bundles_post_ra>
// kernel: tpu_custom_call.1
= control target key start
LH: loop header
LB: loop body
LE: loop exit
PB: predicated region body
PF: predicated region fallthrough
CT: control target
= control target key end

     0   :  { %s5483_s0 = inlined_call_operand.hbm [shape: f32[16,32], index: 0, kind: input, shape index: {}]   ;;  %s5484_s1 = inlined_call_operand.vmem [shape: f32[2,1,8], index: 1, kind: input, shape index: {}]   ;;  %s5485_s2 = inlined_call_operand.hbm [shape: f32[1,32], index: 2, kind: input, shape index: {}]   ;;  %s5486_s3 = inlined_call_operand.hbm [shape: f32[1,32], index: 3, kind: input, shape index: {}]   ;;  %s5487_s4 = inlined_call_operand.vmem [shape: bf16[4,32,96], index: 4, kind: input, shape index: {}]   ;;  %s5488_s5 = inlined_call_operand.vmem [shape: f32[4,1,96], index: 5, kind: input, shape index: {}]   ;;  %s5489_s6 = inlined_call_operand.vmem [shape: bf16[4,32,32], index: 6, kind: input, shape index: {}]   ;;  %s5490_s7 = inlined_call_operand.vmem [shape: f32[4,1,32], index: 7, kind: input, shape index: {}]   ;;  %s5491_s8 = inlined_call_operand.vmem [shape: f32[4,1,32], index: 8, kind: input, shape index: {}]   ;;  %s5492_s9 = inlined_call_operand.vmem [shape: f32[4,1,32], index: 9, kind: input, shape index: {}]   ;;  %s5493_s10 = inlined_call_operand.vmem [shape: bf16[4,32,64], index: 10, kind: input, shape index: {}]   ;;  %s5494_s11 = inlined_call_operand.vmem [shape: f32[4,1,64], index: 11, kind: input, shape index: {}]   ;;  %s5495_s12 = inlined_call_operand.vmem [shape: bf16[4,64,32], index: 12, kind: input, shape index: {}]   ;;  %s5496_s13 = inlined_call_operand.vmem [shape: f32[4,1,32], index: 13, kind: input, shape index: {}]   ;;  %s5497_s14 = inlined_call_operand.vmem [shape: f32[4,1,32], index: 14, kind: input, shape index: {}]   ;;  %s5498_s15 = inlined_call_operand.vmem [shape: f32[4,1,32], index: 15, kind: input, shape index: {}]   ;;  %s5499_s16 = inlined_call_operand.hbm [shape: f32[2,96], index: 16, kind: output, shape index: {}]  }
   0x1   :  { %5501 = sst [smem:[#allocation12_spill]] %s5483_s0 }
   0x2   :  { %21 = vsyncpa [#allocation3], 0 }
   0x3   :  { %22 = vsyncpa [#allocation6], 0 }
   0x4   :  { %23 = vsyncpa [#allocation4], 0  ;;  %s4578_s21 = smov [#allocation5]   ;;  %s4579_s23 = smov [#allocation2]  }
   0x5   :  { %s44_s22 = sshll.u32 %s4578_s21, 4  ;;  %s29_s24 = sshll.u32 %s4579_s23, 4  ;;  %s45_s22 = int_to_ptr.vmem [resolvable:$true] %s44_s22  ;;  %s4678_s24 = int_to_ptr.vmem [resolvable:$true] %s29_s24 }
   0x6   :  { %s4484_s27 = scalar_lea.hbm %s5485_s2, 16 }
   0x7   :  { %p4485_p0 = scmp.ne.s32.totalorder %s5485_s2, %s4484_s27  ;;  %p4488_p1 = scmp.lt.u32.totalorder %s4484_s27, %s5485_s2 }
   0x9   :  { %p4490_p2 = pnand %p4488_p1, %p4485_p0 }
   0xb   :  { %4493 = shalt.err (!%p4490_p2)
}
   0xc   :  { %s4494_s17 = scalar_lea.vmem %s45_s22, 16  ;;  %s4498_s18 = scalar_lea.vmem %s45_s22, 32 }
   0xd   :  { %p4495_p3 = scmp.ne.s32.totalorder %s45_s22, %s4494_s17  ;;  %p4499_p4 = scmp.lt.s32.totalorder %s45_s22, %s45_s22 }
   0xe   :  { %p4500_p5 = scmp.lt.s32.totalorder %s4498_s18, %s4494_s17 }
  0x10   :  { %p4501_p6 = por %p4500_p5, %p4499_p4 }
  0x12   :  { %p4502_p7 = pnand %p4501_p6, %p4495_p3 }
  0x14   :  { %4505 = shalt.err (!%p4502_p7)
}
  0x15   :  { %47 = dma.hbm_to_vmem [thread:$0]  %s5485_s2, 16, %s45_s22, [#allocation6]  }
  0x16   :  { %s5502_s25 = sld [smem:[#allocation12_spill]] }
  0x1c   :  { %s4506_s26 = scalar_lea.hbm %s5502_s25, 256 }
  0x1d   :  { %p4507_p8 = scmp.ne.s32.totalorder %s5502_s25, %s4506_s26  ;;  %p4510_p9 = scmp.lt.u32.totalorder %s4506_s26, %s5502_s25 }
  0x1f   :  { %p4512_p10 = pnand %p4510_p9, %p4507_p8 }
  0x21   :  { %4515 = shalt.err (!%p4512_p10)
}
  0x22   :  { %s4516_s0 = scalar_lea.vmem %s4678_s24, 256  ;;  %p4521_p12 = scmp.lt.s32.totalorder %s4678_s24, %s4678_s24 }
  0x23   :  { %p4517_p11 = scmp.ne.s32.totalorder %s4678_s24, %s4516_s0  ;;  %p4522_p13 = scmp.lt.s32.totalorder %s4516_s0, %s4516_s0 }
  0x25   :  { %p4523_p0 = por %p4522_p13, %p4521_p12 }
  0x27   :  { %p4524_p1 = pnand %p4523_p0, %p4517_p11 }
  0x29   :  { %4527 = shalt.err (!%p4524_p1)
}
  0x2a   :  { %s4580_s2 = smov 128   ;;  %s4581_s22 = smov 8  }
  0x2b   :  { %35 = dma.hbm_to_vmem [thread:$0]  %s5502_s25, 256, %s4678_s24, [#allocation3], %s4580_s2, %s4580_s2, %s4581_s22  }
  0x2c   :  { %s4582_s19 = smov [#allocation7]   ;;  %s4528_s26 = scalar_lea.hbm %s5486_s3, 16 }
  0x2d   :  { %s54_s20 = sshll.u32 %s4582_s19, 4  ;;  %p4529_p2 = scmp.ne.s32.totalorder %s5486_s3, %s4528_s26  ;;  %s55_s20 = int_to_ptr.vmem [resolvable:$true] %s54_s20 }
  0x2e   :  { %p4532_p3 = scmp.lt.u32.totalorder %s4528_s26, %s5486_s3 }
  0x30   :  { %p4534_p4 = pnand %p4532_p3, %p4529_p2 }
  0x32   :  { %4537 = shalt.err (!%p4534_p4)
}
  0x33   :  { %s4538_s0 = scalar_lea.vmem %s55_s20, 16  ;;  %s4542_s24 = scalar_lea.vmem %s55_s20, 32 }
  0x34   :  { %p4539_p5 = scmp.ne.s32.totalorder %s55_s20, %s4538_s0  ;;  %p4543_p6 = scmp.lt.s32.totalorder %s55_s20, %s55_s20 }
  0x35   :  { %p4544_p7 = scmp.lt.s32.totalorder %s4542_s24, %s4538_s0 }
  0x37   :  { %p4545_p8 = por %p4544_p7, %p4543_p6 }
  0x39   :  { %p4546_p9 = pnand %p4545_p8, %p4539_p5 }
  0x3b   :  { %4549 = shalt.err (!%p4546_p9)
}
  0x3c   :  { %57 = dma.hbm_to_vmem [thread:$0]  %s5486_s3, 16, %s55_s20, [#allocation6]  }
  0x3d   :  { %4572 = dma.done.wait [#allocation3], 256  }
  0x3e   :  { %4573 = vsyncadd [#allocation3], 4294967040 }
  0x3f   :  { %4574 = dma.done.wait [#allocation6], 32  }
  0x40   :  { %4575 = vsyncadd [#allocation6], 4294967264  ;;  %vm98_vm0 = vcmask 261120   ;;  %v94_v0 = vld [vmem:[#allocation2] sm:$0xff]  ;;  %v95_v1 = vld [vmem:[#allocation2 + $0x8] sm:$0xff]  ;;  %v4583_v15 = vmov 0.0  }
  0x41   :  { %v99_v2 = vsel %vm98_vm0, %v94_v0, 0.0  ;;  %v102_v3 = vsel %vm98_vm0, %v95_v1, 0.0  ;;  %v4326_v14 = vld [vmem:[%s5487_s4] sm:$0xff]   ;;  %3955 = vmatprep.subr.bf16.mxu1 %v4583_v15  ;;  %vm4584_vm1 = vmmov 0   ;;  %v4327_v16 = vld [vmem:[%s5487_s4 + $0x8] sm:$0xff]   ;;  %3969 = vmatprep.subr.bf16.mxu0 %v4583_v15  ;;  %s4585_s21 = smov 96  }
  0x42   :  { %100 = vadd.xlane.f32.xlu0 %v99_v2  ;;  %3959 = vmatprep.mubr.msk.bf16.mxu1 %vm4584_vm1, %v4583_v15  ;;  %v3627_v25 = vld [vmem:[#allocation5] ss:$0 sm:$0xff]  ;;  %v3628_v29 = vld [vmem:[#allocation7] ss:$0 sm:$0xff]  ;;  %v3629_v34 = vld [vmem:[%s5488_s5] ss:$0 sm:$0xff] }
  0x43   :  { %3956 = vmatpush3.bf16.msra.mxu1 %v4326_v14  ;;  %3971 = vmatprep.mubr.msk.bf16.mxu0 %vm4584_vm1, %v4583_v15  ;;  %vm227_vm2 = vcmask 130048   ;;  %v4774_v47 = vld [vmem:[%s5484_s1] ss:$0 sm:$0xff]  ;;  %v4779_v49 = vld [vmem:[%s5484_s1 + $0x1] ss:$0 sm:$0xff]  ;;  %vm323_vm3 = vcmask 64512  }
  0x44   :  { %3957 = vmatprep.subr.bf16.mxu1 %v4583_v15  ;;  %s4586_s29 = smov 64   ;;  %s4587_s30 = smov 80   ;;  %vm353_vm4 = vcmask 1043456   ;;  %vm915_vm5 = vcmask 523264   ;;  %vm1869_vm6 = vcmask 1040384   ;;  %vm3609_vm7 = vcmask 779264  }
  0x45   :  { %s4588_s0 = smov 112   ;;  %s4589_s24 = smov 48  }
  0x46   :  { %103 = vadd.xlane.f32.xlu0 %v102_v3  ;;  %s4590_s17 = smov 16  }
  0x47   :  { %3958 = vmatpush3.bf16.msra.mxu1 %v4327_v16 }
  0x48   :  { %3963 = vmatprep.subr.bf16.mxu1 %v4583_v15 }
  0xcf   :  { %v101_v4 = vpop.xlane.xlu0 %100 }
  0xd0   :  { %v106_v5 = vmul.f32 0.03125, %v101_v4 }
  0xd2   :  { %v108_v6 = vsub.f32 %v94_v0, %v106_v5 }
  0xd3   :  { %v104_v7 = vpop.xlane.xlu0 %103 }
  0xd4   :  { %v107_v8 = vmul.f32 0.03125, %v104_v7  ;;  %v110_v9 = vmul.f32 %v108_v6, %v108_v6 }
  0xd6   :  { %v109_v10 = vsub.f32 %v95_v1, %v107_v8  ;;  %v112_v11 = vsel %vm98_vm0, %v110_v9, 0.0 }
  0xd7   :  { %113 = vadd.xlane.f32.xlu1 %v112_v11 }
  0xd8   :  { %v111_v12 = vmul.f32 %v109_v10, %v109_v10 }
  0xda   :  { %v115_v13 = vsel %vm98_vm0, %v111_v12, 0.0 }
  0xdb   :  { %116 = vadd.xlane.f32.xlu1 %v115_v13 }
 0x164   :  { %v114_v17 = vpop.xlane.xlu1 %113 }
 0x165   :  { %v118_v18 = vmul.f32 0.03125, %v114_v17 }
 0x167   :  { %v120_v19 = vadd.f32 1e-12, %v118_v18 }
 0x168   :  { %v117_v20 = vpop.xlane.xlu1 %116 }
 0x169   :  { %4366 = vrsqrt.f32 %v120_v19  ;;  %v119_v21 = vmul.f32 0.03125, %v117_v20 }
 0x16b   :  { %v121_v22 = vadd.f32 1e-12, %v119_v21 }
 0x16d   :  { %4368 = vrsqrt.f32 %v121_v22 }
 0x173   :  { %v4367_v23 = vpop.eup %4366 }
 0x174   :  { %v124_v24 = vmul.f32 %v4367_v23, %v108_v6 }
 0x176   :  { %v132_v28 = vmul.f32 %v3627_v25, %v124_v24 }
 0x177   :  { %v4369_v26 = vpop.eup %4368 }
 0x178   :  { %v125_v27 = vmul.f32 %v4369_v26, %v109_v10  ;;  %v4739_v31 = vadd.f32 %v3628_v29, %v132_v28 }
 0x17a   :  { %v133_v30 = vmul.f32 %v3627_v25, %v125_v27 }
 0x17c   :  { %v4741_v32 = vadd.f32 %v3628_v29, %v133_v30 }
 0x17e   :  { %v146_v33 = vpack.c.bf16 %v4741_v32, %v4739_v31 }
 0x180   :  { %3960 = vmatmul.mubr.msk.bf16.vlgmr.msra.gmra.mrb[0].mxu1 %vm98_vm0, %v146_v33 }
 0x181   :  { %3965 = vmatprep.mubr.msk.bf16.mxu1 %vm4584_vm1, %v4583_v15 }
 0x253   :  { %v203_v35 = vpop.f32.mrb[0].mxu1 }
 0x254   :  { %v204_v36 = vadd.f32 %v3629_v34, %v203_v35  ;;  %v3961_v37 = vpop.f32.mrb[1].mxu1 }
 0x255   :  { %v206_v38 = vpop.f32.mrb[2].mxu1 }
 0x256   :  { %v4751_v39 = vpack.c.bf16 %v204_v36, %v204_v36  ;;  %v207_v40 = vadd.f32 %v3629_v34, %v206_v38  ;;  %v3962_v41 = vpop.f32.mrb[3].mxu1 }
 0x258   :  { %v4753_v42 = vpack.c.bf16 %v207_v40, %v207_v40  ;;  %225 = vrot.lane.b32.xlu0 %v4751_v39, %s4585_s21 }
 0x25a   :  { %275 = vrot.lane.b32.xlu1 %v4753_v42, %s4585_s21 }
 0x2ca   :  { %v226_v43 = vpop.permute.xlu0 %225 }
 0x2cb   :  { %v232_v44 = vsel %vm227_vm2, %v226_v43, 0 }
 0x2cc   :  { %3964 = vmatpush3.bf16.xpose.msra.mxu1 %v232_v44  ;;  %v276_v45 = vpop.permute.xlu1 %275 }
 0x2cd   :  { %v281_v46 = vsel %vm227_vm2, %v276_v45, 0  ;;  %3975 = vmatprep.subr.bf16.mxu1 %v4583_v15 }
 0x2ce   :  { %3970 = vmatpush3.bf16.xpose.msra.mxu0 %v281_v46 }
 0x2cf   :  { %3981 = vmatprep.subr.bf16.mxu0 %v4583_v15 }
 0x2d3   :  { %3966 = vmatmul.mubr.msk.bf16.vlgmr.msra.gmra.mrb[4].mxu1 %vm227_vm2, %v4751_v39 }
 0x2d4   :  { %3977 = vmatprep.mubr.msk.bf16.mxu1 %vm4584_vm1, %v4583_v15 }
 0x2d5   :  { %3972 = vmatmul.mubr.msk.bf16.vlgmr.msra.gmra.mrb[0].mxu0 %vm227_vm2, %v4753_v42 }
 0x2d6   :  { %3983 = vmatprep.mubr.msk.bf16.mxu0 %vm4584_vm1, %v4583_v15 }
 0x3a6   :  { %v268_v48 = vpop.f32.mrb[4].mxu1 }
 0x3a7   :  { %v269_v50 = vadd.f32 %v4774_v47, %v268_v48  ;;  %v3967_v51 = vpop.f32.mrb[5].mxu1 }
 0x3a8   :  { %v271_v52 = vpop.f32.mrb[6].mxu1  ;;  %v317_v53 = vpop.f32.mrb[0].mxu0 }
 0x3a9   :  { %v318_v54 = vadd.f32 %v4779_v49, %v317_v53  ;;  %v3968_v55 = vpop.f32.mrb[7].mxu1  ;;  %v3973_v56 = vpop.f32.mrb[1].mxu0  ;;  %v324_v57 = vsel %vm323_vm3, %v269_v50, -inf }
 0x3aa   :  { %v320_v58 = vpop.f32.mrb[2].mxu0  ;;  %325 = vmax.xlane.f32.xlu1 %v324_v57 }
 0x3ab   :  { %v3974_v59 = vpop.f32.mrb[3].mxu0  ;;  %v327_v60 = vsel %vm323_vm3, %v318_v54, -inf }
 0x3ac   :  { %328 = vmax.xlane.f32.xlu0 %v327_v60 }
 0x3bb   :  { %397 = vrot.lane.b32.xlu1 %v4753_v42, %s4586_s29 }
 0x3bf   :  { %447 = vrot.lane.b32.xlu1 %v4751_v39, %s4587_s30 }
 0x437   :  { %v326_v61 = vpop.xlane.xlu1 %325 }
 0x438   :  { %v330_v62 = vsub.f32 %v269_v50, %v326_v61 }
 0x439   :  { %v329_v63 = vpop.xlane.xlu0 %328 }
 0x43a   :  { %v332_v0 = vmul.f32 1.442695, %v330_v62  ;;  %v331_v1 = vsub.f32 %v318_v54, %v329_v63 }
 0x43b   :  { %v398_v2 = vpop.permute.xlu1 %397 }
 0x43c   :  { %4370 = vpow2.f32 %v332_v0  ;;  %v334_v3 = vmul.f32 1.442695, %v331_v1  ;;  %v403_v4 = vsel %vm353_vm4, %v398_v2, 0 }
 0x43d   :  { %3982 = vmatpush3.bf16.msra.mxu0 %v403_v4 }
 0x43e   :  { %4372 = vpow2.f32 %v334_v3  ;;  %3993 = vmatprep.subr.bf16.mxu0 %v4583_v15 }
 0x43f   :  { %v448_v9 = vpop.permute.xlu1 %447 }
 0x440   :  { %v453_v21 = vsel %vm227_vm2, %v448_v9, 0  ;;  %v4329_v9 = vld [vmem:[%s5489_s6 + $0x8] sm:$0xff]  }
 0x446   :  { %v4371_v5 = vpop.eup %4370 }
 0x447   :  { %v336_v6 = vsel %vm323_vm3, %v4371_v5, 0.0 }
 0x448   :  { %v4373_v7 = vpop.eup %4372  ;;  %337 = vadd.xlane.f32.xlu0 %v336_v6 }
 0x449   :  { %v339_v8 = vsel %vm323_vm3, %v4373_v7, 0.0 }
 0x44a   :  { %340 = vadd.xlane.f32.xlu1 %v339_v8  ;;  %v4328_v8 = vld [vmem:[%s5489_s6] sm:$0xff]  }
 0x45b   :  { %497 = vrot.lane.b32.xlu1 %v4753_v42, %s4587_s30 }
 0x45e   :  { %348 = vrot.lane.b32.xlu0 %v4751_v39, %s4586_s29 }
 0x45f   :  { %495 = vrot.lane.b32.xlu1 %v4753_v42, %s4588_s0 }
 0x462   :  { %445 = vrot.lane.b32.xlu0 %v4751_v39, %s4588_s0 }
 0x4d5   :  { %v338_v10 = vpop.xlane.xlu0 %337 }
 0x4d6   :  { %4374 = vrcp.f32 %v338_v10 }
 0x4d7   :  { %v341_v11 = vpop.xlane.xlu1 %340 }
 0x4d8   :  { %4376 = vrcp.f32 %v341_v11 }
 0x4d9   :  { %v349_v12 = vpop.permute.xlu0 %348 }
 0x4da   :  { %v355_v13 = vsel %vm353_vm4, %v349_v12, 0 }
 0x4db   :  { %3976 = vmatpush3.bf16.msra.mxu1 %v355_v13  ;;  %v498_v20 = vpop.permute.xlu1 %497 }
 0x4dc   :  { %3987 = vmatprep.subr.bf16.mxu1 %v4583_v15  ;;  %v503_v23 = vsel %vm227_vm2, %v498_v20, 0 }
 0x4dd   :  { %v446_v24 = vpop.permute.xlu0 %445 }
 0x4df   :  { %v496_v25 = vpop.permute.xlu1 %495 }
 0x4e0   :  { %v4375_v14 = vpop.eup %4374 }
 0x4e1   :  { %v344_v16 = vmul.f32 %v4375_v14, %v4371_v5 }
 0x4e2   :  { %v4377_v17 = vpop.eup %4376 }
 0x4e3   :  { %v346_v18 = vpack.c.bf16 %v344_v16, %v344_v16  ;;  %v345_v19 = vmul.f32 %v4377_v17, %v4373_v7 }
 0x4e5   :  { %3978 = vmatmul.mubr.msk.bf16.vlgmr.msra.gmra.mrb[8].mxu1 %vm323_vm3, %v346_v18  ;;  %v347_v22 = vpack.c.bf16 %v345_v19, %v345_v19 }
 0x4e6   :  { %3988 = vmatpush3.bf16.xpose.msra.mxu1 %v453_v21  ;;  %3989 = vmatprep.mubr.msk.bf16.mxu1 %vm4584_vm1, %v4583_v15 }
 0x4e7   :  { %3984 = vmatmul.mubr.msk.bf16.vlgmr.msra.gmra.mrb[4].mxu0 %vm323_vm3, %v347_v22  ;;  %3999 = vmatprep.subr.bf16.mxu1 %v4583_v15 }
 0x4e8   :  { %3994 = vmatpush3.bf16.xpose.msra.mxu0 %v503_v23  ;;  %3995 = vmatprep.mubr.msk.bf16.mxu0 %vm4584_vm1, %v4583_v15 }
 0x4e9   :  { %4005 = vmatprep.subr.bf16.mxu0 %v4583_v15 }
 0x4ed   :  { %3990 = vmatmul.mubr.msk.bf16.vlgmr.msra.gmra.mrb[12].mxu1 %vm227_vm2, %v446_v24 }
 0x4ee   :  { %4001 = vmatprep.mubr.msk.bf16.mxu1 %vm4584_vm1, %v4583_v15 }
 0x4ef   :  { %3996 = vmatmul.mubr.msk.bf16.vlgmr.msra.gmra.mrb[8].mxu0 %vm227_vm2, %v496_v25 }
 0x4f0   :  { %4007 = vmatprep.mubr.msk.bf16.mxu0 %vm4584_vm1, %v4583_v15 }
 0x5b8   :  { %v4819_v26 = vpop.f32.mrb[8].mxu1 }
 0x5b9   :  { %v3979_v27 = vpop.f32.mrb[9].mxu1 }
 0x5ba   :  { %v394_v28 = vpop.f32.mrb[10].mxu1  ;;  %v4821_v29 = vpop.f32.mrb[4].mxu0  ;;  %v3643_v27 = vld [vmem:[%s5490_s7] ss:$0 sm:$0xff] }
 0x5bb   :  { %v3980_v30 = vpop.f32.mrb[11].mxu1  ;;  %v3985_v33 = vpop.f32.mrb[5].mxu0 }
 0x5bc   :  { %v442_v34 = vpop.f32.mrb[6].mxu0 }
 0x5bd   :  { %v3986_v35 = vpop.f32.mrb[7].mxu0 }
 0x5c0   :  { %v489_v36 = vpop.f32.mrb[12].mxu1 }
 0x5c1   :  { %v490_v37 = vadd.f32 %v4774_v47, %v489_v36  ;;  %v3991_v38 = vpop.f32.mrb[13].mxu1 }
 0x5c2   :  { %v492_v40 = vpop.f32.mrb[14].mxu1  ;;  %v539_v41 = vpop.f32.mrb[8].mxu0 }
 0x5c3   :  { %v540_v43 = vadd.f32 %v4779_v49, %v539_v41  ;;  %v3992_v44 = vpop.f32.mrb[15].mxu1  ;;  %v3997_v45 = vpop.f32.mrb[9].mxu0  ;;  %v545_v46 = vsel %vm323_vm3, %v490_v37, -inf }
 0x5c4   :  { %546 = vmax.xlane.f32.xlu0 %v545_v46  ;;  %v542_v48 = vpop.f32.mrb[10].mxu0 }
 0x5c5   :  { %v3998_v50 = vpop.f32.mrb[11].mxu0  ;;  %v548_v51 = vsel %vm323_vm3, %v540_v43, -inf }
 0x5c6   :  { %549 = vmax.xlane.f32.xlu1 %v548_v51 }
 0x5d7   :  { %617 = vrot.lane.b32.xlu1 %v4753_v42, %s4589_s24 }
 0x651   :  { %v547_v52 = vpop.xlane.xlu0 %546 }
 0x652   :  { %v551_v53 = vsub.f32 %v490_v37, %v547_v52  ;;  %v4331_v52 = vld [vmem:[%s5493_s10 + $0x8] sm:$0xff]  }
 0x653   :  { %v550_v54 = vpop.xlane.xlu1 %549 }
 0x654   :  { %v553_v55 = vmul.f32 1.442695, %v551_v53  ;;  %v552_v56 = vsub.f32 %v540_v43, %v550_v54 }
 0x656   :  { %4378 = vpow2.f32 %v553_v55  ;;  %v555_v57 = vmul.f32 1.442695, %v552_v56 }
 0x657   :  { %v618_v58 = vpop.permute.xlu1 %617 }
 0x658   :  { %4380 = vpow2.f32 %v555_v57  ;;  %v623_v59 = vsel %vm353_vm4, %v618_v58, 0 }
 0x659   :  { %4006 = vmatpush3.bf16.msra.mxu0 %v623_v59 }
 0x65a   :  { %4019 = vmatprep.subr.bf16.mxu0 %v4583_v15 }
 0x660   :  { %v4379_v60 = vpop.eup %4378 }
 0x661   :  { %v557_v61 = vsel %vm323_vm3, %v4379_v60, 0.0 }
 0x662   :  { %v4381_v62 = vpop.eup %4380  ;;  %558 = vadd.xlane.f32.xlu0 %v557_v61  ;;  %v3647_v61 = vld [vmem:[%s5491_s8] ss:$0 sm:$0xff] }
 0x663   :  { %v560_v42 = vsel %vm323_vm3, %v4381_v62, 0.0 }
 0x666   :  { %561 = vadd.xlane.f32.xlu0 %v560_v42 }
 0x67c   :  { %569 = vrot.lane.b32.xlu0 %v4751_v39, %s4589_s24 }
 0x6ef   :  { %v559_v63 = vpop.xlane.xlu0 %558 }
 0x6f0   :  { %4382 = vrcp.f32 %v559_v63 }
 0x6f3   :  { %v562_v0 = vpop.xlane.xlu0 %561 }
 0x6f4   :  { %4384 = vrcp.f32 %v562_v0  ;;  %v3648_v0 = vld [vmem:[%s5492_s9] ss:$0 sm:$0xff] }
 0x6f7   :  { %v570_v1 = vpop.permute.xlu0 %569 }
 0x6f8   :  { %v575_v2 = vsel %vm353_vm4, %v570_v1, 0 }
 0x6f9   :  { %4000 = vmatpush3.bf16.msra.mxu1 %v575_v2 }
 0x6fa   :  { %v4383_v3 = vpop.eup %4382  ;;  %4011 = vmatprep.subr.bf16.mxu1 %v4583_v15 }
 0x6fb   :  { %v565_v4 = vmul.f32 %v4383_v3, %v4379_v60 }
 0x6fd   :  { %v567_v5 = vpack.c.bf16 %v565_v4, %v565_v4 }
 0x6fe   :  { %v4385_v6 = vpop.eup %4384 }
 0x6ff   :  { %v566_v7 = vmul.f32 %v4385_v6, %v4381_v62  ;;  %4002 = vmatmul.mubr.msk.bf16.vlgmr.msra.gmra.mrb[16].mxu1 %vm323_vm3, %v567_v5  ;;  %v4332_v5 = vld [vmem:[%s5495_s12] sm:$0xff]   ;;  %v4333_v6 = vld [vmem:[%s5495_s12 + $0x8] sm:$0xff]  }
 0x700   :  { %4015 = vmatprep.mubr.msk.bf16.mxu1 %vm4584_vm1, %v4583_v15  ;;  %4012 = vmatpush3.bf16.msra.mxu1 %v4328_v8  ;;  %v3649_v8 = vld [vmem:[%s5494_s11] ss:$0 sm:$0xff] }
 0x701   :  { %v568_v39 = vpack.c.bf16 %v566_v7, %v566_v7  ;;  %4013 = vmatprep.subr.bf16.mxu1 %v4583_v15  ;;  %v4334_v7 = vld [vmem:[%s5495_s12 + $0x10] sm:$0xff]  }
 0x703   :  { %4008 = vmatmul.mubr.msk.bf16.vlgmr.msra.gmra.mrb[12].mxu0 %vm323_vm3, %v568_v39  ;;  %v4335_v39 = vld [vmem:[%s5495_s12 + $0x18] sm:$0xff]  }
 0x704   :  { %4023 = vmatprep.mubr.msk.bf16.mxu0 %vm4584_vm1, %v4583_v15  ;;  %4014 = vmatpush3.bf16.msra.mxu1 %v4329_v9 }
 0x705   :  { %4027 = vmatprep.subr.bf16.mxu1 %v4583_v15 }
 0x7d2   :  { %v611_v10 = vpop.f32.mrb[16].mxu1 }
 0x7d3   :  { %v4003_v11 = vpop.f32.mrb[17].mxu1 }
 0x7d4   :  { %v614_v12 = vpop.f32.mrb[18].mxu1 }
 0x7d5   :  { %v4004_v13 = vpop.f32.mrb[19].mxu1 }
 0x7d6   :  { %v659_v14 = vpop.f32.mrb[12].mxu0 }
 0x7d7   :  { %v4306_v16 = vpack.i.bf16 %v659_v14, %v611_v10  ;;  %v4009_v17 = vpop.f32.mrb[13].mxu0 }
 0x7d8   :  { %v662_v18 = vpop.f32.mrb[14].mxu0 }
 0x7d9   :  { %4307 = vrot.lane.b32.xlu1 %v4306_v16, %s4590_s17  ;;  %v4010_v19 = vpop.f32.mrb[15].mxu0 }
 0x84b   :  { %v4308_v20 = vpop.permute.xlu1 %4307 }
 0x84c   :  { %v4310_v21 = vunpack.i.h.bf16 %v4308_v20  ;;  %v4309_v22 = vunpack.i.l.bf16 %v4308_v20 }
 0x84e   :  { %v674_v23 = vsel %vm227_vm2, %v4821_v29, %v4310_v21  ;;  %v673_v24 = vsel %vm227_vm2, %v4819_v26, %v4309_v22 }
 0x84f   :  { %v679_v25 = vpack.c.bf16 %v674_v23, %v673_v24 }
 0x851   :  { %4016 = vmatmul.mubr.msk.bf16.vlgmr.msra.gmra.mrb[20].mxu1 %vm98_vm0, %v679_v25 }
 0x852   :  { %4035 = vmatprep.mubr.msk.bf16.mxu1 %vm4584_vm1, %v4583_v15  ;;  %4028 = vmatpush3.bf16.msra.mxu1 %v4332_v5 }
 0x853   :  { %4029 = vmatprep.subr.bf16.mxu1 %v4583_v15 }
 0x856   :  { %4030 = vmatpush3.bf16.msra.mxu1 %v4333_v6 }
 0x857   :  { %4031 = vmatprep.subr.bf16.mxu1 %v4583_v15 }
 0x85a   :  { %4032 = vmatpush3.bf16.msra.mxu1 %v4334_v7 }
 0x85b   :  { %4033 = vmatprep.subr.bf16.mxu1 %v4583_v15 }
 0x85e   :  { %4034 = vmatpush3.bf16.msra.mxu1 %v4335_v39 }
 0x85f   :  { %4053 = vmatprep.subr.bf16.mxu1 %v4583_v15 }
 0x924   :  { %v736_v28 = vpop.f32.mrb[20].mxu1 }
 0x925   :  { %v737_v30 = vadd.f32 %v3643_v27, %v736_v28  ;;  %v4017_v33 = vpop.f32.mrb[21].mxu1 }
 0x926   :  { %v739_v34 = vpop.f32.mrb[22].mxu1 }
 0x927   :  { %v740_v35 = vadd.f32 %v3643_v27, %v739_v34  ;;  %v4018_v36 = vpop.f32.mrb[23].mxu1  ;;  %v743_v29 = vadd.f32 %v737_v30, %v4739_v31 }
 0x929   :  { %v747_v26 = vsel %vm98_vm0, %v743_v29, 0.0  ;;  %v744_v37 = vadd.f32 %v740_v35, %v4741_v32  ;;  %v4330_v32 = vld [vmem:[%s5493_s10] sm:$0xff]  }
 0x92a   :  { %748 = vadd.xlane.f32.xlu1 %v747_v26  ;;  %4020 = vmatpush3.bf16.msra.mxu0 %v4330_v32 }
 0x92b   :  { %v750_v38 = vsel %vm98_vm0, %v744_v37, 0.0  ;;  %4021 = vmatprep.subr.bf16.mxu0 %v4583_v15 }
 0x92c   :  { %751 = vadd.xlane.f32.xlu0 %v750_v38 }
 0x92e   :  { %4022 = vmatpush3.bf16.msra.mxu0 %v4331_v52 }
 0x92f   :  { %4039 = vmatprep.subr.bf16.mxu0 %v4583_v15 }
 0x9b7   :  { %v749_v40 = vpop.xlane.xlu1 %748 }
 0x9b8   :  { %v753_v41 = vmul.f32 0.03125, %v749_v40 }
 0x9b9   :  { %v752_v43 = vpop.xlane.xlu0 %751 }
 0x9ba   :  { %v755_v44 = vsub.f32 %v743_v29, %v753_v41  ;;  %v754_v45 = vmul.f32 0.03125, %v752_v43 }
 0x9bc   :  { %v756_v46 = vsub.f32 %v744_v37, %v754_v45  ;;  %v757_v48 = vmul.f32 %v755_v44, %v755_v44  ;;  %v3653_v37 = vld [vmem:[%s5496_s13] ss:$0 sm:$0xff] }
 0x9be   :  { %v759_v50 = vsel %vm98_vm0, %v757_v48, 0.0  ;;  %v758_v51 = vmul.f32 %v756_v46, %v756_v46 }
 0x9bf   :  { %760 = vadd.xlane.f32.xlu0 %v759_v50 }
 0x9c0   :  { %v762_v31 = vsel %vm98_vm0, %v758_v51, 0.0 }
 0x9c3   :  { %763 = vadd.xlane.f32.xlu0 %v762_v31 }
 0xa4c   :  { %v761_v53 = vpop.xlane.xlu0 %760 }
 0xa4d   :  { %v765_v54 = vmul.f32 0.03125, %v761_v53 }
 0xa4f   :  { %v767_v55 = vadd.f32 1e-12, %v765_v54 }
 0xa50   :  { %v764_v56 = vpop.xlane.xlu0 %763 }
 0xa51   :  { %4386 = vrsqrt.f32 %v767_v55  ;;  %v766_v57 = vmul.f32 0.03125, %v764_v56 }
 0xa53   :  { %v768_v58 = vadd.f32 1e-12, %v766_v57 }
 0xa55   :  { %4388 = vrsqrt.f32 %v768_v58 }
 0xa5b   :  { %v4387_v59 = vpop.eup %4386 }
 0xa5c   :  { %v771_v60 = vmul.f32 %v4387_v59, %v755_v44 }
 0xa5e   :  { %v779_v42 = vmul.f32 %v3647_v61, %v771_v60  ;;  %v4336_v60 = vld [vmem:[%s5487_s4 + $0x10] sm:$0xff]  }
 0xa5f   :  { %v4389_v62 = vpop.eup %4388 }
 0xa60   :  { %v772_v63 = vmul.f32 %v4389_v62, %v756_v46  ;;  %v787_v2 = vadd.f32 %v3648_v0, %v779_v42 }
 0xa62   :  { %v780_v1 = vmul.f32 %v3647_v61, %v772_v63  ;;  %v4337_v61 = vld [vmem:[%s5487_s4 + $0x18] sm:$0xff]  }
 0xa64   :  { %v788_v3 = vadd.f32 %v3648_v0, %v780_v1 }
 0xa66   :  { %v793_v4 = vpack.c.bf16 %v788_v3, %v787_v2 }
 0xa68   :  { %4024 = vmatmul.mubr.msk.bf16.vlgmr.msra.gmra.mrb[16].mxu0 %vm98_vm0, %v793_v4  ;;  %v3659_v4 = vld [vmem:[%s5497_s14] ss:$0 sm:$0xff] }
 0xa69   :  { %4043 = vmatprep.mubr.msk.bf16.mxu0 %vm4584_vm1, %v4583_v15  ;;  %4040 = vmatpush3.bf16.msra.mxu0 %v4336_v60 }
 0xa6a   :  { %4041 = vmatprep.subr.bf16.mxu0 %v4583_v15 }
 0xa6d   :  { %4042 = vmatpush3.bf16.msra.mxu0 %v4337_v61 }
 0xa6e   :  { %4047 = vmatprep.subr.bf16.mxu0 %v4583_v15 }
 0xb3b   :  { %v850_v9 = vpop.f32.mrb[16].mxu0 }
 0xb3c   :  { %v851_v10 = vadd.f32 %v3649_v8, %v850_v9  ;;  %v4025_v11 = vpop.f32.mrb[17].mxu0 }
 0xb3d   :  { %v853_v12 = vpop.f32.mrb[18].mxu0 }
 0xb3e   :  { %v859_v13 = vmul.f32 0.044715, %v851_v10  ;;  %v854_v14 = vadd.f32 %v3649_v8, %v853_v12  ;;  %v4026_v16 = vpop.f32.mrb[19].mxu0  ;;  %v857_v33 = vmul.f32 0.5, %v851_v10  ;;  %v3660_v8 = vld [vmem:[%s5498_s15] ss:$0 sm:$0xff] }
 0xb40   :  { %v861_v17 = vmul.f32 %v859_v13, %v851_v10  ;;  %v860_v18 = vmul.f32 0.044715, %v854_v14  ;;  %v858_v34 = vmul.f32 0.5, %v854_v14  ;;  %v3666_v13 = vld [vmem:[%s5488_s5 + $0x1] ss:$0 sm:$0xff] }
 0xb42   :  { %v863_v19 = vmul.f32 %v861_v17, %v851_v10  ;;  %v862_v20 = vmul.f32 %v860_v18, %v854_v14 }
 0xb44   :  { %v865_v21 = vadd.f32 %v863_v19, %v851_v10  ;;  %v864_v22 = vmul.f32 %v862_v20, %v854_v14 }
 0xb46   :  { %v867_v23 = vmul.f32 0.7978846, %v865_v21  ;;  %v866_v24 = vadd.f32 %v864_v22, %v854_v14 }
 0xb48   :  { %4390 = vtanh.f32 %v867_v23  ;;  %v868_v25 = vmul.f32 0.7978846, %v866_v24 }
 0xb4a   :  { %4392 = vtanh.f32 %v868_v25 }
 0xb52   :  { %v4391_v27 = vpop.eup %4390 }
 0xb53   :  { %v871_v28 = vadd.f32 1.0, %v4391_v27 }
 0xb54   :  { %v4393_v30 = vpop.eup %4392 }
 0xb55   :  { %v872_v35 = vadd.f32 1.0, %v4393_v30  ;;  %v873_v36 = vmul.f32 %v871_v28, %v857_v33 }
 0xb57   :  { %v874_v29 = vmul.f32 %v872_v35, %v858_v34 }
 0xb59   :  { %v883_v26 = vpack.c.bf16 %v874_v29, %v873_v36 }
 0xb5b   :  { %4036 = vmatmul.mubr.msk.bf16.vlgmr.msra.gmra.mrb[24].mxu1 %vm915_vm5, %v883_v26 }
 0xb5c   :  { %4055 = vmatprep.mubr.msk.bf16.mxu1 %vm4584_vm1, %v4583_v15 }
 0xc2e   :  { %v953_v38 = vpop.f32.mrb[24].mxu1 }
 0xc2f   :  { %v954_v40 = vadd.f32 %v3653_v37, %v953_v38  ;;  %v4037_v41 = vpop.f32.mrb[25].mxu1 }
 0xc30   :  { %v956_v43 = vpop.f32.mrb[26].mxu1 }
 0xc31   :  { %v957_v44 = vadd.f32 %v3653_v37, %v956_v43  ;;  %v4038_v45 = vpop.f32.mrb[27].mxu1  ;;  %v960_v46 = vadd.f32 %v954_v40, %v787_v2 }
 0xc33   :  { %v964_v48 = vsel %vm98_vm0, %v960_v46, 0.0  ;;  %v961_v50 = vadd.f32 %v957_v44, %v788_v3 }
 0xc34   :  { %965 = vadd.xlane.f32.xlu1 %v964_v48 }
 0xc35   :  { %v967_v51 = vsel %vm98_vm0, %v961_v50, 0.0 }
 0xc36   :  { %968 = vadd.xlane.f32.xlu0 %v967_v51 }
 0xcc1   :  { %v966_v31 = vpop.xlane.xlu1 %965 }
 0xcc2   :  { %v970_v32 = vmul.f32 0.03125, %v966_v31 }
 0xcc3   :  { %v969_v52 = vpop.xlane.xlu0 %968 }
 0xcc4   :  { %v972_v53 = vsub.f32 %v960_v46, %v970_v32  ;;  %v971_v54 = vmul.f32 0.03125, %v969_v52 }
 0xcc6   :  { %v973_v55 = vsub.f32 %v961_v50, %v971_v54  ;;  %v974_v56 = vmul.f32 %v972_v53, %v972_v53 }
 0xcc8   :  { %v976_v57 = vsel %vm98_vm0, %v974_v56, 0.0  ;;  %v975_v58 = vmul.f32 %v973_v55, %v973_v55 }
 0xcc9   :  { %977 = vadd.xlane.f32.xlu1 %v976_v57 }
 0xcca   :  { %v979_v59 = vsel %vm98_vm0, %v975_v58, 0.0 }
 0xccb   :  { %980 = vadd.xlane.f32.xlu0 %v979_v59 }
 0xd56   :  { %v978_v62 = vpop.xlane.xlu1 %977 }
 0xd57   :  { %v982_v42 = vmul.f32 0.03125, %v978_v62 }
 0xd58   :  { %v981_v63 = vpop.xlane.xlu0 %980 }
 0xd59   :  { %v984_v0 = vadd.f32 1e-12, %v982_v42  ;;  %v983_v1 = vmul.f32 0.03125, %v981_v63 }
 0xd5b   :  { %4394 = vrsqrt.f32 %v984_v0  ;;  %v985_v2 = vadd.f32 1e-12, %v983_v1 }
 0xd5d   :  { %4396 = vrsqrt.f32 %v985_v2 }
 0xd65   :  { %v4395_v3 = vpop.eup %4394 }
 0xd66   :  { %v988_v5 = vmul.f32 %v4395_v3, %v972_v53 }
 0xd67   :  { %v4397_v6 = vpop.eup %4396 }
 0xd68   :  { %v996_v7 = vmul.f32 %v3659_v4, %v988_v5  ;;  %v989_v39 = vmul.f32 %v4397_v6, %v973_v55 }
 0xd6a   :  { %v997_v9 = vmul.f32 %v3659_v4, %v989_v39  ;;  %v4928_v10 = vadd.f32 %v3660_v8, %v996_v7 }
 0xd6c   :  { %v4930_v11 = vadd.f32 %v3660_v8, %v997_v9 }
 0xd6e   :  { %v1011_v12 = vpack.c.bf16 %v4930_v11, %v4928_v10 }
 0xd70   :  { %4044 = vmatmul.mubr.msk.bf16.vlgmr.msra.gmra.mrb[20].mxu0 %vm98_vm0, %v1011_v12 }
 0xd71   :  { %4049 = vmatprep.mubr.msk.bf16.mxu0 %vm4584_vm1, %v4583_v15 }
 0xe43   :  { %v1069_v14 = vpop.f32.mrb[20].mxu0 }
 0xe44   :  { %v1070_v16 = vadd.f32 %v3666_v13, %v1069_v14  ;;  %v4045_v17 = vpop.f32.mrb[21].mxu0 }
 0xe45   :  { %v1072_v18 = vpop.f32.mrb[22].mxu0 }
 0xe46   :  { %v4940_v19 = vpack.c.bf16 %v1070_v16, %v1070_v16  ;;  %v1073_v20 = vadd.f32 %v3666_v13, %v1072_v18  ;;  %v4046_v21 = vpop.f32.mrb[23].mxu0 }
 0xe48   :  { %v4942_v22 = vpack.c.bf16 %v1073_v20, %v1073_v20  ;;  %1079 = vrot.lane.b32.xlu1 %v4940_v19, %s4585_s21 }
 0xe4a   :  { %1128 = vrot.lane.b32.xlu0 %v4942_v22, %s4585_s21 }
 0xeba   :  { %v1080_v23 = vpop.permute.xlu1 %1079 }
 0xebb   :  { %v1085_v24 = vsel %vm227_vm2, %v1080_v23, 0 }
 0xebc   :  { %4048 = vmatpush3.bf16.xpose.msra.mxu0 %v1085_v24  ;;  %v1129_v25 = vpop.permute.xlu0 %1128 }
 0xebd   :  { %v1134_v27 = vsel %vm227_vm2, %v1129_v25, 0  ;;  %4059 = vmatprep.subr.bf16.mxu0 %v4583_v15 }
 0xebe   :  { %4054 = vmatpush3.bf16.xpose.msra.mxu1 %v1134_v27 }
 0xebf   :  { %4065 = vmatprep.subr.bf16.mxu1 %v4583_v15 }
 0xec3   :  { %4050 = vmatmul.mubr.msk.bf16.vlgmr.msra.gmra.mrb[24].mxu0 %vm227_vm2, %v4940_v19 }
 0xec4   :  { %4061 = vmatprep.mubr.msk.bf16.mxu0 %vm4584_vm1, %v4583_v15 }
 0xec5   :  { %4056 = vmatmul.mubr.msk.bf16.vlgmr.msra.gmra.mrb[28].mxu1 %vm227_vm2, %v4942_v22 }
 0xec6   :  { %4067 = vmatprep.mubr.msk.bf16.mxu1 %vm4584_vm1, %v4583_v15 }
 0xf96   :  { %v1121_v28 = vpop.f32.mrb[24].mxu0 }
 0xf97   :  { %v1122_v30 = vadd.f32 %v4774_v47, %v1121_v28  ;;  %v4051_v33 = vpop.f32.mrb[25].mxu0 }
 0xf98   :  { %v1124_v34 = vpop.f32.mrb[26].mxu0  ;;  %v1170_v35 = vpop.f32.mrb[28].mxu1 }
 0xf99   :  { %v1171_v36 = vadd.f32 %v4779_v49, %v1170_v35  ;;  %v4052_v29 = vpop.f32.mrb[27].mxu0  ;;  %v4057_v26 = vpop.f32.mrb[29].mxu1  ;;  %v1176_v37 = vsel %vm323_vm3, %v1122_v30, -inf }
 0xf9a   :  { %v1173_v38 = vpop.f32.mrb[30].mxu1  ;;  %1177 = vmax.xlane.f32.xlu1 %v1176_v37 }
 0xf9b   :  { %v4058_v40 = vpop.f32.mrb[31].mxu1  ;;  %v1179_v41 = vsel %vm323_vm3, %v1171_v36, -inf }
 0xf9c   :  { %1180 = vmax.xlane.f32.xlu0 %v1179_v41 }
 0xfab   :  { %1200 = vrot.lane.b32.xlu1 %v4940_v19, %s4586_s29 }
0x1027   :  { %v1178_v43 = vpop.xlane.xlu1 %1177 }
0x1028   :  { %v1182_v44 = vsub.f32 %v1122_v30, %v1178_v43 }
0x1029   :  { %v1181_v45 = vpop.xlane.xlu0 %1180 }
0x102a   :  { %v1184_v46 = vmul.f32 1.442695, %v1182_v44  ;;  %v1183_v48 = vsub.f32 %v1171_v36, %v1181_v45 }
0x102b   :  { %v1201_v50 = vpop.permute.xlu1 %1200 }
0x102c   :  { %4398 = vpow2.f32 %v1184_v46  ;;  %v1186_v51 = vmul.f32 1.442695, %v1183_v48  ;;  %v1206_v31 = vsel %vm353_vm4, %v1201_v50, 0 }
0x102d   :  { %4060 = vmatpush3.bf16.msra.mxu0 %v1206_v31 }
0x102e   :  { %4400 = vpow2.f32 %v1186_v51  ;;  %4071 = vmatprep.subr.bf16.mxu0 %v4583_v15 }
0x1036   :  { %v4399_v32 = vpop.eup %4398 }
0x1037   :  { %v1188_v52 = vsel %vm323_vm3, %v4399_v32, 0.0 }
0x1038   :  { %v4401_v53 = vpop.eup %4400  ;;  %1189 = vadd.xlane.f32.xlu1 %v1188_v52  ;;  %v4338_v52 = vld [vmem:[%s5489_s6 + $0x10] sm:$0xff]  }
0x1039   :  { %v1191_v54 = vsel %vm323_vm3, %v4401_v53, 0.0 }
0x103a   :  { %1192 = vadd.xlane.f32.xlu0 %v1191_v54 }
0x1049   :  { %1298 = vrot.lane.b32.xlu1 %v4940_v19, %s4587_s30 }
0x104d   :  { %1348 = vrot.lane.b32.xlu1 %v4942_v22, %s4587_s30 }
0x1050   :  { %1248 = vrot.lane.b32.xlu0 %v4942_v22, %s4586_s29 }
0x1051   :  { %1296 = vrot.lane.b32.xlu1 %v4940_v19, %s4588_s0 }
0x1054   :  { %1346 = vrot.lane.b32.xlu0 %v4942_v22, %s4588_s0 }
0x10c5   :  { %v1190_v55 = vpop.xlane.xlu1 %1189 }
0x10c6   :  { %4402 = vrcp.f32 %v1190_v55 }
0x10c7   :  { %v1193_v56 = vpop.xlane.xlu0 %1192 }
0x10c8   :  { %4404 = vrcp.f32 %v1193_v56 }
0x10c9   :  { %v1299_v59 = vpop.permute.xlu1 %1298 }
0x10ca   :  { %v1304_v1 = vsel %vm227_vm2, %v1299_v59, 0 }
0x10cb   :  { %v1249_v57 = vpop.permute.xlu0 %1248 }
0x10cc   :  { %v1254_v58 = vsel %vm353_vm4, %v1249_v57, 0 }
0x10cd   :  { %4066 = vmatpush3.bf16.msra.mxu1 %v1254_v58  ;;  %v1349_v0 = vpop.permute.xlu1 %1348 }
0x10ce   :  { %4077 = vmatprep.subr.bf16.mxu1 %v4583_v15  ;;  %v1354_v3 = vsel %vm227_vm2, %v1349_v0, 0 }
0x10cf   :  { %v1347_v5 = vpop.permute.xlu0 %1346 }
0x10d0   :  { %v4403_v60 = vpop.eup %4402 }
0x10d1   :  { %v1196_v61 = vmul.f32 %v4403_v60, %v4399_v32  ;;  %v1297_v4 = vpop.permute.xlu1 %1296 }
0x10d2   :  { %v4405_v62 = vpop.eup %4404 }
0x10d3   :  { %v1197_v42 = vmul.f32 %v4405_v62, %v4401_v53  ;;  %v1198_v63 = vpack.c.bf16 %v1196_v61, %v1196_v61  ;;  %v4339_v53 = vld [vmem:[%s5489_s6 + $0x18] sm:$0xff]  }
0x10d5   :  { %4062 = vmatmul.mubr.msk.bf16.vlgmr.msra.gmra.mrb[28].mxu0 %vm323_vm3, %v1198_v63  ;;  %v1199_v2 = vpack.c.bf16 %v1197_v42, %v1197_v42 }
0x10d6   :  { %4072 = vmatpush3.bf16.xpose.msra.mxu0 %v1304_v1  ;;  %4073 = vmatprep.mubr.msk.bf16.mxu0 %vm4584_vm1, %v4583_v15 }
0x10d7   :  { %4068 = vmatmul.mubr.msk.bf16.vlgmr.msra.gmra.mrb[32].mxu1 %vm323_vm3, %v1199_v2  ;;  %4083 = vmatprep.subr.bf16.mxu0 %v4583_v15 }
0x10d8   :  { %4078 = vmatpush3.bf16.xpose.msra.mxu1 %v1354_v3  ;;  %4079 = vmatprep.mubr.msk.bf16.mxu1 %vm4584_vm1, %v4583_v15 }
0x10d9   :  { %4089 = vmatprep.subr.bf16.mxu1 %v4583_v15 }
0x10dd   :  { %4074 = vmatmul.mubr.msk.bf16.vlgmr.msra.gmra.mrb[32].mxu0 %vm227_vm2, %v1297_v4  ;;  %v3683_v4 = vld [vmem:[%s5490_s7 + $0x1] ss:$0 sm:$0xff] }
0x10de   :  { %4085 = vmatprep.mubr.msk.bf16.mxu0 %vm4584_vm1, %v4583_v15 }
0x10df   :  { %4080 = vmatmul.mubr.msk.bf16.vlgmr.msra.gmra.mrb[36].mxu1 %vm227_vm2, %v1347_v5 }
0x10e0   :  { %4091 = vmatprep.mubr.msk.bf16.mxu1 %vm4584_vm1, %v4583_v15 }
0x11a8   :  { %v4998_v6 = vpop.f32.mrb[28].mxu0 }
0x11a9   :  { %v4063_v7 = vpop.f32.mrb[29].mxu0 }
0x11aa   :  { %v1245_v39 = vpop.f32.mrb[30].mxu0  ;;  %v5000_v8 = vpop.f32.mrb[32].mxu1 }
0x11ab   :  { %v4064_v9 = vpop.f32.mrb[31].mxu0  ;;  %v4069_v12 = vpop.f32.mrb[33].mxu1 }
0x11ac   :  { %v1293_v13 = vpop.f32.mrb[34].mxu1 }
0x11ad   :  { %v4070_v14 = vpop.f32.mrb[35].mxu1 }
0x11b0   :  { %v1340_v16 = vpop.f32.mrb[32].mxu0 }
0x11b1   :  { %v1341_v17 = vadd.f32 %v4774_v47, %v1340_v16  ;;  %v4075_v18 = vpop.f32.mrb[33].mxu0 }
0x11b2   :  { %v1343_v20 = vpop.f32.mrb[34].mxu0  ;;  %v1390_v21 = vpop.f32.mrb[36].mxu1 }
0x11b3   :  { %v1391_v23 = vadd.f32 %v4779_v49, %v1390_v21  ;;  %v4076_v24 = vpop.f32.mrb[35].mxu0  ;;  %v4081_v25 = vpop.f32.mrb[37].mxu1  ;;  %v1396_v27 = vsel %vm323_vm3, %v1341_v17, -inf }
0x11b4   :  { %v1393_v28 = vpop.f32.mrb[38].mxu1  ;;  %1397 = vmax.xlane.f32.xlu1 %v1396_v27 }
0x11b5   :  { %v4082_v30 = vpop.f32.mrb[39].mxu1  ;;  %v1399_v33 = vsel %vm323_vm3, %v1391_v23, -inf }
0x11b6   :  { %1400 = vmax.xlane.f32.xlu0 %v1399_v33  ;;  %v4341_v30 = vld [vmem:[%s5493_s10 + $0x18] sm:$0xff]  }
0x11c5   :  { %1420 = vrot.lane.b32.xlu1 %v4940_v19, %s4589_s24 }
0x1241   :  { %v1398_v34 = vpop.xlane.xlu1 %1397 }
0x1242   :  { %v1402_v47 = vsub.f32 %v1341_v17, %v1398_v34 }
0x1243   :  { %v1401_v35 = vpop.xlane.xlu0 %1400 }
0x1244   :  { %v1404_v36 = vmul.f32 1.442695, %v1402_v47  ;;  %v1403_v29 = vsub.f32 %v1391_v23, %v1401_v35 }
0x1245   :  { %v1421_v26 = vpop.permute.xlu1 %1420 }
0x1246   :  { %4406 = vpow2.f32 %v1404_v36  ;;  %v1406_v49 = vmul.f32 1.442695, %v1403_v29  ;;  %v1426_v37 = vsel %vm353_vm4, %v1421_v26, 0 }
0x1247   :  { %4084 = vmatpush3.bf16.msra.mxu0 %v1426_v37 }
0x1248   :  { %4408 = vpow2.f32 %v1406_v49  ;;  %4095 = vmatprep.subr.bf16.mxu0 %v4583_v15  ;;  %v3689_v49 = vld [vmem:[%s5491_s8 + $0x1] ss:$0 sm:$0xff] }
0x1250   :  { %v4407_v38 = vpop.eup %4406 }
0x1251   :  { %v1408_v40 = vsel %vm323_vm3, %v4407_v38, 0.0 }
0x1252   :  { %v4409_v41 = vpop.eup %4408  ;;  %1409 = vadd.xlane.f32.xlu0 %v1408_v40 }
0x1253   :  { %v1411_v19 = vsel %vm323_vm3, %v4409_v41, 0.0 }
0x1256   :  { %1412 = vadd.xlane.f32.xlu0 %v1411_v19  ;;  %v3690_v19 = vld [vmem:[%s5492_s9 + $0x1] ss:$0 sm:$0xff] }
0x126c   :  { %1468 = vrot.lane.b32.xlu0 %v4942_v22, %s4589_s24 }
0x12df   :  { %v1410_v43 = vpop.xlane.xlu0 %1409 }
0x12e0   :  { %4410 = vrcp.f32 %v1410_v43 }
0x12e3   :  { %v1413_v44 = vpop.xlane.xlu0 %1412 }
0x12e4   :  { %4412 = vrcp.f32 %v1413_v44 }
0x12e7   :  { %v1469_v45 = vpop.permute.xlu0 %1468 }
0x12e8   :  { %v1474_v46 = vsel %vm353_vm4, %v1469_v45, 0 }
0x12e9   :  { %4090 = vmatpush3.bf16.msra.mxu1 %v1474_v46 }
0x12ea   :  { %v4411_v48 = vpop.eup %4410  ;;  %4103 = vmatprep.subr.bf16.mxu1 %v4583_v15 }
0x12eb   :  { %v1416_v50 = vmul.f32 %v4411_v48, %v4407_v38  ;;  %v4342_v48 = vld [vmem:[%s5495_s12 + $0x20] sm:$0xff]  }
0x12ed   :  { %v1418_v51 = vpack.c.bf16 %v1416_v50, %v1416_v50  ;;  %v4343_v50 = vld [vmem:[%s5495_s12 + $0x28] sm:$0xff]  }
0x12ee   :  { %v4413_v31 = vpop.eup %4412 }
0x12ef   :  { %v1417_v32 = vmul.f32 %v4413_v31, %v4409_v41  ;;  %4086 = vmatmul.mubr.msk.bf16.vlgmr.msra.gmra.mrb[36].mxu0 %vm323_vm3, %v1418_v51  ;;  %v4344_v51 = vld [vmem:[%s5495_s12 + $0x30] sm:$0xff]   ;;  %v4345_v31 = vld [vmem:[%s5495_s12 + $0x38] sm:$0xff]  }
0x12f0   :  { %4099 = vmatprep.mubr.msk.bf16.mxu0 %vm4584_vm1, %v4583_v15  ;;  %4096 = vmatpush3.bf16.msra.mxu0 %v4338_v52 }
0x12f1   :  { %v1419_v22 = vpack.c.bf16 %v1417_v32, %v1417_v32  ;;  %4097 = vmatprep.subr.bf16.mxu0 %v4583_v15  ;;  %v3696_v32 = vld [vmem:[%s5494_s11 + $0x1] ss:$0 sm:$0xff] }
0x12f3   :  { %4092 = vmatmul.mubr.msk.bf16.vlgmr.msra.gmra.mrb[40].mxu1 %vm323_vm3, %v1419_v22 }
0x12f4   :  { %4107 = vmatprep.mubr.msk.bf16.mxu1 %vm4584_vm1, %v4583_v15  ;;  %4098 = vmatpush3.bf16.msra.mxu0 %v4339_v53 }
0x12f5   :  { %4111 = vmatprep.subr.bf16.mxu0 %v4583_v15 }
0x13c2   :  { %v1462_v54 = vpop.f32.mrb[36].mxu0 }
0x13c3   :  { %v4087_v55 = vpop.f32.mrb[37].mxu0 }
0x13c4   :  { %v1465_v56 = vpop.f32.mrb[38].mxu0 }
0x13c5   :  { %v4088_v57 = vpop.f32.mrb[39].mxu0 }
0x13c6   :  { %v1510_v58 = vpop.f32.mrb[40].mxu1 }
0x13c7   :  { %v4311_v59 = vpack.i.bf16 %v1510_v58, %v1462_v54  ;;  %v4093_v60 = vpop.f32.mrb[41].mxu1 }
0x13c8   :  { %v1513_v61 = vpop.f32.mrb[42].mxu1 }
0x13c9   :  { %v4094_v62 = vpop.f32.mrb[43].mxu1  ;;  %4312 = vrot.lane.b32.xlu1 %v4311_v59, %s4590_s17 }
0x143b   :  { %v4313_v42 = vpop.permute.xlu1 %4312 }
0x143c   :  { %v4315_v63 = vunpack.i.h.bf16 %v4313_v42  ;;  %v4314_v0 = vunpack.i.l.bf16 %v4313_v42 }
0x143e   :  { %v1525_v1 = vsel %vm227_vm2, %v5000_v8, %v4315_v63  ;;  %v1524_v2 = vsel %vm227_vm2, %v4998_v6, %v4314_v0 }
0x143f   :  { %v1531_v3 = vpack.c.bf16 %v1525_v1, %v1524_v2 }
0x1441   :  { %4100 = vmatmul.mubr.msk.bf16.vlgmr.msra.gmra.mrb[40].mxu0 %vm98_vm0, %v1531_v3 }
0x1442   :  { %4119 = vmatprep.mubr.msk.bf16.mxu0 %vm4584_vm1, %v4583_v15  ;;  %4112 = vmatpush3.bf16.msra.mxu0 %v4342_v48 }
0x1443   :  { %4113 = vmatprep.subr.bf16.mxu0 %v4583_v15 }
0x1446   :  { %4114 = vmatpush3.bf16.msra.mxu0 %v4343_v50 }
0x1447   :  { %4115 = vmatprep.subr.bf16.mxu0 %v4583_v15 }
0x144a   :  { %4116 = vmatpush3.bf16.msra.mxu0 %v4344_v51  ;;  %v3718_v51 = vld [vmem:[%s5498_s15 + $0x1] ss:$0 sm:$0xff] }
0x144b   :  { %4117 = vmatprep.subr.bf16.mxu0 %v4583_v15 }
0x144e   :  { %4118 = vmatpush3.bf16.msra.mxu0 %v4345_v31 }
0x144f   :  { %4137 = vmatprep.subr.bf16.mxu0 %v4583_v15 }
0x1514   :  { %v1589_v5 = vpop.f32.mrb[40].mxu0 }
0x1515   :  { %v1590_v7 = vadd.f32 %v3683_v4, %v1589_v5  ;;  %v4101_v39 = vpop.f32.mrb[41].mxu0 }
0x1516   :  { %v1592_v9 = vpop.f32.mrb[42].mxu0 }
0x1517   :  { %v1593_v12 = vadd.f32 %v3683_v4, %v1592_v9  ;;  %v4102_v13 = vpop.f32.mrb[43].mxu0  ;;  %v1596_v8 = vadd.f32 %v1590_v7, %v4928_v10 }
0x1519   :  { %v1602_v6 = vsel %vm98_vm0, %v1596_v8, 0.0  ;;  %v1597_v14 = vadd.f32 %v1593_v12, %v4930_v11  ;;  %v4340_v11 = vld [vmem:[%s5493_s10 + $0x10] sm:$0xff]  }
0x151a   :  { %1603 = vadd.xlane.f32.xlu1 %v1602_v6  ;;  %4104 = vmatpush3.bf16.msra.mxu1 %v4340_v11 }
0x151b   :  { %v1605_v16 = vsel %vm98_vm0, %v1597_v14, 0.0  ;;  %4105 = vmatprep.subr.bf16.mxu1 %v4583_v15 }
0x151c   :  { %1606 = vadd.xlane.f32.xlu0 %v1605_v16 }
0x151e   :  { %4106 = vmatpush3.bf16.msra.mxu1 %v4341_v30 }
0x151f   :  { %4123 = vmatprep.subr.bf16.mxu1 %v4583_v15 }
0x15a7   :  { %v1604_v17 = vpop.xlane.xlu1 %1603 }
0x15a8   :  { %v1608_v18 = vmul.f32 0.03125, %v1604_v17 }
0x15a9   :  { %v1607_v20 = vpop.xlane.xlu0 %1606 }
0x15aa   :  { %v1610_v21 = vsub.f32 %v1596_v8, %v1608_v18  ;;  %v1609_v23 = vmul.f32 0.03125, %v1607_v20  ;;  %v3709_v8 = vld [vmem:[%s5496_s13 + $0x1] ss:$0 sm:$0xff] }
0x15ac   :  { %v1611_v24 = vsub.f32 %v1597_v14, %v1609_v23  ;;  %v1612_v25 = vmul.f32 %v1610_v21, %v1610_v21 }
0x15ae   :  { %v1614_v27 = vsel %vm98_vm0, %v1612_v25, 0.0  ;;  %v1613_v28 = vmul.f32 %v1611_v24, %v1611_v24 }
0x15af   :  { %1615 = vadd.xlane.f32.xlu0 %v1614_v27 }
0x15b0   :  { %v1617_v10 = vsel %vm98_vm0, %v1613_v28, 0.0 }
0x15b1   :  { %1618 = vadd.xlane.f32.xlu1 %v1617_v10 }
0x163c   :  { %v1616_v33 = vpop.xlane.xlu0 %1615 }
0x163d   :  { %v1620_v34 = vmul.f32 0.03125, %v1616_v33 }
0x163e   :  { %v1619_v47 = vpop.xlane.xlu1 %1618 }
0x163f   :  { %v1622_v35 = vadd.f32 1e-12, %v1620_v34  ;;  %v1621_v36 = vmul.f32 0.03125, %v1619_v47 }
0x1641   :  { %4414 = vrsqrt.f32 %v1622_v35  ;;  %v1623_v29 = vadd.f32 1e-12, %v1621_v36 }
0x1643   :  { %4416 = vrsqrt.f32 %v1623_v29  ;;  %v4346_v29 = vld [vmem:[%s5487_s4 + $0x20] sm:$0xff]  }
0x164b   :  { %v4415_v26 = vpop.eup %4414 }
0x164c   :  { %v1626_v37 = vmul.f32 %v4415_v26, %v1610_v21  ;;  %v4347_v26 = vld [vmem:[%s5487_s4 + $0x28] sm:$0xff]  }
0x164d   :  { %v4417_v38 = vpop.eup %4416 }
0x164e   :  { %v1634_v40 = vmul.f32 %v3689_v49, %v1626_v37  ;;  %v1627_v41 = vmul.f32 %v4417_v38, %v1611_v24 }
0x1650   :  { %v1635_v43 = vmul.f32 %v3689_v49, %v1627_v41  ;;  %v1642_v44 = vadd.f32 %v3690_v19, %v1634_v40 }
0x1652   :  { %v1643_v45 = vadd.f32 %v3690_v19, %v1635_v43 }
0x1654   :  { %v1649_v46 = vpack.c.bf16 %v1643_v45, %v1642_v44 }
0x1656   :  { %4108 = vmatmul.mubr.msk.bf16.vlgmr.msra.gmra.mrb[44].mxu1 %vm98_vm0, %v1649_v46 }
0x1657   :  { %4127 = vmatprep.mubr.msk.bf16.mxu1 %vm4584_vm1, %v4583_v15  ;;  %4124 = vmatpush3.bf16.msra.mxu1 %v4346_v29 }
0x1658   :  { %4125 = vmatprep.subr.bf16.mxu1 %v4583_v15 }
0x165b   :  { %4126 = vmatpush3.bf16.msra.mxu1 %v4347_v26 }
0x165c   :  { %4131 = vmatprep.subr.bf16.mxu1 %v4583_v15 }
0x1729   :  { %v1707_v22 = vpop.f32.mrb[44].mxu1 }
0x172a   :  { %v1708_v52 = vadd.f32 %v3696_v32, %v1707_v22  ;;  %v4109_v53 = vpop.f32.mrb[45].mxu1 }
0x172b   :  { %v1710_v54 = vpop.f32.mrb[46].mxu1  ;;  %v3724_v53 = vld [vmem:[%s5488_s5 + $0x2] ss:$0 sm:$0xff] }
0x172c   :  { %v1716_v55 = vmul.f32 0.044715, %v1708_v52  ;;  %v1711_v56 = vadd.f32 %v3696_v32, %v1710_v54  ;;  %v4110_v57 = vpop.f32.mrb[47].mxu1  ;;  %v1714_v5 = vmul.f32 0.5, %v1708_v52 }
0x172e   :  { %v1718_v58 = vmul.f32 %v1716_v55, %v1708_v52  ;;  %v1717_v59 = vmul.f32 0.044715, %v1711_v56  ;;  %v1715_v7 = vmul.f32 0.5, %v1711_v56 }
0x1730   :  { %v1720_v60 = vmul.f32 %v1718_v58, %v1708_v52  ;;  %v1719_v61 = vmul.f32 %v1717_v59, %v1711_v56 }
0x1732   :  { %v1722_v62 = vadd.f32 %v1720_v60, %v1708_v52  ;;  %v1721_v42 = vmul.f32 %v1719_v61, %v1711_v56 }
0x1734   :  { %v1724_v63 = vmul.f32 0.7978846, %v1722_v62  ;;  %v1723_v0 = vadd.f32 %v1721_v42, %v1711_v56 }
0x1736   :  { %4418 = vtanh.f32 %v1724_v63  ;;  %v1725_v1 = vmul.f32 0.7978846, %v1723_v0 }
0x1738   :  { %4420 = vtanh.f32 %v1725_v1 }
0x1740   :  { %v4419_v2 = vpop.eup %4418 }
0x1741   :  { %v1728_v3 = vadd.f32 1.0, %v4419_v2  ;;  %v5142_v2 = vld [vmem:[%s5484_s1] ss:$0 sm:$0xff] }
0x1742   :  { %v4421_v4 = vpop.eup %4420 }
0x1743   :  { %v1729_v39 = vadd.f32 1.0, %v4421_v4  ;;  %v1730_v9 = vmul.f32 %v1728_v3, %v1714_v5 }
0x1745   :  { %v1731_v12 = vmul.f32 %v1729_v39, %v1715_v7  ;;  %v5148_v39 = vld [vmem:[%s5484_s1 + $0x1] ss:$0 sm:$0xff] }
0x1747   :  { %v1741_v13 = vpack.c.bf16 %v1731_v12, %v1730_v9 }
0x1749   :  { %4120 = vmatmul.mubr.msk.bf16.vlgmr.msra.gmra.mrb[44].mxu0 %vm915_vm5, %v1741_v13 }
0x174a   :  { %4139 = vmatprep.mubr.msk.bf16.mxu0 %vm4584_vm1, %v4583_v15 }
0x181c   :  { %v1811_v6 = vpop.f32.mrb[44].mxu0 }
0x181d   :  { %v1812_v14 = vadd.f32 %v3709_v8, %v1811_v6  ;;  %v4121_v16 = vpop.f32.mrb[45].mxu0 }
0x181e   :  { %v1814_v17 = vpop.f32.mrb[46].mxu0 }
0x181f   :  { %v1815_v18 = vadd.f32 %v3709_v8, %v1814_v17  ;;  %v4122_v20 = vpop.f32.mrb[47].mxu0  ;;  %v1818_v21 = vadd.f32 %v1812_v14, %v1642_v44  ;;  %v3717_v44 = vld [vmem:[%s5497_s14 + $0x1] ss:$0 sm:$0xff] }
0x1821   :  { %v1824_v23 = vsel %vm98_vm0, %v1818_v21, 0.0  ;;  %v1819_v24 = vadd.f32 %v1815_v18, %v1643_v45 }
0x1822   :  { %1825 = vadd.xlane.f32.xlu0 %v1824_v23 }
0x1823   :  { %v1827_v25 = vsel %vm98_vm0, %v1819_v24, 0.0 }
0x1824   :  { %1828 = vadd.xlane.f32.xlu1 %v1827_v25 }
0x18af   :  { %v1826_v27 = vpop.xlane.xlu0 %1825 }
0x18b0   :  { %v1830_v28 = vmul.f32 0.03125, %v1826_v27 }
0x18b1   :  { %v1829_v10 = vpop.xlane.xlu1 %1828 }
0x18b2   :  { %v1832_v11 = vsub.f32 %v1818_v21, %v1830_v28  ;;  %v1831_v30 = vmul.f32 0.03125, %v1829_v10 }
0x18b4   :  { %v1833_v33 = vsub.f32 %v1819_v24, %v1831_v30  ;;  %v1834_v34 = vmul.f32 %v1832_v11, %v1832_v11 }
0x18b6   :  { %v1836_v47 = vsel %vm98_vm0, %v1834_v34, 0.0  ;;  %v1835_v35 = vmul.f32 %v1833_v33, %v1833_v33 }
0x18b7   :  { %1837 = vadd.xlane.f32.xlu0 %v1836_v47 }
0x18b8   :  { %v1839_v36 = vsel %vm98_vm0, %v1835_v35, 0.0 }
0x18b9   :  { %1840 = vadd.xlane.f32.xlu1 %v1839_v36 }
0x1944   :  { %v1838_v49 = vpop.xlane.xlu0 %1837 }
0x1945   :  { %v1842_v37 = vmul.f32 0.03125, %v1838_v49 }
0x1946   :  { %v1841_v38 = vpop.xlane.xlu1 %1840 }
0x1947   :  { %v1844_v40 = vadd.f32 1e-12, %v1842_v37  ;;  %v1843_v41 = vmul.f32 0.03125, %v1841_v38 }
0x1949   :  { %4422 = vrsqrt.f32 %v1844_v40  ;;  %v1845_v19 = vadd.f32 1e-12, %v1843_v41 }
0x194b   :  { %4424 = vrsqrt.f32 %v1845_v19 }
0x1953   :  { %v4423_v43 = vpop.eup %4422 }
0x1954   :  { %v1848_v45 = vmul.f32 %v4423_v43, %v1832_v11 }
0x1955   :  { %v4425_v46 = vpop.eup %4424 }
0x1956   :  { %v1856_v48 = vmul.f32 %v3717_v44, %v1848_v45  ;;  %v1849_v50 = vmul.f32 %v4425_v46, %v1833_v33 }
0x1958   :  { %v1857_v31 = vmul.f32 %v3717_v44, %v1849_v50  ;;  %v5107_v32 = vadd.f32 %v3718_v51, %v1856_v48 }
0x195a   :  { %v5109_v22 = vadd.f32 %v3718_v51, %v1857_v31 }
0x195c   :  { %v1876_v52 = vpack.c.bf16 %v5109_v22, %v5107_v32 }
0x195e   :  { %4128 = vmatmul.mubr.msk.bf16.vlgmr.msra.gmra.mrb[48].mxu1 %vm98_vm0, %v1876_v52 }
0x195f   :  { %4133 = vmatprep.mubr.msk.bf16.mxu1 %vm4584_vm1, %v4583_v15 }
0x1a31   :  { %v1934_v54 = vpop.f32.mrb[48].mxu1 }
0x1a32   :  { %v1935_v55 = vadd.f32 %v3724_v53, %v1934_v54  ;;  %v4129_v56 = vpop.f32.mrb[49].mxu1 }
0x1a33   :  { %v1937_v57 = vpop.f32.mrb[50].mxu1 }
0x1a34   :  { %v5119_v58 = vpack.c.bf16 %v1935_v55, %v1935_v55  ;;  %v1938_v59 = vadd.f32 %v3724_v53, %v1937_v57  ;;  %v4130_v60 = vpop.f32.mrb[51].mxu1 }
0x1a36   :  { %v5121_v61 = vpack.c.bf16 %v1938_v59, %v1938_v59  ;;  %1944 = vrot.lane.b32.xlu0 %v5119_v58, %s4585_s21 }
0x1a38   :  { %1993 = vrot.lane.b32.xlu1 %v5121_v61, %s4585_s21 }
0x1aa8   :  { %v1945_v62 = vpop.permute.xlu0 %1944 }
0x1aa9   :  { %v1950_v42 = vsel %vm227_vm2, %v1945_v62, 0 }
0x1aaa   :  { %4132 = vmatpush3.bf16.xpose.msra.mxu1 %v1950_v42  ;;  %v1994_v63 = vpop.permute.xlu1 %1993 }
0x1aab   :  { %v1999_v0 = vsel %vm227_vm2, %v1994_v63, 0  ;;  %4143 = vmatprep.subr.bf16.mxu1 %v4583_v15 }
0x1aac   :  { %4138 = vmatpush3.bf16.xpose.msra.mxu0 %v1999_v0 }
0x1aad   :  { %4149 = vmatprep.subr.bf16.mxu0 %v4583_v15 }
0x1ab1   :  { %4134 = vmatmul.mubr.msk.bf16.vlgmr.msra.gmra.mrb[52].mxu1 %vm227_vm2, %v5119_v58 }
0x1ab2   :  { %4145 = vmatprep.mubr.msk.bf16.mxu1 %vm4584_vm1, %v4583_v15 }
0x1ab3   :  { %4140 = vmatmul.mubr.msk.bf16.vlgmr.msra.gmra.mrb[48].mxu0 %vm227_vm2, %v5121_v61 }
0x1ab4   :  { %4151 = vmatprep.mubr.msk.bf16.mxu0 %vm4584_vm1, %v4583_v15 }
0x1b84   :  { %v1986_v1 = vpop.f32.mrb[52].mxu1 }
0x1b85   :  { %v1987_v3 = vadd.f32 %v5142_v2, %v1986_v1  ;;  %v4135_v4 = vpop.f32.mrb[53].mxu1 }
0x1b86   :  { %v1989_v5 = vpop.f32.mrb[54].mxu1  ;;  %v2035_v7 = vpop.f32.mrb[48].mxu0 }
0x1b87   :  { %v2036_v9 = vadd.f32 %v5148_v39, %v2035_v7  ;;  %v4136_v12 = vpop.f32.mrb[55].mxu1  ;;  %v4141_v13 = vpop.f32.mrb[49].mxu0  ;;  %v2041_v8 = vsel %vm323_vm3, %v1987_v3, -inf }
0x1b88   :  { %2042 = vmax.xlane.f32.xlu1 %v2041_v8  ;;  %v2038_v6 = vpop.f32.mrb[50].mxu0 }
0x1b89   :  { %v4142_v14 = vpop.f32.mrb[51].mxu0  ;;  %v2044_v16 = vsel %vm323_vm3, %v2036_v9, -inf }
0x1b8a   :  { %2045 = vmax.xlane.f32.xlu0 %v2044_v16 }
0x1b99   :  { %2113 = vrot.lane.b32.xlu1 %v5121_v61, %s4586_s29 }
0x1b9d   :  { %2163 = vrot.lane.b32.xlu1 %v5119_v58, %s4587_s30 }
0x1c15   :  { %v2043_v17 = vpop.xlane.xlu1 %2042 }
0x1c16   :  { %v2047_v18 = vsub.f32 %v1987_v3, %v2043_v17 }
0x1c17   :  { %v2046_v20 = vpop.xlane.xlu0 %2045 }
0x1c18   :  { %v2049_v21 = vmul.f32 1.442695, %v2047_v18  ;;  %v2048_v23 = vsub.f32 %v2036_v9, %v2046_v20 }
0x1c19   :  { %v2114_v24 = vpop.permute.xlu1 %2113 }
0x1c1a   :  { %4426 = vpow2.f32 %v2049_v21  ;;  %v2051_v25 = vmul.f32 1.442695, %v2048_v23  ;;  %v2119_v27 = vsel %vm353_vm4, %v2114_v24, 0 }
0x1c1b   :  { %4150 = vmatpush3.bf16.msra.mxu0 %v2119_v27 }
0x1c1c   :  { %4428 = vpow2.f32 %v2051_v25  ;;  %4161 = vmatprep.subr.bf16.mxu0 %v4583_v15 }
0x1c1d   :  { %v2164_v33 = vpop.permute.xlu1 %2163 }
0x1c1e   :  { %v2169_v41 = vsel %vm227_vm2, %v2164_v33, 0  ;;  %v4349_v33 = vld [vmem:[%s5489_s6 + $0x28] sm:$0xff]  }
0x1c24   :  { %v4427_v28 = vpop.eup %4426 }
0x1c25   :  { %v2053_v10 = vsel %vm323_vm3, %v4427_v28, 0.0 }
0x1c26   :  { %v4429_v11 = vpop.eup %4428  ;;  %2054 = vadd.xlane.f32.xlu0 %v2053_v10 }
0x1c27   :  { %v2056_v30 = vsel %vm323_vm3, %v4429_v11, 0.0 }
0x1c28   :  { %2057 = vadd.xlane.f32.xlu1 %v2056_v30  ;;  %v4348_v30 = vld [vmem:[%s5489_s6 + $0x20] sm:$0xff]  }
0x1c39   :  { %2213 = vrot.lane.b32.xlu1 %v5121_v61, %s4587_s30 }
0x1c3c   :  { %2065 = vrot.lane.b32.xlu0 %v5119_v58, %s4586_s29 }
0x1c3d   :  { %2211 = vrot.lane.b32.xlu1 %v5121_v61, %s4588_s0 }
0x1c40   :  { %2161 = vrot.lane.b32.xlu0 %v5119_v58, %s4588_s0 }
0x1cb3   :  { %v2055_v34 = vpop.xlane.xlu0 %2054 }
0x1cb4   :  { %4430 = vrcp.f32 %v2055_v34 }
0x1cb5   :  { %v2058_v47 = vpop.xlane.xlu1 %2057 }
0x1cb6   :  { %4432 = vrcp.f32 %v2058_v47 }
0x1cb7   :  { %v2066_v35 = vpop.permute.xlu0 %2065 }
0x1cb8   :  { %v2071_v36 = vsel %vm353_vm4, %v2066_v35, 0 }
0x1cb9   :  { %4144 = vmatpush3.bf16.msra.mxu1 %v2071_v36  ;;  %v2214_v40 = vpop.permute.xlu1 %2213 }
0x1cba   :  { %4155 = vmatprep.subr.bf16.mxu1 %v4583_v15  ;;  %v2219_v43 = vsel %vm227_vm2, %v2214_v40, 0 }
0x1cbb   :  { %v2162_v44 = vpop.permute.xlu0 %2161 }
0x1cbd   :  { %v2212_v45 = vpop.permute.xlu1 %2211 }
0x1cbe   :  { %v4431_v29 = vpop.eup %4430 }
0x1cbf   :  { %v2061_v26 = vmul.f32 %v4431_v29, %v4427_v28 }
0x1cc0   :  { %v4433_v49 = vpop.eup %4432 }
0x1cc1   :  { %v2062_v37 = vmul.f32 %v4433_v49, %v4429_v11  ;;  %v2063_v38 = vpack.c.bf16 %v2061_v26, %v2061_v26 }
0x1cc3   :  { %4146 = vmatmul.mubr.msk.bf16.vlgmr.msra.gmra.mrb[56].mxu1 %vm323_vm3, %v2063_v38  ;;  %v2064_v19 = vpack.c.bf16 %v2062_v37, %v2062_v37 }
0x1cc4   :  { %4156 = vmatpush3.bf16.xpose.msra.mxu1 %v2169_v41  ;;  %4157 = vmatprep.mubr.msk.bf16.mxu1 %vm4584_vm1, %v4583_v15 }
0x1cc5   :  { %4152 = vmatmul.mubr.msk.bf16.vlgmr.msra.gmra.mrb[52].mxu0 %vm323_vm3, %v2064_v19  ;;  %4167 = vmatprep.subr.bf16.mxu1 %v4583_v15 }
0x1cc6   :  { %4162 = vmatpush3.bf16.xpose.msra.mxu0 %v2219_v43  ;;  %4163 = vmatprep.mubr.msk.bf16.mxu0 %vm4584_vm1, %v4583_v15 }
0x1cc7   :  { %4173 = vmatprep.subr.bf16.mxu0 %v4583_v15 }
0x1ccb   :  { %4158 = vmatmul.mubr.msk.bf16.vlgmr.msra.gmra.mrb[60].mxu1 %vm227_vm2, %v2162_v44 }
0x1ccc   :  { %4169 = vmatprep.mubr.msk.bf16.mxu1 %vm4584_vm1, %v4583_v15 }
0x1ccd   :  { %4164 = vmatmul.mubr.msk.bf16.vlgmr.msra.gmra.mrb[56].mxu0 %vm227_vm2, %v2212_v45 }
0x1cce   :  { %4175 = vmatprep.mubr.msk.bf16.mxu0 %vm4584_vm1, %v4583_v15 }
0x1d96   :  { %v5187_v46 = vpop.f32.mrb[56].mxu1 }
0x1d97   :  { %v4147_v48 = vpop.f32.mrb[57].mxu1 }
0x1d98   :  { %v2110_v50 = vpop.f32.mrb[58].mxu1  ;;  %v5189_v51 = vpop.f32.mrb[52].mxu0  ;;  %v3741_v48 = vld [vmem:[%s5490_s7 + $0x2] ss:$0 sm:$0xff] }
0x1d99   :  { %v4148_v31 = vpop.f32.mrb[59].mxu1  ;;  %v4153_v52 = vpop.f32.mrb[53].mxu0 }
0x1d9a   :  { %v2158_v53 = vpop.f32.mrb[54].mxu0 }
0x1d9b   :  { %v4154_v54 = vpop.f32.mrb[55].mxu0 }
0x1d9e   :  { %v2205_v55 = vpop.f32.mrb[60].mxu1 }
0x1d9f   :  { %v2206_v56 = vadd.f32 %v5142_v2, %v2205_v55  ;;  %v4159_v57 = vpop.f32.mrb[61].mxu1 }
0x1da0   :  { %v2208_v59 = vpop.f32.mrb[62].mxu1  ;;  %v2255_v60 = vpop.f32.mrb[56].mxu0 }
0x1da1   :  { %v2256_v62 = vadd.f32 %v5148_v39, %v2255_v60  ;;  %v4160_v42 = vpop.f32.mrb[63].mxu1  ;;  %v4165_v63 = vpop.f32.mrb[57].mxu0  ;;  %v2261_v0 = vsel %vm323_vm3, %v2206_v56, -inf }
0x1da2   :  { %2262 = vmax.xlane.f32.xlu0 %v2261_v0  ;;  %v2258_v1 = vpop.f32.mrb[58].mxu0 }
0x1da3   :  { %v4166_v3 = vpop.f32.mrb[59].mxu0  ;;  %v2264_v4 = vsel %vm323_vm3, %v2256_v62, -inf }
0x1da4   :  { %2265 = vmax.xlane.f32.xlu1 %v2264_v4 }
0x1db5   :  { %2333 = vrot.lane.b32.xlu1 %v5121_v61, %s4589_s24 }
0x1e2f   :  { %v2263_v5 = vpop.xlane.xlu0 %2262 }
0x1e30   :  { %v2267_v7 = vsub.f32 %v2206_v56, %v2263_v5 }
0x1e31   :  { %v2266_v9 = vpop.xlane.xlu1 %2265 }
0x1e32   :  { %v2269_v12 = vmul.f32 1.442695, %v2267_v7  ;;  %v2268_v13 = vsub.f32 %v2256_v62, %v2266_v9  ;;  %v4350_v7 = vld [vmem:[%s5493_s10 + $0x20] sm:$0xff]   ;;  %v4351_v9 = vld [vmem:[%s5493_s10 + $0x28] sm:$0xff]  }
0x1e34   :  { %4434 = vpow2.f32 %v2269_v12  ;;  %v2271_v8 = vmul.f32 1.442695, %v2268_v13 }
0x1e35   :  { %v2334_v6 = vpop.permute.xlu1 %2333 }
0x1e36   :  { %4436 = vpow2.f32 %v2271_v8  ;;  %v2339_v14 = vsel %vm353_vm4, %v2334_v6, 0 }
0x1e37   :  { %4174 = vmatpush3.bf16.msra.mxu0 %v2339_v14 }
0x1e38   :  { %4187 = vmatprep.subr.bf16.mxu0 %v4583_v15 }
0x1e3e   :  { %v4435_v16 = vpop.eup %4434 }
0x1e3f   :  { %v2273_v17 = vsel %vm323_vm3, %v4435_v16, 0.0 }
0x1e40   :  { %v4437_v18 = vpop.eup %4436  ;;  %2274 = vadd.xlane.f32.xlu0 %v2273_v17 }
0x1e41   :  { %v2276_v61 = vsel %vm323_vm3, %v4437_v18, 0.0 }
0x1e44   :  { %2277 = vadd.xlane.f32.xlu0 %v2276_v61  ;;  %v3747_v61 = vld [vmem:[%s5491_s8 + $0x2] ss:$0 sm:$0xff] }
0x1e5a   :  { %2285 = vrot.lane.b32.xlu0 %v5119_v58, %s4589_s24 }
0x1ecd   :  { %v2275_v20 = vpop.xlane.xlu0 %2274 }
0x1ece   :  { %4438 = vrcp.f32 %v2275_v20 }
0x1ed1   :  { %v2278_v21 = vpop.xlane.xlu0 %2277 }
0x1ed2   :  { %4440 = vrcp.f32 %v2278_v21 }
0x1ed5   :  { %v2286_v23 = vpop.permute.xlu0 %2285 }
0x1ed6   :  { %v2291_v24 = vsel %vm353_vm4, %v2286_v23, 0 }
0x1ed7   :  { %4168 = vmatpush3.bf16.msra.mxu1 %v2291_v24  ;;  %v3748_v24 = vld [vmem:[%s5492_s9 + $0x2] ss:$0 sm:$0xff] }
0x1ed8   :  { %v4439_v25 = vpop.eup %4438  ;;  %4179 = vmatprep.subr.bf16.mxu1 %v4583_v15 }
0x1ed9   :  { %v2281_v27 = vmul.f32 %v4439_v25, %v4435_v16 }
0x1edb   :  { %v2283_v28 = vpack.c.bf16 %v2281_v27, %v2281_v27 }
0x1edc   :  { %v4441_v10 = vpop.eup %4440 }
0x1edd   :  { %v2282_v11 = vmul.f32 %v4441_v10, %v4437_v18  ;;  %4170 = vmatmul.mubr.msk.bf16.vlgmr.msra.gmra.mrb[64].mxu1 %vm323_vm3, %v2283_v28 }
0x1ede   :  { %4183 = vmatprep.mubr.msk.bf16.mxu1 %vm4584_vm1, %v4583_v15  ;;  %4180 = vmatpush3.bf16.msra.mxu1 %v4348_v30  ;;  %v4354_v30 = vld [vmem:[%s5495_s12 + $0x50] sm:$0xff]  }
0x1edf   :  { %v2284_v58 = vpack.c.bf16 %v2282_v11, %v2282_v11  ;;  %4181 = vmatprep.subr.bf16.mxu1 %v4583_v15  ;;  %v4352_v11 = vld [vmem:[%s5495_s12 + $0x40] sm:$0xff]  }
0x1ee1   :  { %4176 = vmatmul.mubr.msk.bf16.vlgmr.msra.gmra.mrb[60].mxu0 %vm323_vm3, %v2284_v58  ;;  %v4353_v58 = vld [vmem:[%s5495_s12 + $0x48] sm:$0xff]  }
0x1ee2   :  { %4191 = vmatprep.mubr.msk.bf16.mxu0 %vm4584_vm1, %v4583_v15  ;;  %4182 = vmatpush3.bf16.msra.mxu1 %v4349_v33  ;;  %v4355_v33 = vld [vmem:[%s5495_s12 + $0x58] sm:$0xff]  }
0x1ee3   :  { %4195 = vmatprep.subr.bf16.mxu1 %v4583_v15  ;;  %4188 = vmatpush3.bf16.msra.mxu0 %v4350_v7 }
0x1ee4   :  { %4189 = vmatprep.subr.bf16.mxu0 %v4583_v15 }
0x1ee7   :  { %4190 = vmatpush3.bf16.msra.mxu0 %v4351_v9 }
0x1ee8   :  { %4207 = vmatprep.subr.bf16.mxu0 %v4583_v15 }
0x1fb0   :  { %v2327_v34 = vpop.f32.mrb[64].mxu1 }
0x1fb1   :  { %v4171_v47 = vpop.f32.mrb[65].mxu1 }
0x1fb2   :  { %v2330_v35 = vpop.f32.mrb[66].mxu1 }
0x1fb3   :  { %v4172_v36 = vpop.f32.mrb[67].mxu1 }
0x1fb4   :  { %v2375_v29 = vpop.f32.mrb[60].mxu0 }
0x1fb5   :  { %v4316_v26 = vpack.i.bf16 %v2375_v29, %v2327_v34  ;;  %v4177_v49 = vpop.f32.mrb[61].mxu0  ;;  %v3754_v34 = vld [vmem:[%s5494_s11 + $0x2] ss:$0 sm:$0xff] }
0x1fb6   :  { %v2378_v37 = vpop.f32.mrb[62].mxu0 }
0x1fb7   :  { %4317 = vrot.lane.b32.xlu1 %v4316_v26, %s4590_s17  ;;  %v4178_v38 = vpop.f32.mrb[63].mxu0 }
0x2029   :  { %v4318_v40 = vpop.permute.xlu1 %4317 }
0x202a   :  { %v4320_v41 = vunpack.i.h.bf16 %v4318_v40  ;;  %v4319_v19 = vunpack.i.l.bf16 %v4318_v40 }
0x202c   :  { %v2390_v43 = vsel %vm227_vm2, %v5189_v51, %v4320_v41  ;;  %v2389_v44 = vsel %vm227_vm2, %v5187_v46, %v4319_v19 }
0x202d   :  { %v2396_v45 = vpack.c.bf16 %v2390_v43, %v2389_v44 }
0x202f   :  { %4184 = vmatmul.mubr.msk.bf16.vlgmr.msra.gmra.mrb[68].mxu1 %vm98_vm0, %v2396_v45 }
0x2030   :  { %4203 = vmatprep.mubr.msk.bf16.mxu1 %vm4584_vm1, %v4583_v15  ;;  %4196 = vmatpush3.bf16.msra.mxu1 %v4352_v11 }
0x2031   :  { %4197 = vmatprep.subr.bf16.mxu1 %v4583_v15 }
0x2034   :  { %4198 = vmatpush3.bf16.msra.mxu1 %v4353_v58  ;;  %v3775_v58 = vld [vmem:[%s5497_s14 + $0x2] ss:$0 sm:$0xff] }
0x2035   :  { %4199 = vmatprep.subr.bf16.mxu1 %v4583_v15 }
0x2038   :  { %4200 = vmatpush3.bf16.msra.mxu1 %v4354_v30 }
0x2039   :  { %4201 = vmatprep.subr.bf16.mxu1 %v4583_v15 }
0x203c   :  { %4202 = vmatpush3.bf16.msra.mxu1 %v4355_v33 }
0x203d   :  { %4221 = vmatprep.subr.bf16.mxu1 %v4583_v15 }
0x2102   :  { %v2454_v50 = vpop.f32.mrb[68].mxu1 }
0x2103   :  { %v2455_v31 = vadd.f32 %v3741_v48, %v2454_v50  ;;  %v4185_v52 = vpop.f32.mrb[69].mxu1 }
0x2104   :  { %v2457_v53 = vpop.f32.mrb[70].mxu1 }
0x2105   :  { %v2458_v54 = vadd.f32 %v3741_v48, %v2457_v53  ;;  %v4186_v55 = vpop.f32.mrb[71].mxu1  ;;  %v2461_v51 = vadd.f32 %v2455_v31, %v5107_v32 }
0x2107   :  { %v2467_v46 = vsel %vm98_vm0, %v2461_v51, 0.0  ;;  %v2462_v56 = vadd.f32 %v2458_v54, %v5109_v22 }
0x2108   :  { %2468 = vadd.xlane.f32.xlu1 %v2467_v46 }
0x2109   :  { %v2470_v57 = vsel %vm98_vm0, %v2462_v56, 0.0 }
0x210a   :  { %2471 = vadd.xlane.f32.xlu0 %v2470_v57 }
0x2195   :  { %v2469_v59 = vpop.xlane.xlu1 %2468 }
0x2196   :  { %v2473_v60 = vmul.f32 0.03125, %v2469_v59  ;;  %v3767_v59 = vld [vmem:[%s5496_s13 + $0x2] ss:$0 sm:$0xff] }
0x2197   :  { %v2472_v62 = vpop.xlane.xlu0 %2471 }
0x2198   :  { %v2475_v42 = vsub.f32 %v2461_v51, %v2473_v60  ;;  %v2474_v63 = vmul.f32 0.03125, %v2472_v62 }
0x219a   :  { %v2476_v0 = vsub.f32 %v2462_v56, %v2474_v63  ;;  %v2477_v1 = vmul.f32 %v2475_v42, %v2475_v42 }
0x219c   :  { %v2479_v3 = vsel %vm98_vm0, %v2477_v1, 0.0  ;;  %v2478_v4 = vmul.f32 %v2476_v0, %v2476_v0 }
0x219d   :  { %2480 = vadd.xlane.f32.xlu0 %v2479_v3 }
0x219e   :  { %v2482_v5 = vsel %vm98_vm0, %v2478_v4, 0.0 }
0x21a1   :  { %2483 = vadd.xlane.f32.xlu0 %v2482_v5 }
0x222a   :  { %v2481_v12 = vpop.xlane.xlu0 %2480 }
0x222b   :  { %v2485_v13 = vmul.f32 0.03125, %v2481_v12 }
0x222d   :  { %v2487_v8 = vadd.f32 1e-12, %v2485_v13 }
0x222e   :  { %v2484_v6 = vpop.xlane.xlu0 %2483 }
0x222f   :  { %4442 = vrsqrt.f32 %v2487_v8  ;;  %v2486_v14 = vmul.f32 0.03125, %v2484_v6 }
0x2231   :  { %v2488_v16 = vadd.f32 1e-12, %v2486_v14 }
0x2233   :  { %4444 = vrsqrt.f32 %v2488_v16 }
0x2239   :  { %v4443_v17 = vpop.eup %4442 }
0x223a   :  { %v2491_v18 = vmul.f32 %v4443_v17, %v2475_v42 }
0x223c   :  { %v2499_v21 = vmul.f32 %v3747_v61, %v2491_v18 }
0x223d   :  { %v4445_v20 = vpop.eup %4444 }
0x223e   :  { %v2492_v23 = vmul.f32 %v4445_v20, %v2476_v0  ;;  %v2507_v27 = vadd.f32 %v3748_v24, %v2499_v21  ;;  %v4356_v20 = vld [vmem:[%s5487_s4 + $0x30] sm:$0xff]   ;;  %v4357_v21 = vld [vmem:[%s5487_s4 + $0x38] sm:$0xff]  }
0x2240   :  { %v2500_v25 = vmul.f32 %v3747_v61, %v2492_v23 }
0x2242   :  { %v2508_v28 = vadd.f32 %v3748_v24, %v2500_v25 }
0x2244   :  { %v2514_v10 = vpack.c.bf16 %v2508_v28, %v2507_v27 }
0x2246   :  { %4192 = vmatmul.mubr.msk.bf16.vlgmr.msra.gmra.mrb[64].mxu0 %vm98_vm0, %v2514_v10 }
0x2247   :  { %4211 = vmatprep.mubr.msk.bf16.mxu0 %vm4584_vm1, %v4583_v15  ;;  %4208 = vmatpush3.bf16.msra.mxu0 %v4356_v20 }
0x2248   :  { %4209 = vmatprep.subr.bf16.mxu0 %v4583_v15 }
0x224b   :  { %4210 = vmatpush3.bf16.msra.mxu0 %v4357_v21 }
0x224c   :  { %4215 = vmatprep.subr.bf16.mxu0 %v4583_v15 }
0x2319   :  { %v2572_v47 = vpop.f32.mrb[64].mxu0 }
0x231a   :  { %v2573_v35 = vadd.f32 %v3754_v34, %v2572_v47  ;;  %v4193_v36 = vpop.f32.mrb[65].mxu0 }
0x231b   :  { %v2575_v29 = vpop.f32.mrb[66].mxu0 }
0x231c   :  { %v2581_v26 = vmul.f32 0.044715, %v2573_v35  ;;  %v2576_v49 = vadd.f32 %v3754_v34, %v2575_v29  ;;  %v4194_v37 = vpop.f32.mrb[67].mxu0  ;;  %v2579_v54 = vmul.f32 0.5, %v2573_v35 }
0x231d   :  { %v3782_v37 = vld [vmem:[%s5488_s5 + $0x3] ss:$0 sm:$0xff] }
0x231e   :  { %v2583_v38 = vmul.f32 %v2581_v26, %v2573_v35  ;;  %v2582_v40 = vmul.f32 0.044715, %v2576_v49  ;;  %v2580_v55 = vmul.f32 0.5, %v2576_v49 }
0x2320   :  { %v2585_v41 = vmul.f32 %v2583_v38, %v2573_v35  ;;  %v2584_v19 = vmul.f32 %v2582_v40, %v2576_v49 }
0x2322   :  { %v2587_v43 = vadd.f32 %v2585_v41, %v2573_v35  ;;  %v2586_v44 = vmul.f32 %v2584_v19, %v2576_v49  ;;  %v3776_v35 = vld [vmem:[%s5498_s15 + $0x2] ss:$0 sm:$0xff] }
0x2324   :  { %v2589_v45 = vmul.f32 0.7978846, %v2587_v43  ;;  %v2588_v48 = vadd.f32 %v2586_v44, %v2576_v49 }
0x2326   :  { %4446 = vtanh.f32 %v2589_v45  ;;  %v2590_v50 = vmul.f32 0.7978846, %v2588_v48 }
0x2328   :  { %4448 = vtanh.f32 %v2590_v50 }
0x2330   :  { %v4447_v31 = vpop.eup %4446 }
0x2331   :  { %v2593_v52 = vadd.f32 1.0, %v4447_v31 }
0x2332   :  { %v4449_v53 = vpop.eup %4448 }
0x2333   :  { %v2594_v51 = vadd.f32 1.0, %v4449_v53  ;;  %v2595_v46 = vmul.f32 %v2593_v52, %v2579_v54 }
0x2335   :  { %v2596_v56 = vmul.f32 %v2594_v51, %v2580_v55 }
0x2337   :  { %v2606_v57 = vpack.c.bf16 %v2596_v56, %v2595_v46 }
0x2339   :  { %4204 = vmatmul.mubr.msk.bf16.vlgmr.msra.gmra.mrb[72].mxu1 %vm915_vm5, %v2606_v57 }
0x233a   :  { %4223 = vmatprep.mubr.msk.bf16.mxu1 %vm4584_vm1, %v4583_v15 }
0x240c   :  { %v2676_v60 = vpop.f32.mrb[72].mxu1 }
0x240d   :  { %v2677_v62 = vadd.f32 %v3767_v59, %v2676_v60  ;;  %v4205_v42 = vpop.f32.mrb[73].mxu1 }
0x240e   :  { %v2679_v63 = vpop.f32.mrb[74].mxu1 }
0x240f   :  { %v2680_v0 = vadd.f32 %v3767_v59, %v2679_v63  ;;  %v4206_v1 = vpop.f32.mrb[75].mxu1  ;;  %v2683_v3 = vadd.f32 %v2677_v62, %v2507_v27 }
0x2411   :  { %v2689_v4 = vsel %vm98_vm0, %v2683_v3, 0.0  ;;  %v2684_v5 = vadd.f32 %v2680_v0, %v2508_v28 }
0x2412   :  { %2690 = vadd.xlane.f32.xlu1 %v2689_v4 }
0x2413   :  { %v2692_v7 = vsel %vm98_vm0, %v2684_v5, 0.0 }
0x2414   :  { %2693 = vadd.xlane.f32.xlu0 %v2692_v7 }
0x249f   :  { %v2691_v9 = vpop.xlane.xlu1 %2690 }
0x24a0   :  { %v2695_v12 = vmul.f32 0.03125, %v2691_v9 }
0x24a1   :  { %v2694_v13 = vpop.xlane.xlu0 %2693 }
0x24a2   :  { %v2697_v8 = vsub.f32 %v2683_v3, %v2695_v12  ;;  %v2696_v6 = vmul.f32 0.03125, %v2694_v13 }
0x24a4   :  { %v2698_v14 = vsub.f32 %v2684_v5, %v2696_v6  ;;  %v2699_v16 = vmul.f32 %v2697_v8, %v2697_v8 }
0x24a6   :  { %v2701_v17 = vsel %vm98_vm0, %v2699_v16, 0.0  ;;  %v2700_v18 = vmul.f32 %v2698_v14, %v2698_v14 }
0x24a7   :  { %2702 = vadd.xlane.f32.xlu1 %v2701_v17 }
0x24a8   :  { %v2704_v61 = vsel %vm98_vm0, %v2700_v18, 0.0 }
0x24a9   :  { %2705 = vadd.xlane.f32.xlu0 %v2704_v61 }
0x2534   :  { %v2703_v23 = vpop.xlane.xlu1 %2702 }
0x2535   :  { %v2707_v24 = vmul.f32 0.03125, %v2703_v23 }
0x2536   :  { %v2706_v25 = vpop.xlane.xlu0 %2705 }
0x2537   :  { %v2709_v27 = vadd.f32 1e-12, %v2707_v24  ;;  %v2708_v28 = vmul.f32 0.03125, %v2706_v25 }
0x2539   :  { %4450 = vrsqrt.f32 %v2709_v27  ;;  %v2710_v10 = vadd.f32 1e-12, %v2708_v28 }
0x253b   :  { %4452 = vrsqrt.f32 %v2710_v10 }
0x2543   :  { %v4451_v11 = vpop.eup %4450 }
0x2544   :  { %v2713_v30 = vmul.f32 %v4451_v11, %v2697_v8 }
0x2545   :  { %v4453_v33 = vpop.eup %4452 }
0x2546   :  { %v2721_v34 = vmul.f32 %v3775_v58, %v2713_v30  ;;  %v2714_v47 = vmul.f32 %v4453_v33, %v2698_v14 }
0x2548   :  { %v2722_v36 = vmul.f32 %v3775_v58, %v2714_v47  ;;  %v5296_v29 = vadd.f32 %v3776_v35, %v2721_v34 }
0x254a   :  { %v5298_v26 = vadd.f32 %v3776_v35, %v2722_v36 }
0x254c   :  { %v2740_v49 = vpack.c.bf16 %v5298_v26, %v5296_v29 }
0x254e   :  { %4212 = vmatmul.mubr.msk.bf16.vlgmr.msra.gmra.mrb[68].mxu0 %vm98_vm0, %v2740_v49 }
0x254f   :  { %4217 = vmatprep.mubr.msk.bf16.mxu0 %vm4584_vm1, %v4583_v15 }
0x2621   :  { %v2798_v38 = vpop.f32.mrb[68].mxu0 }
0x2622   :  { %v2799_v40 = vadd.f32 %v3782_v37, %v2798_v38  ;;  %v4213_v41 = vpop.f32.mrb[69].mxu0 }
0x2623   :  { %v2801_v19 = vpop.f32.mrb[70].mxu0 }
0x2624   :  { %v5308_v43 = vpack.c.bf16 %v2799_v40, %v2799_v40  ;;  %v2802_v44 = vadd.f32 %v3782_v37, %v2801_v19  ;;  %v4214_v45 = vpop.f32.mrb[71].mxu0 }
0x2626   :  { %v5310_v48 = vpack.c.bf16 %v2802_v44, %v2802_v44  ;;  %2808 = vrot.lane.b32.xlu1 %v5308_v43, %s4585_s21 }
0x2628   :  { %2857 = vrot.lane.b32.xlu0 %v5310_v48, %s4585_s21 }
0x2698   :  { %v2809_v50 = vpop.permute.xlu1 %2808 }
0x2699   :  { %v2814_v31 = vsel %vm227_vm2, %v2809_v50, 0 }
0x269a   :  { %4216 = vmatpush3.bf16.xpose.msra.mxu0 %v2814_v31  ;;  %v2858_v52 = vpop.permute.xlu0 %2857 }
0x269b   :  { %v2863_v53 = vsel %vm227_vm2, %v2858_v52, 0  ;;  %4227 = vmatprep.subr.bf16.mxu0 %v4583_v15 }
0x269c   :  { %4222 = vmatpush3.bf16.xpose.msra.mxu1 %v2863_v53 }
0x269d   :  { %4233 = vmatprep.subr.bf16.mxu1 %v4583_v15 }
0x26a1   :  { %4218 = vmatmul.mubr.msk.bf16.vlgmr.msra.gmra.mrb[72].mxu0 %vm227_vm2, %v5308_v43 }
0x26a2   :  { %4229 = vmatprep.mubr.msk.bf16.mxu0 %vm4584_vm1, %v4583_v15 }
0x26a3   :  { %4224 = vmatmul.mubr.msk.bf16.vlgmr.msra.gmra.mrb[76].mxu1 %vm227_vm2, %v5310_v48 }
0x26a4   :  { %4235 = vmatprep.mubr.msk.bf16.mxu1 %vm4584_vm1, %v4583_v15 }
0x2774   :  { %v2850_v54 = vpop.f32.mrb[72].mxu0 }
0x2775   :  { %v2851_v55 = vadd.f32 %v5142_v2, %v2850_v54  ;;  %v4219_v51 = vpop.f32.mrb[73].mxu0 }
0x2776   :  { %v2853_v46 = vpop.f32.mrb[74].mxu0  ;;  %v2899_v56 = vpop.f32.mrb[76].mxu1 }
0x2777   :  { %v2900_v57 = vadd.f32 %v5148_v39, %v2899_v56  ;;  %v4220_v59 = vpop.f32.mrb[75].mxu0  ;;  %v4225_v60 = vpop.f32.mrb[77].mxu1  ;;  %v2905_v62 = vsel %vm323_vm3, %v2851_v55, -inf }
0x2778   :  { %v2902_v42 = vpop.f32.mrb[78].mxu1  ;;  %2906 = vmax.xlane.f32.xlu1 %v2905_v62 }
0x2779   :  { %v4226_v63 = vpop.f32.mrb[79].mxu1  ;;  %v2908_v0 = vsel %vm323_vm3, %v2900_v57, -inf }
0x277a   :  { %2909 = vmax.xlane.f32.xlu0 %v2908_v0 }
0x2789   :  { %2929 = vrot.lane.b32.xlu1 %v5308_v43, %s4586_s29 }
0x2805   :  { %v2907_v1 = vpop.xlane.xlu1 %2906 }
0x2806   :  { %v2911_v3 = vsub.f32 %v2851_v55, %v2907_v1 }
0x2807   :  { %v2910_v4 = vpop.xlane.xlu0 %2909 }
0x2808   :  { %v2913_v5 = vmul.f32 1.442695, %v2911_v3  ;;  %v2912_v7 = vsub.f32 %v2900_v57, %v2910_v4 }
0x2809   :  { %v2930_v9 = vpop.permute.xlu1 %2929 }
0x280a   :  { %4454 = vpow2.f32 %v2913_v5  ;;  %v2915_v12 = vmul.f32 1.442695, %v2912_v7  ;;  %v2935_v13 = vsel %vm353_vm4, %v2930_v9, 0 }
0x280b   :  { %4228 = vmatpush3.bf16.msra.mxu0 %v2935_v13 }
0x280c   :  { %4456 = vpow2.f32 %v2915_v12  ;;  %4239 = vmatprep.subr.bf16.mxu0 %v4583_v15 }
0x2814   :  { %v4455_v8 = vpop.eup %4454 }
0x2815   :  { %v2917_v6 = vsel %vm323_vm3, %v4455_v8, 0.0 }
0x2816   :  { %v4457_v14 = vpop.eup %4456  ;;  %2918 = vadd.xlane.f32.xlu1 %v2917_v6 }
0x2817   :  { %v2920_v16 = vsel %vm323_vm3, %v4457_v14, 0.0 }
0x2818   :  { %2921 = vadd.xlane.f32.xlu0 %v2920_v16  ;;  %v4358_v16 = vld [vmem:[%s5489_s6 + $0x30] sm:$0xff]  }
0x2827   :  { %3027 = vrot.lane.b32.xlu1 %v5308_v43, %s4587_s30 }
0x282b   :  { %3077 = vrot.lane.b32.xlu1 %v5310_v48, %s4587_s30 }
0x282e   :  { %2977 = vrot.lane.b32.xlu0 %v5310_v48, %s4586_s29 }
0x282f   :  { %3025 = vrot.lane.b32.xlu1 %v5308_v43, %s4588_s0 }
0x2832   :  { %3075 = vrot.lane.b32.xlu0 %v5310_v48, %s4588_s0  ;;  %s4592_s0 = smov [#allocation8]  }
0x28a3   :  { %v2919_v17 = vpop.xlane.xlu1 %2918 }
0x28a4   :  { %4458 = vrcp.f32 %v2919_v17  ;;  %v4359_v17 = vld [vmem:[%s5489_s6 + $0x38] sm:$0xff]   ;;  %s3617_s6 = sshll.u32 %s4592_s0, 4  ;;  %s3618_s6 = int_to_ptr.vmem [resolvable:$true] %s3617_s6 }
0x28a5   :  { %v2922_v18 = vpop.xlane.xlu0 %2921  ;;  %p4555_p11 = scmp.lt.s32.totalorder %s3618_s6, %s3618_s6 }
0x28a6   :  { %4460 = vrcp.f32 %v2922_v18 }
0x28a7   :  { %v3028_v21 = vpop.permute.xlu1 %3027 }
0x28a8   :  { %v3033_v11 = vsel %vm227_vm2, %v3028_v21, 0 }
0x28a9   :  { %v2978_v61 = vpop.permute.xlu0 %2977 }
0x28aa   :  { %v2983_v20 = vsel %vm353_vm4, %v2978_v61, 0 }
0x28ab   :  { %4234 = vmatpush3.bf16.msra.mxu1 %v2983_v20  ;;  %v3078_v10 = vpop.permute.xlu1 %3077 }
0x28ac   :  { %4245 = vmatprep.subr.bf16.mxu1 %v4583_v15  ;;  %v3083_v30 = vsel %vm227_vm2, %v3078_v10, 0 }
0x28ad   :  { %v3076_v34 = vpop.permute.xlu0 %3075 }
0x28ae   :  { %v4459_v23 = vpop.eup %4458 }
0x28af   :  { %v2925_v24 = vmul.f32 %v4459_v23, %v4455_v8  ;;  %v3026_v33 = vpop.permute.xlu1 %3025 }
0x28b0   :  { %v4461_v25 = vpop.eup %4460 }
0x28b1   :  { %v2926_v27 = vmul.f32 %v4461_v25, %v4457_v14  ;;  %v2927_v28 = vpack.c.bf16 %v2925_v24, %v2925_v24 }
0x28b3   :  { %4230 = vmatmul.mubr.msk.bf16.vlgmr.msra.gmra.mrb[76].mxu0 %vm323_vm3, %v2927_v28  ;;  %v2928_v58 = vpack.c.bf16 %v2926_v27, %v2926_v27 }
0x28b4   :  { %4240 = vmatpush3.bf16.xpose.msra.mxu0 %v3033_v11  ;;  %4241 = vmatprep.mubr.msk.bf16.mxu0 %vm4584_vm1, %v4583_v15 }
0x28b5   :  { %4236 = vmatmul.mubr.msk.bf16.vlgmr.msra.gmra.mrb[80].mxu1 %vm323_vm3, %v2928_v58  ;;  %4251 = vmatprep.subr.bf16.mxu0 %v4583_v15 }
0x28b6   :  { %4246 = vmatpush3.bf16.xpose.msra.mxu1 %v3083_v30  ;;  %4247 = vmatprep.mubr.msk.bf16.mxu1 %vm4584_vm1, %v4583_v15 }
0x28b7   :  { %4257 = vmatprep.subr.bf16.mxu1 %v4583_v15 }
0x28bb   :  { %4242 = vmatmul.mubr.msk.bf16.vlgmr.msra.gmra.mrb[80].mxu0 %vm227_vm2, %v3026_v33 }
0x28bc   :  { %4253 = vmatprep.mubr.msk.bf16.mxu0 %vm4584_vm1, %v4583_v15 }
0x28bd   :  { %4248 = vmatmul.mubr.msk.bf16.vlgmr.msra.gmra.mrb[84].mxu1 %vm227_vm2, %v3076_v34 }
0x28be   :  { %4259 = vmatprep.mubr.msk.bf16.mxu1 %vm4584_vm1, %v4583_v15 }
0x2986   :  { %v5366_v47 = vpop.f32.mrb[76].mxu0 }
0x2987   :  { %v4231_v35 = vpop.f32.mrb[77].mxu0 }
0x2988   :  { %v2974_v36 = vpop.f32.mrb[78].mxu0  ;;  %v5368_v49 = vpop.f32.mrb[80].mxu1  ;;  %v3799_v35 = vld [vmem:[%s5490_s7 + $0x3] ss:$0 sm:$0xff] }
0x2989   :  { %v4232_v37 = vpop.f32.mrb[79].mxu0  ;;  %v4237_v38 = vpop.f32.mrb[81].mxu1 }
0x298a   :  { %v3022_v40 = vpop.f32.mrb[82].mxu1 }
0x298b   :  { %v4238_v41 = vpop.f32.mrb[83].mxu1 }
0x298e   :  { %v3069_v19 = vpop.f32.mrb[80].mxu0 }
0x298f   :  { %v3070_v44 = vadd.f32 %v5142_v2, %v3069_v19  ;;  %v4243_v45 = vpop.f32.mrb[81].mxu0 }
0x2990   :  { %v3072_v50 = vpop.f32.mrb[82].mxu0  ;;  %v3119_v31 = vpop.f32.mrb[84].mxu1 }
0x2991   :  { %v3120_v52 = vadd.f32 %v5148_v39, %v3119_v31  ;;  %v4244_v53 = vpop.f32.mrb[83].mxu0  ;;  %v4249_v54 = vpop.f32.mrb[85].mxu1  ;;  %v3125_v55 = vsel %vm323_vm3, %v3070_v44, -inf }
0x2992   :  { %v3122_v51 = vpop.f32.mrb[86].mxu1  ;;  %3126 = vmax.xlane.f32.xlu1 %v3125_v55 }
0x2993   :  { %v4250_v46 = vpop.f32.mrb[87].mxu1  ;;  %v3128_v56 = vsel %vm323_vm3, %v3120_v52, -inf }
0x2994   :  { %3129 = vmax.xlane.f32.xlu0 %v3128_v56 }
0x29a3   :  { %3149 = vrot.lane.b32.xlu1 %v5308_v43, %s4589_s24 }
0x2a1f   :  { %v3127_v57 = vpop.xlane.xlu1 %3126 }
0x2a20   :  { %v3131_v2 = vsub.f32 %v3070_v44, %v3127_v57 }
0x2a21   :  { %v3130_v59 = vpop.xlane.xlu0 %3129 }
0x2a22   :  { %v3133_v60 = vmul.f32 1.442695, %v3131_v2  ;;  %v3132_v62 = vsub.f32 %v3120_v52, %v3130_v59  ;;  %v4360_v2 = vld [vmem:[%s5493_s10 + $0x30] sm:$0xff]   ;;  %v4361_v59 = vld [vmem:[%s5493_s10 + $0x38] sm:$0xff]  }
0x2a23   :  { %v3150_v42 = vpop.permute.xlu1 %3149 }
0x2a24   :  { %4462 = vpow2.f32 %v3133_v60  ;;  %v3135_v39 = vmul.f32 1.442695, %v3132_v62  ;;  %v3155_v63 = vsel %vm353_vm4, %v3150_v42, 0 }
0x2a25   :  { %4252 = vmatpush3.bf16.msra.mxu0 %v3155_v63 }
0x2a26   :  { %4464 = vpow2.f32 %v3135_v39  ;;  %4263 = vmatprep.subr.bf16.mxu0 %v4583_v15 }
0x2a2e   :  { %v4463_v0 = vpop.eup %4462 }
0x2a2f   :  { %v3137_v1 = vsel %vm323_vm3, %v4463_v0, 0.0 }
0x2a30   :  { %v4465_v3 = vpop.eup %4464  ;;  %3138 = vadd.xlane.f32.xlu0 %v3137_v1 }
0x2a31   :  { %v3140_v43 = vsel %vm323_vm3, %v4465_v3, 0.0 }
0x2a34   :  { %3141 = vadd.xlane.f32.xlu0 %v3140_v43 }
0x2a4a   :  { %3197 = vrot.lane.b32.xlu0 %v5310_v48, %s4589_s24 }
0x2abd   :  { %v3139_v4 = vpop.xlane.xlu0 %3138 }
0x2abe   :  { %4466 = vrcp.f32 %v3139_v4 }
0x2ac1   :  { %v3142_v5 = vpop.xlane.xlu0 %3141 }
0x2ac2   :  { %4468 = vrcp.f32 %v3142_v5 }
0x2ac5   :  { %v3198_v7 = vpop.permute.xlu0 %3197 }
0x2ac6   :  { %v3203_v9 = vsel %vm353_vm4, %v3198_v7, 0 }
0x2ac7   :  { %4258 = vmatpush3.bf16.msra.mxu1 %v3203_v9  ;;  %v3806_v9 = vld [vmem:[%s5492_s9 + $0x3] ss:$0 sm:$0xff] }
0x2ac8   :  { %v4467_v12 = vpop.eup %4466  ;;  %4271 = vmatprep.subr.bf16.mxu1 %v4583_v15 }
0x2ac9   :  { %v3145_v13 = vmul.f32 %v4467_v12, %v4463_v0 }
0x2acb   :  { %v3147_v8 = vpack.c.bf16 %v3145_v13, %v3145_v13 }
0x2acc   :  { %v4469_v6 = vpop.eup %4468 }
0x2acd   :  { %v3146_v14 = vmul.f32 %v4469_v6, %v4465_v3  ;;  %4254 = vmatmul.mubr.msk.bf16.vlgmr.msra.gmra.mrb[84].mxu0 %vm323_vm3, %v3147_v8  ;;  %v3805_v3 = vld [vmem:[%s5491_s8 + $0x3] ss:$0 sm:$0xff] }
0x2ace   :  { %4267 = vmatprep.mubr.msk.bf16.mxu0 %vm4584_vm1, %v4583_v15  ;;  %4264 = vmatpush3.bf16.msra.mxu0 %v4358_v16  ;;  %v4364_v16 = vld [vmem:[%s5495_s12 + $0x70] sm:$0xff]  }
0x2acf   :  { %v3148_v48 = vpack.c.bf16 %v3146_v14, %v3146_v14  ;;  %4265 = vmatprep.subr.bf16.mxu0 %v4583_v15  ;;  %v4362_v14 = vld [vmem:[%s5495_s12 + $0x60] sm:$0xff]  }
0x2ad1   :  { %4260 = vmatmul.mubr.msk.bf16.vlgmr.msra.gmra.mrb[88].mxu1 %vm323_vm3, %v3148_v48  ;;  %v4363_v48 = vld [vmem:[%s5495_s12 + $0x68] sm:$0xff]  }
0x2ad2   :  { %4275 = vmatprep.mubr.msk.bf16.mxu1 %vm4584_vm1, %v4583_v15  ;;  %4266 = vmatpush3.bf16.msra.mxu0 %v4359_v17  ;;  %v4365_v17 = vld [vmem:[%s5495_s12 + $0x78] sm:$0xff]  }
0x2ad3   :  { %4279 = vmatprep.subr.bf16.mxu0 %v4583_v15  ;;  %4272 = vmatpush3.bf16.msra.mxu1 %v4360_v2 }
0x2ad4   :  { %4273 = vmatprep.subr.bf16.mxu1 %v4583_v15 }
0x2ad7   :  { %4274 = vmatpush3.bf16.msra.mxu1 %v4361_v59 }
0x2ba0   :  { %v3191_v18 = vpop.f32.mrb[84].mxu0 }
0x2ba1   :  { %v4255_v61 = vpop.f32.mrb[85].mxu0 }
0x2ba2   :  { %v3194_v20 = vpop.f32.mrb[86].mxu0 }
0x2ba3   :  { %v4256_v21 = vpop.f32.mrb[87].mxu0 }
0x2ba4   :  { %v3239_v23 = vpop.f32.mrb[88].mxu1 }
0x2ba5   :  { %v4321_v24 = vpack.i.bf16 %v3239_v23, %v3191_v18  ;;  %v4261_v25 = vpop.f32.mrb[89].mxu1  ;;  %v3812_v18 = vld [vmem:[%s5494_s11 + $0x3] ss:$0 sm:$0xff] }
0x2ba6   :  { %v3242_v27 = vpop.f32.mrb[90].mxu1 }
0x2ba7   :  { %v4262_v28 = vpop.f32.mrb[91].mxu1  ;;  %4322 = vrot.lane.b32.xlu1 %v4321_v24, %s4590_s17 }
0x2c19   :  { %v4323_v10 = vpop.permute.xlu1 %4322 }
0x2c1a   :  { %v4325_v11 = vunpack.i.h.bf16 %v4323_v10  ;;  %v4324_v58 = vunpack.i.l.bf16 %v4323_v10 }
0x2c1c   :  { %v3254_v30 = vsel %vm227_vm2, %v5368_v49, %v4325_v11  ;;  %v3253_v33 = vsel %vm227_vm2, %v5366_v47, %v4324_v58 }
0x2c1d   :  { %v3260_v34 = vpack.c.bf16 %v3254_v30, %v3253_v33 }
0x2c1f   :  { %4268 = vmatmul.mubr.msk.bf16.vlgmr.msra.gmra.mrb[88].mxu0 %vm98_vm0, %v3260_v34 }
0x2c20   :  { %4287 = vmatprep.mubr.msk.bf16.mxu0 %vm4584_vm1, %v4583_v15  ;;  %4280 = vmatpush3.bf16.msra.mxu0 %v4362_v14 }
0x2c21   :  { %4281 = vmatprep.subr.bf16.mxu0 %v4583_v15 }
0x2c24   :  { %4282 = vmatpush3.bf16.msra.mxu0 %v4363_v48 }
0x2c25   :  { %4283 = vmatprep.subr.bf16.mxu0 %v4583_v15 }
0x2c28   :  { %4284 = vmatpush3.bf16.msra.mxu0 %v4364_v16 }
0x2c29   :  { %4285 = vmatprep.subr.bf16.mxu0 %v4583_v15 }
0x2c2c   :  { %4286 = vmatpush3.bf16.msra.mxu0 %v4365_v17 }
0x2cf2   :  { %v3318_v36 = vpop.f32.mrb[88].mxu0 }
0x2cf3   :  { %v3319_v37 = vadd.f32 %v3799_v35, %v3318_v36  ;;  %v4269_v38 = vpop.f32.mrb[89].mxu0 }
0x2cf4   :  { %v3321_v40 = vpop.f32.mrb[90].mxu0 }
0x2cf5   :  { %v3325_v41 = vadd.f32 %v3319_v37, %v5296_v29  ;;  %v3322_v49 = vadd.f32 %v3799_v35, %v3321_v40  ;;  %v4270_v19 = vpop.f32.mrb[91].mxu0 }
0x2cf7   :  { %v3326_v47 = vadd.f32 %v3322_v49, %v5298_v26  ;;  %v3331_v44 = vsel %vm98_vm0, %v3325_v41, 0.0 }
0x2cf8   :  { %3332 = vadd.xlane.f32.xlu1 %v3331_v44 }
0x2cf9   :  { %v3334_v45 = vsel %vm98_vm0, %v3326_v47, 0.0 }
0x2cfa   :  { %3335 = vadd.xlane.f32.xlu0 %v3334_v45  ;;  %v3825_v45 = vld [vmem:[%s5496_s13 + $0x3] ss:$0 sm:$0xff]  ;;  %s4591_s13 = smov 32  }
0x2d85   :  { %v3333_v50 = vpop.xlane.xlu1 %3332 }
0x2d86   :  { %v3337_v31 = vmul.f32 0.03125, %v3333_v50 }
0x2d87   :  { %v3336_v52 = vpop.xlane.xlu0 %3335 }
0x2d88   :  { %v3339_v53 = vsub.f32 %v3325_v41, %v3337_v31  ;;  %v3338_v54 = vmul.f32 0.03125, %v3336_v52 }
0x2d8a   :  { %v3340_v55 = vsub.f32 %v3326_v47, %v3338_v54  ;;  %v3341_v51 = vmul.f32 %v3339_v53, %v3339_v53 }
0x2d8c   :  { %v3343_v46 = vsel %vm98_vm0, %v3341_v51, 0.0  ;;  %v3342_v56 = vmul.f32 %v3340_v55, %v3340_v55 }
0x2d8d   :  { %3344 = vadd.xlane.f32.xlu0 %v3343_v46 }
0x2d8e   :  { %v3346_v57 = vsel %vm98_vm0, %v3342_v56, 0.0 }
0x2d8f   :  { %3347 = vadd.xlane.f32.xlu1 %v3346_v57 }
0x2e1a   :  { %v3345_v60 = vpop.xlane.xlu0 %3344 }
0x2e1b   :  { %v3349_v62 = vmul.f32 0.03125, %v3345_v60 }
0x2e1c   :  { %v3348_v42 = vpop.xlane.xlu1 %3347 }
0x2e1d   :  { %v3351_v39 = vadd.f32 1e-12, %v3349_v62  ;;  %v3350_v63 = vmul.f32 0.03125, %v3348_v42 }
0x2e1f   :  { %4470 = vrsqrt.f32 %v3351_v39  ;;  %v3352_v0 = vadd.f32 1e-12, %v3350_v63 }
0x2e21   :  { %4472 = vrsqrt.f32 %v3352_v0 }
0x2e29   :  { %v4471_v1 = vpop.eup %4470 }
0x2e2a   :  { %v3355_v43 = vmul.f32 %v4471_v1, %v3339_v53 }
0x2e2b   :  { %v4473_v4 = vpop.eup %4472 }
0x2e2c   :  { %v3363_v5 = vmul.f32 %v3805_v3, %v3355_v43  ;;  %v3356_v7 = vmul.f32 %v4473_v4, %v3340_v55  ;;  %v1867_v43 = vrot.slane %v5109_v22, 7 }
0x2e2e   :  { %v3364_v12 = vmul.f32 %v3805_v3, %v3356_v7  ;;  %v3371_v13 = vadd.f32 %v3806_v9, %v3363_v5  ;;  %v1870_v4 = vsel %vm1869_vm6, %v5107_v32, %v1867_v43  ;;  %v2732_v5 = vrot.slane %v5298_v26, 7  ;;  %v3833_v26 = vld [vmem:[%s5497_s14 + $0x3] ss:$0 sm:$0xff]  ;;  %s4550_s14 = scalar_lea.vmem %s3618_s6, 32 }
0x2e2f   :  { %p4551_p10 = scmp.ne.s32.totalorder %s3618_s6, %s4550_s14  ;;  %p4556_p12 = scmp.lt.s32.totalorder %s4550_s14, %s4550_s14 }
0x2e30   :  { %v3372_v8 = vadd.f32 %v3806_v9, %v3364_v12  ;;  %v2734_v7 = vsel %vm1869_vm6, %v5296_v29, %v2732_v5 }
0x2e31   :  { %p4557_p13 = por %p4556_p12, %p4555_p11 }
0x2e32   :  { %v3378_v6 = vpack.c.bf16 %v3372_v8, %v3371_v13 }
0x2e33   :  { %p4558_p0 = pnand %p4557_p13, %p4551_p10 }
0x2e34   :  { %4276 = vmatmul.mubr.msk.bf16.vlgmr.msra.gmra.mrb[92].mxu1 %vm98_vm0, %v3378_v6 }
0x2f07   :  { %v3436_v61 = vpop.f32.mrb[92].mxu1 }
0x2f08   :  { %v3437_v20 = vadd.f32 %v3812_v18, %v3436_v61  ;;  %v4277_v21 = vpop.f32.mrb[93].mxu1 }
0x2f09   :  { %v3439_v23 = vpop.f32.mrb[94].mxu1 }
0x2f0a   :  { %v3445_v24 = vmul.f32 0.044715, %v3437_v20  ;;  %v3440_v25 = vadd.f32 %v3812_v18, %v3439_v23  ;;  %v4278_v27 = vpop.f32.mrb[95].mxu1  ;;  %v3443_v40 = vmul.f32 0.5, %v3437_v20  ;;  %v3834_v18 = vld [vmem:[%s5498_s15 + $0x3] ss:$0 sm:$0xff] }
0x2f0c   :  { %v3447_v28 = vmul.f32 %v3445_v24, %v3437_v20  ;;  %v3446_v10 = vmul.f32 0.044715, %v3440_v25  ;;  %v3444_v41 = vmul.f32 0.5, %v3440_v25 }
0x2f0e   :  { %v3449_v11 = vmul.f32 %v3447_v28, %v3437_v20  ;;  %v3448_v58 = vmul.f32 %v3446_v10, %v3440_v25 }
0x2f10   :  { %v3451_v30 = vadd.f32 %v3449_v11, %v3437_v20  ;;  %v3450_v33 = vmul.f32 %v3448_v58, %v3440_v25 }
0x2f12   :  { %v3453_v34 = vmul.f32 0.7978846, %v3451_v30  ;;  %v3452_v15 = vadd.f32 %v3450_v33, %v3440_v25 }
0x2f14   :  { %4474 = vtanh.f32 %v3453_v34  ;;  %v3454_v35 = vmul.f32 0.7978846, %v3452_v15 }
0x2f16   :  { %4476 = vtanh.f32 %v3454_v35 }
0x2f1e   :  { %v4475_v36 = vpop.eup %4474 }
0x2f1f   :  { %v3457_v37 = vadd.f32 1.0, %v4475_v36 }
0x2f20   :  { %v4477_v38 = vpop.eup %4476 }
0x2f21   :  { %v3458_v49 = vadd.f32 1.0, %v4477_v38  ;;  %v3459_v19 = vmul.f32 %v3457_v37, %v3443_v40 }
0x2f23   :  { %v3460_v47 = vmul.f32 %v3458_v49, %v3444_v41 }
0x2f25   :  { %v3470_v44 = vpack.c.bf16 %v3460_v47, %v3459_v19 }
0x2f27   :  { %4288 = vmatmul.mubr.msk.bf16.vlgmr.msra.gmra.mrb[92].mxu0 %vm915_vm5, %v3470_v44 }
0x2ffa   :  { %v3540_v50 = vpop.f32.mrb[92].mxu0 }
0x2ffb   :  { %v3541_v31 = vadd.f32 %v3825_v45, %v3540_v50  ;;  %v4289_v52 = vpop.f32.mrb[93].mxu0 }
0x2ffc   :  { %v3543_v53 = vpop.f32.mrb[94].mxu0 }
0x2ffd   :  { %v3547_v54 = vadd.f32 %v3541_v31, %v3371_v13  ;;  %v3544_v55 = vadd.f32 %v3825_v45, %v3543_v53  ;;  %v4290_v51 = vpop.f32.mrb[95].mxu0 }
0x2fff   :  { %v3548_v46 = vadd.f32 %v3544_v55, %v3372_v8  ;;  %v3553_v56 = vsel %vm98_vm0, %v3547_v54, 0.0 }
0x3000   :  { %3554 = vadd.xlane.f32.xlu1 %v3553_v56 }
0x3001   :  { %v3556_v57 = vsel %vm98_vm0, %v3548_v46, 0.0 }
0x3002   :  { %3557 = vadd.xlane.f32.xlu0 %v3556_v57 }
0x308d   :  { %v3555_v2 = vpop.xlane.xlu1 %3554 }
0x308e   :  { %v3559_v59 = vmul.f32 0.03125, %v3555_v2 }
0x308f   :  { %v3558_v60 = vpop.xlane.xlu0 %3557 }
0x3090   :  { %v3561_v62 = vsub.f32 %v3547_v54, %v3559_v59  ;;  %v3560_v42 = vmul.f32 0.03125, %v3558_v60 }
0x3092   :  { %v3562_v39 = vsub.f32 %v3548_v46, %v3560_v42  ;;  %v3563_v63 = vmul.f32 %v3561_v62, %v3561_v62 }
0x3094   :  { %v3565_v0 = vsel %vm98_vm0, %v3563_v63, 0.0  ;;  %v3564_v1 = vmul.f32 %v3562_v39, %v3562_v39 }
0x3095   :  { %3566 = vadd.xlane.f32.xlu1 %v3565_v0 }
0x3096   :  { %v3568_v3 = vsel %vm98_vm0, %v3564_v1, 0.0 }
0x3097   :  { %3569 = vadd.xlane.f32.xlu0 %v3568_v3 }
0x30a6   :  { %3604 = vrot.lane.b32.xlu1 %v1870_v4, %s4586_s29 }
0x30ad   :  { %3600 = vrot.lane.b32.xlu0 %v2734_v7, %s4591_s13 }
0x3122   :  { %v3567_v9 = vpop.xlane.xlu1 %3566 }
0x3123   :  { %v3571_v12 = vmul.f32 0.03125, %v3567_v9 }
0x3124   :  { %v3570_v13 = vpop.xlane.xlu0 %3569 }
0x3125   :  { %v3573_v8 = vadd.f32 1e-12, %v3571_v12  ;;  %v3572_v6 = vmul.f32 0.03125, %v3570_v13 }
0x3126   :  { %v3605_v25 = vpop.permute.xlu1 %3604 }
0x3127   :  { %4478 = vrsqrt.f32 %v3573_v8  ;;  %v3574_v22 = vadd.f32 1e-12, %v3572_v6 }
0x3128   :  { %v3601_v24 = vpop.permute.xlu0 %3600 }
0x3129   :  { %4480 = vrsqrt.f32 %v3574_v22 }
0x3131   :  { %v4479_v14 = vpop.eup %4478 }
0x3132   :  { %v3577_v48 = vmul.f32 %v4479_v14, %v3561_v62 }
0x3133   :  { %v4481_v32 = vpop.eup %4480 }
0x3134   :  { %v3578_v16 = vmul.f32 %v4481_v32, %v3562_v39  ;;  %v3585_v17 = vmul.f32 %v3833_v26, %v3577_v48 }
0x3136   :  { %v3586_v29 = vmul.f32 %v3833_v26, %v3578_v16  ;;  %v3593_v20 = vadd.f32 %v3834_v18, %v3585_v17 }
0x3138   :  { %v3594_v61 = vadd.f32 %v3834_v18, %v3586_v29 }
0x313a   :  { %v3596_v21 = vrot.slane %v3594_v61, 7 }
0x313c   :  { %v3598_v23 = vsel %vm1869_vm6, %v3593_v20, %v3596_v21 }
0x313d   :  { %v3607_v27 = vsel %vm98_vm0, %v3598_v23, %v3601_v24 }
0x313e   :  { %v3608_v28 = vsel %vm915_vm5, %v3607_v27, %v3605_v25 }
0x313f   :  { %3610 = vst.msk [vmem:[#allocation8] sm:$0x3] %vm3609_vm7, %v3608_v28 }
0x3140   :  { %4561 = shalt.err (!%p4558_p0)
}
0x3141   :  { %s4562_s7 = scalar_lea.hbm %s5499_s16, 32 }
0x3142   :  { %p4563_p1 = scmp.ne.s32.totalorder %s5499_s16, %s4562_s7  ;;  %p4566_p2 = scmp.lt.u32.totalorder %s4562_s7, %s5499_s16 }
0x3144   :  { %p4568_p3 = pnand %p4566_p2, %p4563_p1 }
0x3146   :  { %4571 = shalt.err (!%p4568_p3)
}
0x3147   :  { %3620 = dma.vmem_to_hbm [thread:$0]  %s3618_s6, 32, %s5499_s16, [#allocation4]  }
0x3148   :  { %4576 = dma.done.wait [#allocation4], 32  }
0x3149   :  { %4577 = vsyncadd [#allocation4], 4294967264 }
0x314a   :  { %3624 = vsyncpa [#allocation3], 1 }
0x314b   :  { %3625 = vsyncpa [#allocation6], 1 }
0x314c   :  { %3626 = vsyncpa [#allocation4], 1 }

</bundles_post_ra>
